<compile_context>
chip_gen: v7x
topology: tpu7x:2x2x1
jax: 0.10.0
libtpu: 0.0.40
codegen_flags: <defaults>
</compile_context>

<pallas_src>
import functools

import jax
import jax.numpy as jnp
from jax.experimental import pallas as pl
from jax.experimental.pallas import tpu as pltpu


def add_ln_linear_kernel(x1_ref, x2_ref, w_ref, c_ref, o_ref, *, precision=None):
    x = x1_ref[...] + x2_ref[...]                       # (tm, H) f32
    inv_h = 1.0 / x.shape[-1]
    # One-pass mean/variance: two independent cross-lane reductions.
    s1 = jnp.sum(x, axis=-1, keepdims=True)
    s2 = jnp.sum(x * x, axis=-1, keepdims=True)
    mean = s1 * inv_h
    var = jnp.maximum(s2 * inv_h - mean * mean, 0.0)    # clamp: no NaN from rsqrt
    xn = (x - mean) * jax.lax.rsqrt(var + 1e-12)
    # gamma folded into w_ref, beta & bias folded into c_ref.
    out = jnp.dot(xn, w_ref[...], preferred_element_type=jnp.float32,
                  precision=precision)
    o_ref[...] = out + c_ref[...]


def fold_params(gamma, beta, weight, bias):
    """Fold LayerNorm affine + Linear bias into the Linear weight (done ONCE
    at init).  `weight` is PyTorch layout (out_features, in_features)."""
    w_fold_t = jnp.asarray((weight * gamma[None, :]).T, dtype=jnp.float32)  # (in,out)
    c_fold = jnp.asarray(weight @ beta + bias, dtype=jnp.float32)           # (out,)
    return w_fold_t, c_fold


def _device_kind():
    try:
        return jax.devices()[0].device_kind.lower()
    except Exception:
        return ""


def _pick_tm(R, kind):
    prefs = (128, 96, 192, 384) if "v5" in kind else (192, 384, 128, 96)
    for t in prefs:
        if R % t == 0:
            return t
    return R


def _build_call(R, H, H_out, tm, semantics, buffered, precision):
    def const_spec(shape):
        if buffered:
            return pl.BlockSpec(shape, lambda i: (0, 0),
                                pipeline_mode=pl.Buffered(1))
        return pl.BlockSpec(shape, lambda i: (0, 0))

    kernel = functools.partial(add_ln_linear_kernel, precision=precision)
    return pl.pallas_call(
        kernel,
        out_shape=jax.ShapeDtypeStruct((R, H_out), jnp.float32),
        grid_spec=pltpu.PrefetchScalarGridSpec(
            num_scalar_prefetch=0,
            grid=(R // tm,),
            in_specs=[
                pl.BlockSpec((tm, H), lambda i: (i, 0)),   # x153 tile
                pl.BlockSpec((tm, H), lambda i: (i, 0)),   # x149 tile
                const_spec((H, H_out)),                    # W'ᵀ (resident)
                const_spec((1, H_out)),                    # folded bias c
            ],
            out_specs=pl.BlockSpec((tm, H_out), lambda i: (i, 0)),
        ),
        compiler_params=pltpu.CompilerParams(
            dimension_semantics=(semantics,)),
    )


def add_layernorm_linear(x153, x149, w_fold_t, c_fold, *, tm=None, precision=None):
    """x153, x149: (B, S, H).  w_fold_t: (H_in, H_out) gamma-folded W^T.
    c_fold: (H_out,) folded beta@W^T + bias.  Returns (B, S, H_out)."""
    B, S, H = x153.shape
    H_in, H_out = w_fold_t.shape
    assert H_in == H
    R = B * S

    kind = _device_kind()
    if tm is None:
        tm = _pick_tm(R, kind)
    assert R % tm == 0 and H % 128 == 0 and H_out % 128 == 0

    x1 = x153.reshape(R, H).astype(jnp.float32)
    x2 = x149.reshape(R, H).astype(jnp.float32)
    w2 = w_fold_t.astype(jnp.float32)
    c2 = c_fold.reshape(1, H_out).astype(jnp.float32)

    # Preferred config first; fall back if the installed lowering rejects
    # CORE_PARALLEL (single-TC chips) or pipeline_mode=Buffered(1).
    configs = []
    if "v7" in kind and (R // tm) >= 2:
        configs += [(pltpu.CORE_PARALLEL, True), (pltpu.CORE_PARALLEL, False)]
    configs += [(pltpu.PARALLEL, True), (pltpu.PARALLEL, False)]

    last_err = None
    for semantics, buffered in configs:
        try:
            fn = _build_call(R, H, H_out, tm, semantics, buffered, precision)
            out = jax.block_until_ready(fn(x1, x2, w2, c2))
            return out.reshape(B, S, H_out)
        except Exception as e:     # lowering/runtime rejection -> next config
            last_err = e
    raise last_err


def reference(x153, x149, gamma, beta, weight, bias):
    x = x153 + x149
    mean = jnp.mean(x, axis=-1, keepdims=True)
    var = jnp.mean((x - mean) ** 2, axis=-1, keepdims=True)
    xn = (x - mean) / jnp.sqrt(var + 1e-12)
    y = xn * gamma + beta
    return jnp.einsum("bsh,oh->bso", y, weight) + bias


if __name__ == "__main__":
    B, S, H = 1, 384, 256
    key = jax.random.PRNGKey(0)
    k1, k2, kg, kb, k3, k4, k5, k6 = jax.random.split(key, 8)

    x153 = jax.random.normal(k1, (B, S, H), dtype=jnp.float32)
    x149 = jax.random.normal(k2, (B, S, H), dtype=jnp.float32)

    # Synthetic parameters (PyTorch shapes).  Non-trivial gamma/beta so the
    # constant-fold path is actually exercised against the unfused reference.
    gamma = jax.random.uniform(kg, (H,), minval=0.5, maxval=1.5,
                               dtype=jnp.float32)        # LayerNorm weight
    beta = 0.1 * jax.random.normal(kb, (H,), dtype=jnp.float32)  # LayerNorm bias
    bound = 1.0 / (H ** 0.5)
    weight = jax.random.uniform(k3, (H, H), minval=-bound, maxval=bound,
                                dtype=jnp.float32)       # Linear weight (out,in)
    bias = jax.random.uniform(k4, (H,), minval=-bound, maxval=bound,
                              dtype=jnp.float32)         # Linear bias

    # Fold gamma/beta/bias into the weight ONCE at init.
    w_fold_t, c_fold = fold_params(gamma, beta, weight, bias)

    out = add_layernorm_linear(x153, x149, w_fold_t, c_fold)
    jax.block_until_ready(out)

    ref = reference(x153, x149, gamma, beta, weight, bias)
    assert out.shape == (B, S, H)
    assert jnp.allclose(out, ref, atol=1e-4, rtol=1e-4), "mismatch vs reference"

    # Extra guard: rectangular Linear (256 -> 384) through the same kernel
    # (square weights hide W vs W^T mix-ups).
    H_out2 = 384
    weight2 = jax.random.uniform(k5, (H_out2, H), minval=-bound, maxval=bound,
                                 dtype=jnp.float32)
    bias2 = jax.random.uniform(k6, (H_out2,), minval=-bound, maxval=bound,
                               dtype=jnp.float32)
    w_fold_t2, c_fold2 = fold_params(gamma, beta, weight2, bias2)
    out2 = add_layernorm_linear(x153, x149, w_fold_t2, c_fold2)
    jax.block_until_ready(out2)
    ref2 = reference(x153, x149, gamma, beta, weight2, bias2)
    assert out2.shape == (B, S, H_out2)
    assert jnp.allclose(out2, ref2, atol=1e-4, rtol=1e-4), "rect mismatch"

    print("KERNEL_OK")
</pallas_src>

<mosaic_0001>
module attributes {stable_mosaic.version = 11 : i64} {
  func.func @add_ln_linear_kernel(%arg0: i32, %arg1: memref<192x256xf32, #tpu.memory_space<vmem>>, %arg2: memref<192x256xf32, #tpu.memory_space<vmem>>, %arg3: memref<256x256xf32, #tpu.memory_space<vmem>>, %arg4: memref<1x256xf32, #tpu.memory_space<vmem>>, %arg5: memref<192x256xf32, #tpu.memory_space<vmem>>) attributes {dimension_semantics = [#tpu.dimension_semantics<parallel>], iteration_bounds = array<i64: 2>, scalar_prefetch = 0 : i64, scratch_operands = 0 : i64, tpu.core_type = #tpu.core_type<tc>, window_params = [{transform_indices = @transform_0, window_bounds = array<i64: 192, 256>}, {transform_indices = @transform_1, window_bounds = array<i64: 192, 256>}, {pipeline_mode = #tpu.pipeline_mode<synchronous>, transform_indices = @transform_2, window_bounds = array<i64: 256, 256>}, {pipeline_mode = #tpu.pipeline_mode<synchronous>, transform_indices = @transform_3, window_bounds = array<i64: 1, 256>}, {transform_indices = @transform_4, window_bounds = array<i64: 192, 256>}]} {
    %c0 = arith.constant 0 : index
    %c0_0 = arith.constant 0 : index
    %0 = vector.load %arg1[%c0, %c0_0] : memref<192x256xf32, #tpu.memory_space<vmem>>, vector<192x256xf32>
    %c0_1 = arith.constant 0 : index
    %c0_2 = arith.constant 0 : index
    %1 = vector.load %arg2[%c0_1, %c0_2] : memref<192x256xf32, #tpu.memory_space<vmem>>, vector<192x256xf32>
    %2 = arith.addf %0, %1 : vector<192x256xf32>
    %cst = arith.constant dense<0.000000e+00> : vector<192xf32>
    %3 = vector.multi_reduction <add>, %2, %cst [1] : vector<192x256xf32> to vector<192xf32>
    %4 = vector.shape_cast %3 : vector<192xf32> to vector<192x1xf32>
    %5 = arith.mulf %2, %2 : vector<192x256xf32>
    %cst_3 = arith.constant dense<0.000000e+00> : vector<192xf32>
    %6 = vector.multi_reduction <add>, %5, %cst_3 [1] : vector<192x256xf32> to vector<192xf32>
    %7 = vector.shape_cast %6 : vector<192xf32> to vector<192x1xf32>
    %cst_4 = arith.constant 3.906250e-03 : f32
    %8 = vector.broadcast %cst_4 : f32 to vector<192x1xf32>
    %9 = arith.mulf %4, %8 : vector<192x1xf32>
    %cst_5 = arith.constant 3.906250e-03 : f32
    %10 = vector.broadcast %cst_5 : f32 to vector<192x1xf32>
    %11 = arith.mulf %7, %10 : vector<192x1xf32>
    %12 = arith.mulf %9, %9 : vector<192x1xf32>
    %13 = arith.subf %11, %12 : vector<192x1xf32>
    %cst_6 = arith.constant 0.000000e+00 : f32
    %14 = vector.broadcast %cst_6 : f32 to vector<192x1xf32>
    %15 = arith.maximumf %13, %14 : vector<192x1xf32>
    %16 = vector.broadcast %9 : vector<192x1xf32> to vector<192x256xf32>
    %17 = arith.subf %2, %16 : vector<192x256xf32>
    %cst_7 = arith.constant 9.99999996E-13 : f32
    %18 = vector.broadcast %cst_7 : f32 to vector<192x1xf32>
    %19 = arith.addf %15, %18 : vector<192x1xf32>
    %20 = math.rsqrt %19 : vector<192x1xf32>
    %21 = vector.broadcast %20 : vector<192x1xf32> to vector<192x256xf32>
    %22 = arith.mulf %17, %21 : vector<192x256xf32>
    %c0_8 = arith.constant 0 : index
    %c0_9 = arith.constant 0 : index
    %23 = vector.load %arg3[%c0_8, %c0_9] : memref<256x256xf32, #tpu.memory_space<vmem>>, vector<256x256xf32>
    %cst_10 = arith.constant dense<0.000000e+00> : vector<192x256xf32>
    %24 = tpu.matmul %22, %23, %cst_10 {dimension_numbers = #tpu.dot_dimension_numbers<[1], [0], [0], [1], [0, 0, 1, 1], [], []>} : vector<192x256xf32>, vector<256x256xf32>, vector<192x256xf32> -> vector<192x256xf32>
    %c0_11 = arith.constant 0 : index
    %c0_12 = arith.constant 0 : index
    %25 = vector.load %arg4[%c0_11, %c0_12] : memref<1x256xf32, #tpu.memory_space<vmem>>, vector<1x256xf32>
    %26 = vector.broadcast %25 : vector<1x256xf32> to vector<192x256xf32>
    %27 = arith.addf %24, %26 : vector<192x256xf32>
    %c0_13 = arith.constant 0 : index
    %c0_14 = arith.constant 0 : index
    %28 = vector.load %arg5[%c0_13, %c0_14] : memref<192x256xf32, #tpu.memory_space<vmem>>, vector<192x256xf32>
    tpu.vector_store %arg5[%c0_13, %c0_14], %27 {strides = array<i32>} : memref<192x256xf32, #tpu.memory_space<vmem>>, vector<192x256xf32>,
    return
  }
  func.func @transform_0(%arg0: i32) -> (i32, i32) {
    %c0_i32 = arith.constant 0 : i32
    %c0_i32_0 = arith.constant 0 : i32
    return %arg0, %c0_i32 : i32, i32
  }
  func.func @transform_1(%arg0: i32) -> (i32, i32) {
    %c0_i32 = arith.constant 0 : i32
    %c0_i32_0 = arith.constant 0 : i32
    return %arg0, %c0_i32 : i32, i32
  }
  func.func @transform_2(%arg0: i32) -> (i32, i32) {
    %c0_i32 = arith.constant 0 : i32
    %c0_i32_0 = arith.constant 0 : i32
    %c0_i32_1 = arith.constant 0 : i32
    return %c0_i32, %c0_i32_0 : i32, i32
  }
  func.func @transform_3(%arg0: i32) -> (i32, i32) {
    %c0_i32 = arith.constant 0 : i32
    %c0_i32_0 = arith.constant 0 : i32
    %c0_i32_1 = arith.constant 0 : i32
    return %c0_i32, %c0_i32_0 : i32, i32
  }
  func.func @transform_4(%arg0: i32) -> (i32, i32) {
    %c0_i32 = arith.constant 0 : i32
    %c0_i32_0 = arith.constant 0 : i32
    return %arg0, %c0_i32 : i32, i32
  }
}

module attributes {stable_mosaic.version = 11 : i64} {
  func.func @add_ln_linear_kernel(%arg0: i32, %arg1: memref<192x256xf32, #tpu.memory_space<vmem>>, %arg2: memref<192x256xf32, #tpu.memory_space<vmem>>, %arg3: memref<256x256xf32, #tpu.memory_space<vmem>>, %arg4: memref<1x256xf32, #tpu.memory_space<vmem>>, %arg5: memref<192x256xf32, #tpu.memory_space<vmem>>) attributes {dimension_semantics = [#tpu.dimension_semantics<parallel>], iteration_bounds = array<i64: 2>, scalar_prefetch = 0 : i64, scratch_operands = 0 : i64, tpu.core_type = #tpu.core_type<tc>, window_params = [{transform_indices = @transform_0, window_bounds = array<i64: 192, 256>}, {transform_indices = @transform_1, window_bounds = array<i64: 192, 256>}, {pipeline_mode = #tpu.pipeline_mode<synchronous>, transform_indices = @transform_2, window_bounds = array<i64: 256, 256>}, {pipeline_mode = #tpu.pipeline_mode<synchronous>, transform_indices = @transform_3, window_bounds = array<i64: 1, 256>}, {transform_indices = @transform_4, window_bounds = array<i64: 192, 256>}]} {
    %c0 = arith.constant 0 : index
    %c0_0 = arith.constant 0 : index
    %0 = vector.load %arg1[%c0, %c0_0] : memref<192x256xf32, #tpu.memory_space<vmem>>, vector<192x256xf32>
    %c0_1 = arith.constant 0 : index
    %c0_2 = arith.constant 0 : index
    %1 = vector.load %arg2[%c0_1, %c0_2] : memref<192x256xf32, #tpu.memory_space<vmem>>, vector<192x256xf32>
    %2 = arith.addf %0, %1 : vector<192x256xf32>
    %cst = arith.constant dense<0.000000e+00> : vector<192xf32>
    %3 = vector.multi_reduction <add>, %2, %cst [1] : vector<192x256xf32> to vector<192xf32>
    %4 = vector.shape_cast %3 : vector<192xf32> to vector<192x1xf32>
    %5 = arith.mulf %2, %2 : vector<192x256xf32>
    %cst_3 = arith.constant dense<0.000000e+00> : vector<192xf32>
    %6 = vector.multi_reduction <add>, %5, %cst_3 [1] : vector<192x256xf32> to vector<192xf32>
    %7 = vector.shape_cast %6 : vector<192xf32> to vector<192x1xf32>
    %cst_4 = arith.constant 3.906250e-03 : f32
    %8 = vector.broadcast %cst_4 : f32 to vector<192x1xf32>
    %9 = arith.mulf %4, %8 : vector<192x1xf32>
    %cst_5 = arith.constant 3.906250e-03 : f32
    %10 = vector.broadcast %cst_5 : f32 to vector<192x1xf32>
    %11 = arith.mulf %7, %10 : vector<192x1xf32>
    %12 = arith.mulf %9, %9 : vector<192x1xf32>
    %13 = arith.subf %11, %12 : vector<192x1xf32>
    %cst_6 = arith.constant 0.000000e+00 : f32
    %14 = vector.broadcast %cst_6 : f32 to vector<192x1xf32>
    %15 = arith.maximumf %13, %14 : vector<192x1xf32>
    %16 = vector.broadcast %9 : vector<192x1xf32> to vector<192x256xf32>
    %17 = arith.subf %2, %16 : vector<192x256xf32>
    %cst_7 = arith.constant 9.99999996E-13 : f32
    %18 = vector.broadcast %cst_7 : f32 to vector<192x1xf32>
    %19 = arith.addf %15, %18 : vector<192x1xf32>
    %20 = math.rsqrt %19 : vector<192x1xf32>
    %21 = vector.broadcast %20 : vector<192x1xf32> to vector<192x256xf32>
    %22 = arith.mulf %17, %21 : vector<192x256xf32>
    %c0_8 = arith.constant 0 : index
    %c0_9 = arith.constant 0 : index
    %23 = vector.load %arg3[%c0_8, %c0_9] : memref<256x256xf32, #tpu.memory_space<vmem>>, vector<256x256xf32>
    %cst_10 = arith.constant dense<0.000000e+00> : vector<192x256xf32>
    %24 = tpu.matmul %22, %23, %cst_10 {dimension_numbers = #tpu.dot_dimension_numbers<[1], [0], [0], [1], [0, 0, 1, 1], [], []>} : vector<192x256xf32>, vector<256x256xf32>, vector<192x256xf32> -> vector<192x256xf32>
    %c0_11 = arith.constant 0 : index
    %c0_12 = arith.constant 0 : index
    %25 = vector.load %arg4[%c0_11, %c0_12] : memref<1x256xf32, #tpu.memory_space<vmem>>, vector<1x256xf32>
    %26 = vector.broadcast %25 : vector<1x256xf32> to vector<192x256xf32>
    %27 = arith.addf %24, %26 : vector<192x256xf32>
    %c0_13 = arith.constant 0 : index
    %c0_14 = arith.constant 0 : index
    %28 = vector.load %arg5[%c0_13, %c0_14] : memref<192x256xf32, #tpu.memory_space<vmem>>, vector<192x256xf32>
    tpu.vector_store %arg5[%c0_13, %c0_14], %27 {strides = array<i32>} : memref<192x256xf32, #tpu.memory_space<vmem>>, vector<192x256xf32>,
    return
  }
  func.func @transform_0(%arg0: i32) -> (i32, i32) {
    %c0_i32 = arith.constant 0 : i32
    %c0_i32_0 = arith.constant 0 : i32
    return %arg0, %c0_i32 : i32, i32
  }
  func.func @transform_1(%arg0: i32) -> (i32, i32) {
    %c0_i32 = arith.constant 0 : i32
    %c0_i32_0 = arith.constant 0 : i32
    return %arg0, %c0_i32 : i32, i32
  }
  func.func @transform_2(%arg0: i32) -> (i32, i32) {
    %c0_i32 = arith.constant 0 : i32
    %c0_i32_0 = arith.constant 0 : i32
    %c0_i32_1 = arith.constant 0 : i32
    return %c0_i32, %c0_i32_0 : i32, i32
  }
  func.func @transform_3(%arg0: i32) -> (i32, i32) {
    %c0_i32 = arith.constant 0 : i32
    %c0_i32_0 = arith.constant 0 : i32
    %c0_i32_1 = arith.constant 0 : i32
    return %c0_i32, %c0_i32_0 : i32, i32
  }
  func.func @transform_4(%arg0: i32) -> (i32, i32) {
    %c0_i32 = arith.constant 0 : i32
    %c0_i32_0 = arith.constant 0 : i32
    return %arg0, %c0_i32 : i32, i32
  }
}

</mosaic_0001>

<bundles_post_ra>
// kernel: tpu_custom_call.1
= control target key start
LH: loop header
LB: loop body
LE: loop exit
PB: predicated region body
PF: predicated region fallthrough
CT: control target
= control target key end

     0   :  { %s2651_s0 = inlined_call_operand.hbm [shape: f32[384,256], index: 0, kind: input, shape index: {}]   ;;  %s2652_s1 = inlined_call_operand.hbm [shape: f32[384,256], index: 1, kind: input, shape index: {}]   ;;  %s2653_s2 = inlined_call_operand.hbm [shape: f32[256,256], index: 2, kind: input, shape index: {}]   ;;  %s2654_s3 = inlined_call_operand.vmem [shape: f32[1,256], index: 3, kind: input, shape index: {}]   ;;  %s2655_s4 = inlined_call_operand.hbm [shape: f32[384,256], index: 4, kind: output, shape index: {}]  }
   0x1   :  { %2672 = sst [smem:[#allocation25_spill]] %s2651_s0 }
   0x2   :  { %9 = vsyncpa [#allocation3], 0 }
   0x3   :  { %11 = vsyncpa [#allocation3 + $0x1], 0 }
   0x4   :  { %12 = vsyncpa [#allocation6], 0 }
   0x5   :  { %14 = vsyncpa [#allocation6 + $0x1], 0 }
   0x6   :  { %15 = vsyncpa [#allocation4], 0 }
   0x7   :  { %17 = vsyncpa [#allocation4 + $0x1], 0  ;;  %s1761_s15 = smov 0   ;;  %s1763_s16 = smov 0  }
   0x8   :  { %s1765_s17 = smov 0   ;;  %s1767_s18 = smov 0  }
   0x9 LB: > { %s1782_s19 = sadd.s32 4294967295, %s1726_s18   ;;  %s1328_s20 = sadd.s32 4294967294, %s1726_s18   ;;  %s1726_s18 = sphi %s1767_s18, %s2716_s18   ;;  %s1722_s17 = sphi %s1765_s17, %s2715_s17   ;;  %s1718_s16 = sphi %s1763_s16, %s2714_s16   ;;  %s1714_s15 = sphi %s1761_s15, %s2713_s15  }
   0xa   : > { %p43_p0 = scmp.ne.s32.totalorder %s1718_s16, %s1714_s15  ;;  %p2656_p1 = scmp.eq.s32.totalorder %s1782_s19, 0 }
   0xb   : > { %p141_p3 = scmp.eq.s32.totalorder %s1328_s20, 1  ;;  %p1329_p5 = scmp.ge.s32.totalorder %s1726_s18, 1 }
   0xc   : > { %p1791_p4 = por %p2656_p1, %p43_p0  ;;  %p148_p7 = scmp.lt.s32.totalorder %s1726_s18, 3 }
   0xd   : > { %p1796_p6 = por %p141_p3, %p43_p0  ;;  %s1728_s24 = smov [#allocation7]  }
   0xe   : > { %s2673_s21 = scalar_select %p1791_p4, 1, 0 }
   0xf   : > { %s2674_s22 = scalar_select %p1796_p6, 1, 0 }
  0x10   : > { %p1801_p8 = pnand %p1329_p5, %p148_p7  ;;  %s160_s25 = sshll.u32 %s1728_s24, 4  ;;  %s1805_s25 = int_to_ptr.vmem [resolvable:$true] %s160_s25 }
  0x11   : > { %s1817_s27 = sadd.s32 1, %s1726_s18   ;;  %s30_s28 = sadd.s32 1, %s1722_s17 }
  0x12   : > { %s2675_s23 = scalar_select %p1801_p8, 1, 0 }
  0x13   : > { %p1460_p9 = pneg %p1801_p8  ;;  %s27_s29 = ssub.s32 %s1726_s18, %s1817_s27 }
  0x14   : > { %s1564_s6 = scalar_lea.hbm %s2653_s2, 8192 }
  0x15   : > { %p1812_p11 = pnand %p1460_p9, %p2656_p1  ;;  %p1565_p12 = scmp.ne.s32.totalorder %s2653_s2, %s1564_s6 }
  0x16   : > { %p1571_p5 = scmp.lt.u32.totalorder %s1564_s6, %s2653_s2 }
  0x17   : > { %p1566_p13 = pneg %p1812_p11 }
  0x19   : > { %p1567_p0 = pnand %p1566_p13, %p1565_p12 }
  0x1b   : > { %p1568_p3 = pneg %p1567_p0 }
  0x1d   : > { %p1573_p7 = pnand %p1571_p5, %p1568_p3 }
  0x1f   : > { %1576 = shalt.err (!%p1573_p7)
}
  0x20   : > { %s1577_s11 = scalar_lea.vmem %s1805_s25, 8192  ;;  %p1585_p2 = scmp.lt.s32.totalorder %s1805_s25, %s1805_s25 }
  0x21   : > { %p1578_p9 = scmp.ne.s32.totalorder %s1805_s25, %s1577_s11  ;;  %p1586_p6 = scmp.lt.s32.totalorder %s1577_s11, %s1577_s11 }
  0x23   : > { %p1580_p10 = pnand %p1578_p9, %p1566_p13  ;;  %p1587_p4 = por %p1586_p6, %p1585_p2 }
  0x25   : > { %p1581_p1 = pneg %p1580_p10 }
  0x27   : > { %p1588_p8 = pnand %p1587_p4, %p1581_p1 }
  0x29   : > { %1591 = shalt.err (!%p1588_p8)
}
  0x2a   : > { %s1729_s12 = smov 256   ;;  %s1730_s13 = smov 16  }
  0x2b   : > { %1463 = dma.hbm_to_vmem [thread:$0]  (!%p1812_p11), %s2653_s2, 8192, %s1805_s25, [#allocation6], %s1729_s12, %s1729_s12, %s1730_s13  }
  0x2c   : > { %p28_p1 = scmp.eq.s32.totalorder %s27_s29, 0  ;;  %p37_p2 = scmp.ne.s32.totalorder %s1722_s17, %s1718_s16 }
  0x2d   : > { %p38_p4 = scmp.eq.s32.totalorder %s1726_s18, 0  ;;  %p1476_p6 = scmp.lt.s32.totalorder %s1726_s18, 2 }
  0x2e   : > { %s1851_s24 = scalar_select %p28_p1, %s1722_s17, %s30_s28  }
  0x2f   : > { %p39_p8 = por %p38_p4, %p37_p2  ;;  %p2677_p10 = scmp.eq.s32.totalorder %s1782_s19, 1 }
  0x30   : > { %s177_s26 = sand.u32 1, %s1722_s17   ;;  %s2659_s5 = smul.u32 6144, %s1726_s18 }
  0x31   : > { %p1855_p12 = por %p2677_p10, %p37_p2  ;;  %s1861_s6 = smul.u32 384, %s177_s26 }
  0x32   : > { %s2679_s0 = sld [smem:[#allocation25_spill]]  ;;  %p1870_p11 = pnand %p1476_p6, %p39_p8 }
  0x33   : > { %s181_s9 = scalar_lea.vmem [#allocation2], %s1861_s6  ;;  %s1878_s11 = scalar_lea.sflag [#allocation3], %s177_s26 }
  0x34   : > { %s189_s10 = sshll.u32 %s181_s9, 4  ;;  %p1594_p0 = pneg %p1870_p11  ;;  %s1876_s10 = int_to_ptr.vmem [resolvable:$true] %s189_s10 }
  0x38   : > { %s1868_s25 = scalar_lea.hbm %s2679_s0, %s2659_s5  ;;  %s1597_s8 = scalar_lea.hbm %s2679_s0, 12288 }
  0x39   : > { %s1592_s14 = scalar_lea.hbm %s1868_s25, 6144  ;;  %p1598_p7 = scmp.lt.u32.totalorder %s1868_s25, %s2679_s0 }
  0x3a   : > { %p1593_p13 = scmp.ne.s32.totalorder %s1868_s25, %s1592_s14  ;;  %p1599_p9 = scmp.lt.u32.totalorder %s1597_s8, %s1592_s14 }
  0x3b   : > { %p1601_p2 = scmp.lt.u32.totalorder %s1592_s14, %s1868_s25 }
  0x3c   : > { %p1595_p3 = pnand %p1594_p0, %p1593_p13  ;;  %p1600_p1 = por %p1599_p9, %p1598_p7 }
  0x3e   : > { %p1596_p5 = pneg %p1595_p3  ;;  %p1602_p4 = por %p1601_p2, %p1600_p1 }
  0x40   : > { %p1603_p6 = pnand %p1602_p4, %p1596_p5 }
  0x42   : > { %1606 = shalt.err (!%p1603_p6)
}
  0x43   : > { %s1607_s26 = scalar_lea.vmem %s1876_s10, 6144  ;;  %s1731_s9 = smov [#allocation2]  }
  0x44   : > { %p1608_p8 = scmp.ne.s32.totalorder %s1876_s10, %s1607_s26  ;;  %s1612_s20 = sshll.u32 %s1731_s9, 4  ;;  %s1613_s20 = int_to_ptr.vmem [resolvable:$false] %s1612_s20 }
  0x45   : > { %s1614_s5 = scalar_lea.vmem %s1613_s20, 12288  ;;  %p1615_p3 = scmp.lt.s32.totalorder %s1876_s10, %s1613_s20 }
  0x46   : > { %p1610_p10 = pnand %p1608_p8, %p1594_p0  ;;  %p1616_p7 = scmp.lt.s32.totalorder %s1614_s5, %s1607_s26 }
  0x48   : > { %p1611_p13 = pneg %p1610_p10  ;;  %p1617_p9 = por %p1616_p7, %p1615_p3 }
  0x4a   : > { %p1618_p1 = pnand %p1617_p9, %p1611_p13 }
  0x4c   : > { %1621 = shalt.err (!%p1618_p1)
}
  0x4d   : > { %1467 = dma.hbm_to_vmem [thread:$0]  (!%p1870_p11), %s1868_s25, 6144, %s1876_s10, %s1878_s11, %s1729_s12, %s1729_s12, %s1730_s13  }
  0x4e   : > { %s2681_s29 = smul.u32 6144, %s1726_s18  ;;  %s203_s26 = scalar_lea.vmem [#allocation5], %s1861_s6 }
  0x4f   : > { %s211_s9 = sshll.u32 %s203_s26, 4  ;;  %s2682_s20 = sand.u32 1, %s1726_s18   ;;  %s1917_s9 = int_to_ptr.vmem [resolvable:$true] %s211_s9 }
  0x50   : > { %s1914_s8 = scalar_lea.hbm %s2652_s1, %s2681_s29  ;;  %s1921_s5 = scalar_lea.sflag [#allocation6], %s2682_s20 }
  0x51   : > { %s1622_s0 = scalar_lea.hbm %s1914_s8, 6144  ;;  %s1627_s11 = scalar_lea.hbm %s2652_s1, 12288 }
  0x52   : > { %p1623_p5 = scmp.ne.s32.totalorder %s1914_s8, %s1622_s0  ;;  %p1628_p6 = scmp.lt.u32.totalorder %s1914_s8, %s2652_s1 }
  0x53   : > { %p1629_p8 = scmp.lt.u32.totalorder %s1627_s11, %s1622_s0  ;;  %p1631_p13 = scmp.lt.u32.totalorder %s1622_s0, %s1914_s8 }
  0x54   : > { %p1625_p2 = pnand %p1623_p5, %p1594_p0 }
  0x55   : > { %p1630_p10 = por %p1629_p8, %p1628_p6 }
  0x56   : > { %p1626_p4 = pneg %p1625_p2 }
  0x57   : > { %p1632_p3 = por %p1631_p13, %p1630_p10 }
  0x59   : > { %p1633_p7 = pnand %p1632_p3, %p1626_p4 }
  0x5b   : > { %1636 = shalt.err (!%p1633_p7)
}
  0x5c   : > { %s1637_s6 = scalar_lea.vmem %s1917_s9, 6144  ;;  %s1732_s7 = smov [#allocation5]  }
  0x5d   : > { %p1638_p9 = scmp.ne.s32.totalorder %s1917_s9, %s1637_s6  ;;  %s1642_s26 = sshll.u32 %s1732_s7, 4  ;;  %s1643_s26 = int_to_ptr.vmem [resolvable:$false] %s1642_s26 }
  0x5e   : > { %s1644_s20 = scalar_lea.vmem %s1643_s26, 12288  ;;  %p1645_p2 = scmp.lt.s32.totalorder %s1917_s9, %s1643_s26 }
  0x5f   : > { %p1640_p1 = pnand %p1638_p9, %p1594_p0  ;;  %p1646_p6 = scmp.lt.s32.totalorder %s1644_s20, %s1637_s6 }
  0x61   : > { %p1641_p5 = pneg %p1640_p1  ;;  %p1647_p8 = por %p1646_p6, %p1645_p2 }
  0x63   : > { %p1648_p10 = pnand %p1647_p8, %p1641_p5 }
  0x65   : > { %1651 = shalt.err (!%p1648_p10)
}
  0x66   : > { %1470 = dma.hbm_to_vmem [thread:$0]  (!%p1870_p11), %s1914_s8, 6144, %s1917_s9, %s1921_s5, %s1729_s12, %s1729_s12, %s1730_s13  }
  0x67   : > { %p2683_p0 = scmp.ne.s32.totalorder %s2675_s23, 0 }
  0x69   : > { %223 = sbr.rel (%p2683_p0) target bundleno = 617 (0x269), region = 36 }
  0x70   : > { %s1953_s0 = sand.u32 1, %s1718_s16   ;;  %p2684_p4 = scmp.ne.s32.totalorder %s2673_s21, 0 }
  0x71   : > { %s1956_s25 = smul.u32 384, %s1953_s0  ;;  %s226_s28 = scalar_lea.sflag [#allocation3], %s1953_s0 }
  0x73   : > { %s1960_s10 = scalar_lea.vmem [#allocation2], %s1956_s25 }
  0x74   : > { %1697 = dma.done.wait (%p2684_p4), %s226_s28, 6144  }
  0x75   : > { %1699 = vsyncadd (%p2684_p4), %s226_s28, 4294961152  ;;  %s234_s23 = sand.u32 1, %s1782_s19   ;;  %s1968_s13 = scalar_lea.vmem [#allocation5], %s1956_s25 }
  0x76   : > { %s235_s12 = scalar_lea.sflag [#allocation6], %s234_s23 }
  0x77   : > { %1701 = dma.done.wait (%p2684_p4), %s235_s12, 6144  }
  0x78   : > { %1703 = vsyncadd (%p2684_p4), %s235_s12, 4294961152  ;;  %p2685_p11 = scmp.eq.s32.totalorder %s1782_s19, 0 }
  0x7a   : > { %1705 = dma.done.wait (%p2685_p11), [#allocation6], 8192   ;;  %p2686_p13 = pmov %p2685_p11 }
  0x7b   : > { %v301_v0 = vld [vmem:[%s1960_s10 + $0xd0] sm:$0xff]  ;;  %v302_v1 = vld [vmem:[%s1960_s10 + $0xd8] sm:$0xff]  ;;  %v275_v5 = vld [vmem:[%s1960_s10] sm:$0xff]  ;;  %s2504_s9 = scalar_lea.vmem [#allocation8], %s1956_s25  ;;  %s1350_s5 = smul.u32 6144, %s1782_s19 }
  0x7c   : > { %1707 = vsyncadd (%p2686_p13), [#allocation6], 4294959104  ;;  %v349_v2 = vld [vmem:[%s1968_s13 + $0xd0] sm:$0xff]  ;;  %v350_v3 = vld [vmem:[%s1968_s13 + $0xd8] sm:$0xff]  ;;  %s1223_s11 = sshll.u32 %s2504_s9, 4  ;;  %s1209_s19 = scalar_lea.sflag [#allocation4], %s1953_s0  ;;  %s2602_s11 = int_to_ptr.vmem [resolvable:$true] %s1223_s11 }
  0x7d   : > { %v1982_v4 = vadd.f32 %v349_v2, %v301_v0  ;;  %v276_v6 = vld [vmem:[%s1960_s10 + $0x8] sm:$0xff]  ;;  %v1986_v7 = vadd.f32 %v350_v3, %v302_v1  ;;  %v323_v8 = vld [vmem:[%s1968_s13] sm:$0xff]  ;;  %v277_v19 = vld [vmem:[%s1960_s10 + $0x10] sm:$0xff]  ;;  %s2600_s6 = scalar_lea.hbm %s2655_s4, %s1350_s5  ;;  %s1652_s7 = scalar_lea.vmem %s2602_s11, 6144 }
  0x7e   : > { %v324_v9 = vld [vmem:[%s1968_s13 + $0x8] sm:$0xff]  ;;  %v299_v10 = vld [vmem:[%s1960_s10 + $0xc0] sm:$0xff]  ;;  %v1991_v11 = vadd.f32 %v323_v8, %v275_v5  ;;  %v278_v20 = vld [vmem:[%s1960_s10 + $0x18] sm:$0xff]  ;;  %p1653_p3 = scmp.ne.s32.totalorder %s2602_s11, %s1652_s7  ;;  %s1733_s26 = smov [#allocation8]  }
  0x7f   : > { %v1993_v12 = vadd.f32 %v324_v9, %v276_v6  ;;  %v300_v13 = vld [vmem:[%s1960_s10 + $0xc8] sm:$0xff]  ;;  %v347_v14 = vld [vmem:[%s1968_s13 + $0xc0] sm:$0xff]  ;;  %v458_v16 = vadd.f32 %v1986_v7, %v1982_v4  ;;  %v325_v21 = vld [vmem:[%s1968_s13 + $0x10] sm:$0xff]  ;;  %v517_v33 = vmul.f32 %v1982_v4, %v1982_v4  ;;  %v518_v34 = vmul.f32 %v1986_v7, %v1986_v7  ;;  %s1656_s20 = sshll.u32 %s1733_s26, 4  ;;  %s1657_s20 = int_to_ptr.vmem [resolvable:$false] %s1656_s20 }
  0x80   : > { %v348_v15 = vld [vmem:[%s1968_s13 + $0xc8] sm:$0xff]  ;;  %v2000_v17 = vadd.f32 %v347_v14, %v299_v10  ;;  %v491_v23 = vmul.f32 %v1991_v11, %v1991_v11  ;;  %v326_v25 = vld [vmem:[%s1968_s13 + $0x18] sm:$0xff]  ;;  %v2020_v30 = vadd.f32 %v325_v21, %v277_v19  ;;  %v303_v35 = vld [vmem:[%s1960_s10 + $0xe0] sm:$0xff]  ;;  %p1654_p7 = pnand %p1653_p3, %p1855_p12  ;;  %s1658_s25 = scalar_lea.vmem %s1657_s20, 12288 }
  0x81   : > { %v2002_v18 = vadd.f32 %v348_v15, %v300_v13  ;;  %v419_v22 = vadd.f32 %v1993_v12, %v1991_v11  ;;  %v492_v24 = vmul.f32 %v1993_v12, %v1993_v12  ;;  %459 = vadd.xlane.f32.xlu1 %v458_v16  ;;  %v2022_v31 = vadd.f32 %v326_v25, %v278_v20  ;;  %v304_v36 = vld [vmem:[%s1960_s10 + $0xe8] sm:$0xff]  ;;  %v351_v40 = vld [vmem:[%s1968_s13 + $0xe0] sm:$0xff]  ;;  %v305_v55 = vld [vmem:[%s1960_s10 + $0xf0] sm:$0xff]  ;;  %p1659_p1 = scmp.lt.s32.totalorder %s2602_s11, %s1657_s20  ;;  %p1660_p5 = scmp.lt.s32.totalorder %s1658_s25, %s1652_s7 }
  0x82   : > { %v515_v26 = vmul.f32 %v2000_v17, %v2000_v17  ;;  %v493_v38 = vmul.f32 %v2020_v30, %v2020_v30  ;;  %v352_v41 = vld [vmem:[%s1968_s13 + $0xe8] sm:$0xff]  ;;  %v279_v42 = vld [vmem:[%s1960_s10 + $0x20] sm:$0xff]  ;;  %v578_v46 = vadd.f32 %v518_v34, %v517_v33  ;;  %v2042_v47 = vadd.f32 %v351_v40, %v303_v35  ;;  %v306_v56 = vld [vmem:[%s1960_s10 + $0xf8] sm:$0xff]  ;;  %p1655_p9 = pneg %p1654_p7 }
  0x83   : > { %v516_v27 = vmul.f32 %v2002_v18, %v2002_v18  ;;  %420 = vadd.xlane.f32.xlu0 %v419_v22  ;;  %v539_v28 = vadd.f32 %v492_v24, %v491_v23  ;;  %v455_v29 = vadd.f32 %v2002_v18, %v2000_v17  ;;  %v422_v37 = vadd.f32 %v2022_v31, %v2020_v30  ;;  %v280_v43 = vld [vmem:[%s1960_s10 + $0x28] sm:$0xff]  ;;  %v327_v44 = vld [vmem:[%s1968_s13 + $0x20] sm:$0xff]  ;;  %v353_v60 = vld [vmem:[%s1968_s13 + $0xf0] sm:$0xff]  ;;  %p1661_p2 = por %p1660_p5, %p1659_p1 }
  0x84   : > { %v494_v39 = vmul.f32 %v2022_v31, %v2022_v31  ;;  %v328_v45 = vld [vmem:[%s1968_s13 + $0x28] sm:$0xff]  ;;  %v2044_v48 = vadd.f32 %v352_v41, %v304_v36  ;;  %v2046_v50 = vadd.f32 %v327_v44, %v279_v42  ;;  %v519_v53 = vmul.f32 %v2042_v47, %v2042_v47  ;;  %v354_v61 = vld [vmem:[%s1968_s13 + $0xf8] sm:$0xff]  ;;  %v281_v62 = vld [vmem:[%s1960_s10 + $0x30] sm:$0xff] }
  0x85   : > { %540 = vadd.xlane.f32.xlu1 %v539_v28  ;;  %v575_v32 = vadd.f32 %v516_v27, %v515_v26  ;;  %v2048_v51 = vadd.f32 %v328_v45, %v280_v43  ;;  %v282_v63 = vld [vmem:[%s1960_s10 + $0x38] sm:$0xff]  ;;  %v329_v0 = vld [vmem:[%s1968_s13 + $0x30] sm:$0xff]  ;;  %v2070_v3 = vadd.f32 %v353_v60, %v305_v55  ;;  %v2072_v5 = vadd.f32 %v354_v61, %v306_v56  ;;  %v307_v15 = vld [vmem:[%s1960_s10 + $0x100] sm:$0xff]  ;;  %p1662_p6 = pnand %p1661_p2, %p1655_p9 }
  0x86   : > { %v542_v49 = vadd.f32 %v494_v39, %v493_v38  ;;  %v461_v52 = vadd.f32 %v2044_v48, %v2042_v47  ;;  %v520_v54 = vmul.f32 %v2044_v48, %v2044_v48  ;;  %v495_v58 = vmul.f32 %v2046_v50, %v2046_v50  ;;  %v330_v1 = vld [vmem:[%s1968_s13 + $0x38] sm:$0xff]  ;;  %v308_v16 = vld [vmem:[%s1960_s10 + $0x108] sm:$0xff]  ;;  %v355_v22 = vld [vmem:[%s1968_s13 + $0x100] sm:$0xff] }
  0x87   : > { %456 = vadd.xlane.f32.xlu0 %v455_v29  ;;  %v425_v57 = vadd.f32 %v2048_v51, %v2046_v50  ;;  %v496_v59 = vmul.f32 %v2048_v51, %v2048_v51  ;;  %v2074_v8 = vadd.f32 %v329_v0, %v281_v62  ;;  %v2076_v9 = vadd.f32 %v330_v1, %v282_v63  ;;  %v356_v23 = vld [vmem:[%s1968_s13 + $0x108] sm:$0xff]  ;;  %v283_v24 = vld [vmem:[%s1960_s10 + $0x40] sm:$0xff]  ;;  %v309_v36 = vld [vmem:[%s1960_s10 + $0x110] sm:$0xff] }
  0x88   : > { %v581_v2 = vadd.f32 %v520_v54, %v519_v53  ;;  %v464_v10 = vadd.f32 %v2072_v5, %v2070_v3  ;;  %v521_v13 = vmul.f32 %v2070_v3, %v2070_v3  ;;  %v522_v14 = vmul.f32 %v2072_v5, %v2072_v5  ;;  %v284_v25 = vld [vmem:[%s1960_s10 + $0x48] sm:$0xff]  ;;  %v331_v26 = vld [vmem:[%s1968_s13 + $0x40] sm:$0xff]  ;;  %v357_v38 = vld [vmem:[%s1968_s13 + $0x110] sm:$0xff] }
  0x89   : > { %576 = vadd.xlane.f32.xlu1 %v575_v32  ;;  %v545_v6 = vadd.f32 %v496_v59, %v495_v58  ;;  %v428_v19 = vadd.f32 %v2076_v9, %v2074_v8  ;;  %v497_v20 = vmul.f32 %v2074_v8, %v2074_v8  ;;  %v498_v21 = vmul.f32 %v2076_v9, %v2076_v9  ;;  %v332_v27 = vld [vmem:[%s1968_s13 + $0x48] sm:$0xff]  ;;  %v878_v40 = vld [vmem:[#allocation7 + $0x18] sm:$0xff]  ;;  %v285_v45 = vld [vmem:[%s1960_s10 + $0x50] sm:$0xff] }
  0x8a   : > { %v584_v28 = vadd.f32 %v522_v14, %v521_v13  ;;  %v2098_v29 = vadd.f32 %v355_v22, %v307_v15  ;;  %v2100_v32 = vadd.f32 %v356_v23, %v308_v16  ;;  %v2102_v34 = vadd.f32 %v331_v26, %v283_v24  ;;  %v876_v39 = vld [vmem:[#allocation7 + $0x8] sm:$0xff]  ;;  %v358_v44 = vld [vmem:[%s1968_s13 + $0x118] sm:$0xff]  ;;  %v333_v54 = vld [vmem:[%s1968_s13 + $0x50] sm:$0xff] }
  0x8b   : > { %423 = vadd.xlane.f32.xlu0 %v422_v37  ;;  %v548_v33 = vadd.f32 %v498_v21, %v497_v20  ;;  %v2104_v35 = vadd.f32 %v332_v27, %v284_v25  ;;  %v310_v37 = vld [vmem:[%s1960_s10 + $0x118] sm:$0xff]  ;;  %v875_v55 = vld [vmem:[#allocation7] sm:$0xff]  ;;  %v877_v56 = vld [vmem:[#allocation7 + $0x10] sm:$0xff]  ;;  %v1351_v58 = vpack.c.bf16 %v878_v40, %v876_v39  ;;  %v2126_v61 = vadd.f32 %v357_v38, %v309_v36 }
  0x8c   : > { %v467_v41 = vadd.f32 %v2100_v32, %v2098_v29  ;;  %v523_v42 = vmul.f32 %v2098_v29, %v2098_v29  ;;  %v524_v43 = vmul.f32 %v2100_v32, %v2100_v32  ;;  %v880_v59 = vld [vmem:[#allocation7 + $0x28] sm:$0xff]  ;;  %v882_v60 = vld [vmem:[#allocation7 + $0x38] sm:$0xff]  ;;  %v2128_v62 = vadd.f32 %v358_v44, %v310_v37  ;;  %v879_v63 = vld [vmem:[#allocation7 + $0x20] sm:$0xff] }
  0x8d   : > { %579 = vadd.xlane.f32.xlu1 %v578_v46  ;;  %v286_v46 = vld [vmem:[%s1960_s10 + $0x58] sm:$0xff]  ;;  %v500_v53 = vmul.f32 %v2104_v35, %v2104_v35  ;;  %v881_v0 = vld [vmem:[#allocation7 + $0x30] sm:$0xff]  ;;  %1352 = vmatprep.subr.bf16.mxu0 %v1351_v58  ;;  %v1355_v16 = vpack.c.bf16 %v882_v60, %v880_v59  ;;  %v311_v20 = vld [vmem:[%s1960_s10 + $0x120] sm:$0xff]  ;;  %v525_v25 = vmul.f32 %v2126_v61, %v2126_v61 }
  0x8e   : > { %v587_v1 = vadd.f32 %v524_v43, %v523_v42  ;;  %v886_v13 = vld [vmem:[#allocation7 + $0x58] sm:$0xff]  ;;  %1415 = vmatprep.subr.bf16.mxu1 %v1351_v58  ;;  %v883_v22 = vld [vmem:[#allocation7 + $0x40] sm:$0xff]  ;;  %v885_v23 = vld [vmem:[#allocation7 + $0x50] sm:$0xff]  ;;  %v470_v24 = vadd.f32 %v2128_v62, %v2126_v61  ;;  %v526_v26 = vmul.f32 %v2128_v62, %v2128_v62 }
  0x8f   : > { %543 = vadd.xlane.f32.xlu0 %v542_v49  ;;  %v431_v49 = vadd.f32 %v2104_v35, %v2102_v34  ;;  %v312_v27 = vld [vmem:[%s1960_s10 + $0x128] sm:$0xff]  ;;  %v359_v39 = vld [vmem:[%s1968_s13 + $0x120] sm:$0xff] }
  0x90   : > { %v360_v40 = vld [vmem:[%s1968_s13 + $0x128] sm:$0xff]  ;;  %v335_v43 = vld [vmem:[%s1968_s13 + $0x60] sm:$0xff] }
  0x91   : > { %462 = vadd.xlane.f32.xlu1 %v461_v52  ;;  %v499_v52 = vmul.f32 %v2102_v34, %v2102_v34  ;;  %v288_v42 = vld [vmem:[%s1960_s10 + $0x68] sm:$0xff] }
  0x92   : > { %v336_v44 = vld [vmem:[%s1968_s13 + $0x68] sm:$0xff] }
  0x93   : > { %426 = vadd.xlane.f32.xlu0 %v425_v57  ;;  %v334_v57 = vld [vmem:[%s1968_s13 + $0x58] sm:$0xff]  ;;  %v551_v14 = vadd.f32 %v500_v53, %v499_v52  ;;  %v889_v52 = vld [vmem:[#allocation7 + $0x70] sm:$0xff]  ;;  %v590_v53 = vadd.f32 %v526_v26, %v525_v25  ;;  %v2160_v60 = vadd.f32 %v336_v44, %v288_v42  ;;  %v900_v44 = vld [vmem:[#allocation7 + $0xc8] sm:$0xff] }
  0x94   : > { %v2132_v15 = vadd.f32 %v334_v57, %v286_v46  ;;  %v894_v57 = vld [vmem:[#allocation7 + $0x98] sm:$0xff]  ;;  %v361_v25 = vld [vmem:[%s1968_s13 + $0x130] sm:$0xff] }
  0x95   : > { %582 = vadd.xlane.f32.xlu1 %v581_v2  ;;  %v2130_v2 = vadd.f32 %v333_v54, %v285_v45  ;;  %v1361_v45 = vpack.c.bf16 %v885_v23, %v883_v22  ;;  %v2154_v54 = vadd.f32 %v359_v39, %v311_v20  ;;  %v896_v20 = vld [vmem:[#allocation7 + $0xa8] sm:$0xff]  ;;  %v362_v26 = vld [vmem:[%s1968_s13 + $0x138] sm:$0xff]  ;;  %v895_v39 = vld [vmem:[#allocation7 + $0xa0] sm:$0xff] }
  0x96   : > { %v502_v38 = vmul.f32 %v2132_v15, %v2132_v15 }
  0x97   : > { %546 = vadd.xlane.f32.xlu0 %v545_v6  ;;  %v1353_v6 = vpack.c.bf16 %v877_v56, %v875_v55  ;;  %v434_v36 = vadd.f32 %v2132_v15, %v2130_v2  ;;  %v501_v37 = vmul.f32 %v2130_v2, %v2130_v2  ;;  %v2156_v55 = vadd.f32 %v360_v40, %v312_v27  ;;  %v892_v56 = vld [vmem:[#allocation7 + $0x88] sm:$0xff]  ;;  %v289_v27 = vld [vmem:[%s1960_s10 + $0x70] sm:$0xff] }
  0x98   : > { %v897_v40 = vld [vmem:[#allocation7 + $0xb0] sm:$0xff] }
  0x99   : > { %465 = vadd.xlane.f32.xlu1 %v464_v10  ;;  %v884_v10 = vld [vmem:[#allocation7 + $0x48] sm:$0xff]  ;;  %1354 = vmatpush1.bf16.msra.mxu0 %v1353_v6  ;;  %v554_v58 = vadd.f32 %v502_v38, %v501_v37 }
  0x9a   : > { %1431 = vmatpush1.bf16.msra.mxu1 %v1353_v6  ;;  %1356 = vmatprep.subr.bf16.mxu0 %v1355_v16  ;;  %v1359_v21 = vpack.c.bf16 %v886_v13, %v884_v10  ;;  %v891_v6 = vld [vmem:[#allocation7 + $0x80] sm:$0xff]  ;;  %v893_v10 = vld [vmem:[#allocation7 + $0x90] sm:$0xff]  ;;  %v473_v13 = vadd.f32 %v2156_v55, %v2154_v54 }
  0x9b   : > { %429 = vadd.xlane.f32.xlu0 %v428_v19  ;;  %v1357_v19 = vpack.c.bf16 %v881_v0, %v879_v63  ;;  %1416 = vmatprep.subr.bf16.mxu1 %v1355_v16  ;;  %v313_v0 = vld [vmem:[%s1960_s10 + $0x130] sm:$0xff]  ;;  %v528_v16 = vmul.f32 %v2156_v55, %v2156_v55  ;;  %v1369_v37 = vpack.c.bf16 %v893_v10, %v891_v6  ;;  %v316_v10 = vld [vmem:[%s1960_s10 + $0x148] sm:$0xff] }
  0x9c   : > { %v2182_v42 = vadd.f32 %v361_v25, %v313_v0  ;;  %v339_v25 = vld [vmem:[%s1968_s13 + $0x80] sm:$0xff] }
  0x9d   : > { %585 = vadd.xlane.f32.xlu1 %v584_v28  ;;  %v888_v28 = vld [vmem:[#allocation7 + $0x68] sm:$0xff]  ;;  %1358 = vmatpush1.bf16.msra.mxu0 %v1357_v19 }
  0x9e   : > { %1432 = vmatpush1.bf16.msra.mxu1 %v1357_v19  ;;  %1360 = vmatprep.subr.bf16.mxu0 %v1359_v21  ;;  %v314_v19 = vld [vmem:[%s1960_s10 + $0x138] sm:$0xff] }
  0x9f   : > { %549 = vadd.xlane.f32.xlu0 %v548_v33  ;;  %v890_v33 = vld [vmem:[#allocation7 + $0x78] sm:$0xff]  ;;  %1417 = vmatprep.subr.bf16.mxu1 %v1359_v21 }
  0xa0   : > { %v1363_v46 = vpack.c.bf16 %v890_v33, %v888_v28  ;;  %v898_v21 = vld [vmem:[#allocation7 + $0xb8] sm:$0xff]  ;;  %v337_v33 = vld [vmem:[%s1968_s13 + $0x70] sm:$0xff] }
  0xa1   : > { %468 = vadd.xlane.f32.xlu1 %v467_v41  ;;  %v287_v41 = vld [vmem:[%s1960_s10 + $0x60] sm:$0xff]  ;;  %1362 = vmatpush1.bf16.msra.mxu0 %v1361_v45  ;;  %v290_v28 = vld [vmem:[%s1960_s10 + $0x78] sm:$0xff]  ;;  %v1371_v38 = vpack.c.bf16 %v898_v21, %v896_v20 }
  0xa2   : > { %v2158_v59 = vadd.f32 %v335_v43, %v287_v41  ;;  %1433 = vmatpush1.bf16.msra.mxu1 %v1361_v45  ;;  %1364 = vmatprep.subr.bf16.mxu0 %v1363_v46  ;;  %v2184_v43 = vadd.f32 %v362_v26, %v314_v19  ;;  %v902_v45 = vld [vmem:[#allocation7 + $0xd8] sm:$0xff]  ;;  %v363_v21 = vld [vmem:[%s1968_s13 + $0x140] sm:$0xff]  ;;  %v340_v26 = vld [vmem:[%s1968_s13 + $0x88] sm:$0xff] }
  0xa3   : > { %432 = vadd.xlane.f32.xlu0 %v431_v49  ;;  %v887_v49 = vld [vmem:[#allocation7 + $0x60] sm:$0xff]  ;;  %1418 = vmatprep.subr.bf16.mxu1 %v1363_v46 }
  0xa4   : > { %v1365_v63 = vpack.c.bf16 %v889_v52, %v887_v49  ;;  %v437_v22 = vadd.f32 %v2160_v60, %v2158_v59  ;;  %v503_v23 = vmul.f32 %v2158_v59, %v2158_v59  ;;  %v2186_v49 = vadd.f32 %v337_v33, %v289_v27  ;;  %v903_v33 = vld [vmem:[#allocation7 + $0xe0] sm:$0xff] }
  0xa5   : > { %588 = vadd.xlane.f32.xlu1 %v587_v1  ;;  %v1367_v1 = vpack.c.bf16 %v894_v57, %v892_v56  ;;  %v315_v56 = vld [vmem:[%s1960_s10 + $0x140] sm:$0xff]  ;;  %v1375_v57 = vpack.c.bf16 %v902_v45, %v900_v44  ;;  %v476_v0 = vadd.f32 %v2184_v43, %v2182_v42  ;;  %v530_v6 = vmul.f32 %v2184_v43, %v2184_v43 }
  0xa6   : > { %1366 = vmatpush1.bf16.msra.mxu0 %v1365_v63  ;;  %1434 = vmatpush1.bf16.msra.mxu1 %v1365_v63  ;;  %v901_v63 = vld [vmem:[#allocation7 + $0xd0] sm:$0xff]  ;;  %v505_v19 = vmul.f32 %v2186_v49, %v2186_v49 }
  0xa7   : > { %552 = vadd.xlane.f32.xlu0 %v551_v14  ;;  %v527_v14 = vmul.f32 %v2154_v54, %v2154_v54  ;;  %1368 = vmatprep.subr.bf16.mxu0 %v1367_v1 }
  0xa8   : > { %1419 = vmatprep.subr.bf16.mxu1 %v1367_v1  ;;  %v529_v1 = vmul.f32 %v2182_v42, %v2182_v42 }
  0xa9   : > { %471 = vadd.xlane.f32.xlu1 %v470_v24  ;;  %v504_v24 = vmul.f32 %v2160_v60, %v2160_v60  ;;  %v593_v41 = vadd.f32 %v528_v16, %v527_v14  ;;  %v906_v14 = vld [vmem:[#allocation7 + $0xf8] sm:$0xff] }
  0xaa   : > { %1370 = vmatpush1.bf16.msra.mxu0 %v1369_v37  ;;  %1435 = vmatpush1.bf16.msra.mxu1 %v1369_v37  ;;  %v596_v37 = vadd.f32 %v530_v6, %v529_v1 }
  0xab   : > { %435 = vadd.xlane.f32.xlu0 %v434_v36  ;;  %v338_v36 = vld [vmem:[%s1968_s13 + $0x78] sm:$0xff]  ;;  %v557_v46 = vadd.f32 %v504_v24, %v503_v23  ;;  %1372 = vmatprep.subr.bf16.mxu0 %v1371_v38  ;;  %v291_v23 = vld [vmem:[%s1960_s10 + $0x80] sm:$0xff]  ;;  %v292_v24 = vld [vmem:[%s1960_s10 + $0x88] sm:$0xff] }
  0xac   : > { %v2188_v52 = vadd.f32 %v338_v36, %v290_v28  ;;  %1420 = vmatprep.subr.bf16.mxu1 %v1371_v38  ;;  %v905_v36 = vld [vmem:[#allocation7 + $0xf0] sm:$0xff]  ;;  %v2210_v38 = vadd.f32 %v363_v21, %v315_v56  ;;  %v2214_v45 = vadd.f32 %v339_v25, %v291_v23 }
  0xad   : > { %591 = vadd.xlane.f32.xlu1 %v590_v53  ;;  %v1373_v53 = vpack.c.bf16 %v897_v40, %v895_v39  ;;  %v908_v40 = vld [vmem:[#allocation7 + $0x108] sm:$0xff]  ;;  %v365_v21 = vld [vmem:[%s1968_s13 + $0x150] sm:$0xff] }
  0xae   : > { %v440_v16 = vadd.f32 %v2188_v52, %v2186_v49  ;;  %v506_v20 = vmul.f32 %v2188_v52, %v2188_v52  ;;  %2687 = vst [vmem:[#allocation13_spill] sm:$0xff] %v2210_v38  ;;  %2689 = vst [vmem:[#allocation15_spill] sm:$0xff] %v2214_v45  ;;  %v531_v1 = vmul.f32 %v2210_v38, %v2210_v38  ;;  %v293_v23 = vld [vmem:[%s1960_s10 + $0x90] sm:$0xff] }
  0xaf   : > { %555 = vadd.xlane.f32.xlu0 %v554_v58  ;;  %v899_v58 = vld [vmem:[#allocation7 + $0xc0] sm:$0xff]  ;;  %1374 = vmatpush1.bf16.msra.mxu0 %v1373_v53  ;;  %v341_v25 = vld [vmem:[%s1968_s13 + $0x90] sm:$0xff] }
  0xb0   : > { %1436 = vmatpush1.bf16.msra.mxu1 %v1373_v53  ;;  %v1377_v27 = vpack.c.bf16 %v901_v63, %v899_v58  ;;  %1376 = vmatprep.subr.bf16.mxu0 %v1375_v57  ;;  %v560_v44 = vadd.f32 %v506_v20, %v505_v19  ;;  %v1381_v53 = vpack.c.bf16 %v905_v36, %v903_v33  ;;  %v907_v58 = vld [vmem:[#allocation7 + $0x100] sm:$0xff]  ;;  %v909_v63 = vld [vmem:[#allocation7 + $0x110] sm:$0xff] }
  0xb1   : > { %474 = vadd.xlane.f32.xlu1 %v473_v13  ;;  %v904_v13 = vld [vmem:[#allocation7 + $0xe8] sm:$0xff]  ;;  %1421 = vmatprep.subr.bf16.mxu1 %v1375_v57  ;;  %v317_v57 = vld [vmem:[%s1960_s10 + $0x150] sm:$0xff]  ;;  %v507_v19 = vmul.f32 %v2214_v45, %v2214_v45  ;;  %v911_v33 = vld [vmem:[#allocation7 + $0x120] sm:$0xff] }
  0xb2   : > { %v1379_v28 = vpack.c.bf16 %v906_v14, %v904_v13  ;;  %v912_v13 = vld [vmem:[#allocation7 + $0x128] sm:$0xff]  ;;  %v914_v14 = vld [vmem:[#allocation7 + $0x138] sm:$0xff]  ;;  %v913_v36 = vld [vmem:[#allocation7 + $0x130] sm:$0xff] }
  0xb3   : > { %438 = vadd.xlane.f32.xlu0 %v437_v22  ;;  %v364_v22 = vld [vmem:[%s1968_s13 + $0x148] sm:$0xff]  ;;  %1378 = vmatpush1.bf16.msra.mxu0 %v1377_v27 }
  0xb4   : > { %v2212_v39 = vadd.f32 %v364_v22, %v316_v10  ;;  %1437 = vmatpush1.bf16.msra.mxu1 %v1377_v27  ;;  %1380 = vmatprep.subr.bf16.mxu0 %v1379_v28  ;;  %v318_v10 = vld [vmem:[%s1960_s10 + $0x158] sm:$0xff]  ;;  %v1385_v27 = vpack.c.bf16 %v909_v63, %v907_v58  ;;  %v319_v58 = vld [vmem:[%s1960_s10 + $0x160] sm:$0xff] }
  0xb5   : > { %594 = vadd.xlane.f32.xlu1 %v593_v41  ;;  %v910_v41 = vld [vmem:[#allocation7 + $0x118] sm:$0xff]  ;;  %1422 = vmatprep.subr.bf16.mxu1 %v1379_v28  ;;  %v1387_v28 = vpack.c.bf16 %v914_v14, %v912_v13  ;;  %v915_v63 = vld [vmem:[#allocation7 + $0x140] sm:$0xff]  ;;  %v320_v13 = vld [vmem:[%s1960_s10 + $0x168] sm:$0xff] }
  0xb6   : > { %2688 = vst [vmem:[#allocation14_spill] sm:$0xff] %v2212_v39  ;;  %v1383_v56 = vpack.c.bf16 %v910_v41, %v908_v40  ;;  %v532_v6 = vmul.f32 %v2212_v39, %v2212_v39  ;;  %v366_v22 = vld [vmem:[%s1968_s13 + $0x158] sm:$0xff]  ;;  %v2238_v40 = vadd.f32 %v365_v21, %v317_v57  ;;  %v920_v14 = vld [vmem:[#allocation7 + $0x168] sm:$0xff]  ;;  %v367_v21 = vld [vmem:[%s1968_s13 + $0x160] sm:$0xff] }
  0xb7   : > { %558 = vadd.xlane.f32.xlu0 %v557_v46  ;;  %v2216_v46 = vadd.f32 %v340_v26, %v292_v24  ;;  %v294_v24 = vld [vmem:[%s1960_s10 + $0x98] sm:$0xff]  ;;  %1382 = vmatpush1.bf16.msra.mxu0 %v1381_v53  ;;  %v2240_v41 = vadd.f32 %v366_v22, %v318_v10  ;;  %v368_v22 = vld [vmem:[%s1968_s13 + $0x168] sm:$0xff] }
  0xb8   : > { %v342_v26 = vld [vmem:[%s1968_s13 + $0x98] sm:$0xff]  ;;  %1438 = vmatpush1.bf16.msra.mxu1 %v1381_v53  ;;  %1384 = vmatprep.subr.bf16.mxu0 %v1383_v56  ;;  %2691 = vst [vmem:[#allocation17_spill] sm:$0xff] %v2238_v40 }
  0xb9   : > { %477 = vadd.xlane.f32.xlu1 %v476_v0  ;;  %2690 = vst [vmem:[#allocation16_spill] sm:$0xff] %v2216_v46  ;;  %v479_v0 = vadd.f32 %v2212_v39, %v2210_v38  ;;  %v508_v20 = vmul.f32 %v2216_v46, %v2216_v46  ;;  %1423 = vmatprep.subr.bf16.mxu1 %v1383_v56  ;;  %2692 = vst [vmem:[#allocation18_spill] sm:$0xff] %v2240_v41 }
  0xba   : > { %v2242_v39 = vadd.f32 %v341_v25, %v293_v23  ;;  %v2244_v53 = vadd.f32 %v342_v26, %v294_v24  ;;  %v1389_v56 = vpack.c.bf16 %v913_v36, %v911_v33  ;;  %v534_v10 = vmul.f32 %v2240_v41, %v2240_v41  ;;  %v295_v23 = vld [vmem:[%s1960_s10 + $0xa0] sm:$0xff]  ;;  %v296_v24 = vld [vmem:[%s1960_s10 + $0xa8] sm:$0xff]  ;;  %v921_v33 = vld [vmem:[#allocation7 + $0x170] sm:$0xff] }
  0xbb   : > { %441 = vadd.xlane.f32.xlu0 %v440_v16  ;;  %v443_v16 = vadd.f32 %v2216_v46, %v2214_v45  ;;  %v918_v46 = vld [vmem:[#allocation7 + $0x158] sm:$0xff]  ;;  %v563_v45 = vadd.f32 %v508_v20, %v507_v19  ;;  %1386 = vmatpush1.bf16.msra.mxu0 %v1385_v27  ;;  %v343_v25 = vld [vmem:[%s1968_s13 + $0xa0] sm:$0xff]  ;;  %v344_v26 = vld [vmem:[%s1968_s13 + $0xa8] sm:$0xff] }
  0xbc   : > { %2693 = vst [vmem:[#allocation19_spill] sm:$0xff] %v2242_v39  ;;  %2694 = vst [vmem:[#allocation20_spill] sm:$0xff] %v2244_v53  ;;  %1439 = vmatpush1.bf16.msra.mxu1 %v1385_v27  ;;  %1388 = vmatprep.subr.bf16.mxu0 %v1387_v28  ;;  %v509_v19 = vmul.f32 %v2242_v39, %v2242_v39  ;;  %v510_v20 = vmul.f32 %v2244_v53, %v2244_v53 }
  0xbd   : > { %597 = vadd.xlane.f32.xlu1 %v596_v37  ;;  %v599_v37 = vadd.f32 %v532_v6, %v531_v1  ;;  %1424 = vmatprep.subr.bf16.mxu1 %v1387_v28  ;;  %v482_v1 = vadd.f32 %v2240_v41, %v2238_v40  ;;  %v533_v6 = vmul.f32 %v2238_v40, %v2238_v40  ;;  %v919_v28 = vld [vmem:[#allocation7 + $0x160] sm:$0xff] }
  0xbe   : > { %v566_v41 = vadd.f32 %v510_v20, %v509_v19  ;;  %v2270_v40 = vadd.f32 %v343_v25, %v295_v23  ;;  %v369_v20 = vld [vmem:[%s1968_s13 + $0x170] sm:$0xff]  ;;  %v298_v23 = vld [vmem:[%s1960_s10 + $0xb8] sm:$0xff] }
  0xbf   : > { %561 = vadd.xlane.f32.xlu0 %v560_v44  ;;  %v916_v44 = vld [vmem:[#allocation7 + $0x148] sm:$0xff]  ;;  %1390 = vmatpush1.bf16.msra.mxu0 %v1389_v56  ;;  %v602_v36 = vadd.f32 %v534_v10, %v533_v6  ;;  %v346_v25 = vld [vmem:[%s1968_s13 + $0xb8] sm:$0xff] }
  0xc0   : > { %v1391_v57 = vpack.c.bf16 %v918_v46, %v916_v44  ;;  %v446_v46 = vadd.f32 %v2244_v53, %v2242_v39  ;;  %1440 = vmatpush1.bf16.msra.mxu1 %v1389_v56  ;;  %v2268_v44 = vadd.f32 %v368_v22, %v320_v13  ;;  %v924_v53 = vld [vmem:[#allocation7 + $0x188] sm:$0xff]  ;;  %v926_v39 = vld [vmem:[#allocation7 + $0x198] sm:$0xff]  ;;  %2697 = vst [vmem:[#allocation23_spill] sm:$0xff] %v2270_v40  ;;  %v297_v22 = vld [vmem:[%s1960_s10 + $0xb0] sm:$0xff] }
  0xc1   : > { %480 = vadd.xlane.f32.xlu1 %v479_v0  ;;  %v917_v0 = vld [vmem:[#allocation7 + $0x150] sm:$0xff]  ;;  %v2272_v56 = vadd.f32 %v344_v26, %v296_v24  ;;  %v2300_v38 = vadd.f32 %v346_v25, %v298_v23 }
  0xc2   : > { %v1393_v27 = vpack.c.bf16 %v917_v0, %v915_v63  ;;  %1392 = vmatprep.subr.bf16.mxu0 %v1391_v57  ;;  %1425 = vmatprep.subr.bf16.mxu1 %v1391_v57  ;;  %2696 = vst [vmem:[#allocation22_spill] sm:$0xff] %v2268_v44  ;;  %v1397_v57 = vpack.c.bf16 %v921_v33, %v919_v28  ;;  %v321_v63 = vld [vmem:[%s1960_s10 + $0x170] sm:$0xff]  ;;  %v923_v0 = vld [vmem:[#allocation7 + $0x180] sm:$0xff] }
  0xc3   : > { %444 = vadd.xlane.f32.xlu0 %v443_v16  ;;  %v922_v16 = vld [vmem:[#allocation7 + $0x178] sm:$0xff]  ;;  %2698 = vst [vmem:[#allocation24_spill] sm:$0xff] %v2272_v56  ;;  %v536_v13 = vmul.f32 %v2268_v44, %v2268_v44  ;;  %v512_v19 = vmul.f32 %v2272_v56, %v2272_v56  ;;  %v345_v24 = vld [vmem:[%s1968_s13 + $0xb0] sm:$0xff]  ;;  %v2294_v33 = vadd.f32 %v369_v20, %v321_v63 }
  0xc4   : > { %1394 = vmatpush1.bf16.msra.mxu0 %v1393_v27  ;;  %1441 = vmatpush1.bf16.msra.mxu1 %v1393_v27  ;;  %v927_v27 = vld [vmem:[#allocation7 + $0x1a0] sm:$0xff] }
  0xc5   : > { %600 = vadd.xlane.f32.xlu1 %v599_v37  ;;  %v2266_v37 = vadd.f32 %v367_v21, %v319_v58  ;;  %v1399_v58 = vpack.c.bf16 %v926_v39, %v924_v53  ;;  %v449_v39 = vadd.f32 %v2272_v56, %v2270_v40  ;;  %v511_v53 = vmul.f32 %v2270_v40, %v2270_v40  ;;  %v370_v21 = vld [vmem:[%s1968_s13 + $0x178] sm:$0xff]  ;;  %v932_v56 = vld [vmem:[#allocation7 + $0x1c8] sm:$0xff] }
  0xc6   : > { %v934_v40 = vld [vmem:[#allocation7 + $0x1d8] sm:$0xff] }
  0xc7   : > { %564 = vadd.xlane.f32.xlu0 %v563_v45  ;;  %v1395_v45 = vpack.c.bf16 %v922_v16, %v920_v14  ;;  %2695 = vst [vmem:[#allocation21_spill] sm:$0xff] %v2266_v37  ;;  %v485_v6 = vadd.f32 %v2268_v44, %v2266_v37  ;;  %v535_v10 = vmul.f32 %v2266_v37, %v2266_v37  ;;  %v322_v14 = vld [vmem:[%s1960_s10 + $0x178] sm:$0xff]  ;;  %v928_v16 = vld [vmem:[#allocation7 + $0x1a8] sm:$0xff] }
  0xc8   : > { %v569_v44 = vadd.f32 %v512_v19, %v511_v53  ;;  %v2298_v37 = vadd.f32 %v345_v24, %v297_v22  ;;  %v935_v53 = vld [vmem:[#allocation7 + $0x1e0] sm:$0xff]  ;;  %v937_v19 = vld [vmem:[#allocation7 + $0x1f0] sm:$0xff] }
  0xc9   : > { %483 = vadd.xlane.f32.xlu1 %v482_v1  ;;  %1396 = vmatprep.subr.bf16.mxu0 %v1395_v45  ;;  %v925_v1 = vld [vmem:[#allocation7 + $0x190] sm:$0xff]  ;;  %v605_v28 = vadd.f32 %v536_v13, %v535_v10  ;;  %v936_v13 = vld [vmem:[#allocation7 + $0x1e8] sm:$0xff] }
  0xca   : > { %1426 = vmatprep.subr.bf16.mxu1 %v1395_v45  ;;  %1398 = vmatpush1.bf16.msra.mxu0 %v1397_v57  ;;  %v1401_v26 = vpack.c.bf16 %v925_v1, %v923_v0  ;;  %v929_v45 = vld [vmem:[#allocation7 + $0x1b0] sm:$0xff]  ;;  %v931_v0 = vld [vmem:[#allocation7 + $0x1c0] sm:$0xff] }
  0xcb   : > { %447 = vadd.xlane.f32.xlu0 %v446_v46  ;;  %v930_v46 = vld [vmem:[#allocation7 + $0x1b8] sm:$0xff]  ;;  %1442 = vmatpush1.bf16.msra.mxu1 %v1397_v57  ;;  %v1405_v57 = vpack.c.bf16 %v929_v45, %v927_v27  ;;  %v933_v1 = vld [vmem:[#allocation7 + $0x1d0] sm:$0xff] }
  0xcc   : > { %1400 = vmatprep.subr.bf16.mxu0 %v1399_v58  ;;  %1427 = vmatprep.subr.bf16.mxu1 %v1399_v58  ;;  %v1407_v58 = vpack.c.bf16 %v934_v40, %v932_v56  ;;  %v513_v40 = vmul.f32 %v2298_v37, %v2298_v37  ;;  %v514_v56 = vmul.f32 %v2300_v38, %v2300_v38 }
  0xcd   : > { %603 = vadd.xlane.f32.xlu1 %v602_v36  ;;  %v2296_v36 = vadd.f32 %v370_v21, %v322_v14  ;;  %v938_v14 = vld [vmem:[#allocation7 + $0x1f8] sm:$0xff]  ;;  %v1413_v21 = vpack.c.bf16 %v937_v19, %v935_v53 }
  0xce   : > { %1402 = vmatpush1.bf16.msra.mxu0 %v1401_v26 }
  0xcf   : > { %567 = vadd.xlane.f32.xlu0 %v566_v41  ;;  %v1403_v41 = vpack.c.bf16 %v930_v46, %v928_v16  ;;  %1443 = vmatpush1.bf16.msra.mxu1 %v1401_v26  ;;  %v488_v63 = vadd.f32 %v2296_v36, %v2294_v33  ;;  %v538_v10 = vmul.f32 %v2296_v36, %v2296_v36 }
  0xd0   : > { %v452_v16 = vadd.f32 %v2300_v38, %v2298_v37  ;;  %v1409_v46 = vpack.c.bf16 %v933_v1, %v931_v0 }
  0xd1   : > { %486 = vadd.xlane.f32.xlu1 %v485_v6  ;;  %1404 = vmatprep.subr.bf16.mxu0 %v1403_v41  ;;  %v537_v6 = vmul.f32 %v2294_v33, %v2294_v33 }
  0xd2   : > { %1428 = vmatprep.subr.bf16.mxu1 %v1403_v41  ;;  %1406 = vmatpush1.bf16.msra.mxu0 %v1405_v57 }
  0xd3   : > { %450 = vadd.xlane.f32.xlu0 %v449_v39  ;;  %1444 = vmatpush1.bf16.msra.mxu1 %v1405_v57  ;;  %v1411_v39 = vpack.c.bf16 %v938_v14, %v936_v13  ;;  %v608_v20 = vadd.f32 %v538_v10, %v537_v6 }
  0xd4   : > { %1408 = vmatprep.subr.bf16.mxu0 %v1407_v58  ;;  %1429 = vmatprep.subr.bf16.mxu1 %v1407_v58 }
  0xd5   : > { %606 = vadd.xlane.f32.xlu1 %v605_v28 }
  0xd6   : > { %1410 = vmatpush1.bf16.msra.mxu0 %v1409_v46 }
  0xd7   : > { %570 = vadd.xlane.f32.xlu0 %v569_v44  ;;  %v572_v44 = vadd.f32 %v514_v56, %v513_v40  ;;  %1445 = vmatpush1.bf16.msra.mxu1 %v1409_v46 }
  0xd8   : > { %1412 = vmatprep.subr.bf16.mxu0 %v1411_v39  ;;  %1430 = vmatprep.subr.bf16.mxu1 %v1411_v39 }
  0xd9   : > { %489 = vadd.xlane.f32.xlu1 %v488_v63 }
  0xda   : > { %1414 = vmatpush1.bf16.msra.mxu0 %v1413_v21 }
  0xdb   : > { %453 = vadd.xlane.f32.xlu0 %v452_v16  ;;  %1446 = vmatpush1.bf16.msra.mxu1 %v1413_v21 }
  0xdd   : > { %609 = vadd.xlane.f32.xlu1 %v608_v20 }
  0xdf   : > { %573 = vadd.xlane.f32.xlu0 %v572_v44 }
 0x10e   : > { %v460_v22 = vpop.xlane.xlu1 %459 }
 0x10f   : > { %v2316_v58 = vmul.f32 0.00390625, %v460_v22 }
 0x110   : > { %v421_v23 = vpop.xlane.xlu0 %420 }
 0x111   : > { %v611_v24 = vmul.f32 0.00390625, %v421_v23  ;;  %v672_v56 = vmul.f32 %v2316_v58, %v2316_v58 }
 0x112   : > { %v541_v25 = vpop.xlane.xlu1 %540 }
 0x113   : > { %v635_v26 = vmul.f32 0.00390625, %v541_v25  ;;  %v659_v41 = vmul.f32 %v611_v24, %v611_v24 }
 0x114   : > { %v457_v27 = vpop.xlane.xlu0 %456 }
 0x115   : > { %v2314_v45 = vmul.f32 0.00390625, %v457_v27  ;;  %v683_v28 = vsub.f32 %v635_v26, %v659_v41 }
 0x116   : > { %v577_v57 = vpop.xlane.xlu1 %576 }
 0x117   : > { %v707_v0 = vmax.f32 %v683_v28, 0.0  ;;  %v647_v1 = vmul.f32 0.00390625, %v577_v57  ;;  %v671_v63 = vmul.f32 %v2314_v45, %v2314_v45 }
 0x118   : > { %v424_v6 = vpop.xlane.xlu0 %423 }
 0x119   : > { %v2320_v10 = vmul.f32 0.00390625, %v424_v6  ;;  %v779_v13 = vadd.f32 1e-12, %v707_v0  ;;  %v695_v14 = vsub.f32 %v647_v1, %v671_v63  ;;  %v731_v1 = vsub.f32 %v1991_v11, %v611_v24 }
 0x11a   : > { %v580_v16 = vpop.xlane.xlu1 %579 }
 0x11b   : > { %1516 = vrsqrt.f32 %v779_v13  ;;  %v719_v40 = vmax.f32 %v695_v14, 0.0  ;;  %v648_v46 = vmul.f32 0.00390625, %v580_v16  ;;  %v660_v53 = vmul.f32 %v2320_v10, %v2320_v10 }
 0x11c   : > { %v544_v39 = vpop.xlane.xlu0 %543 }
 0x11d   : > { %v636_v19 = vmul.f32 0.00390625, %v544_v39  ;;  %v791_v20 = vadd.f32 1e-12, %v719_v40  ;;  %v696_v44 = vsub.f32 %v648_v46, %v672_v56  ;;  %v732_v40 = vsub.f32 %v1993_v12, %v611_v24 }
 0x11e   : > { %v463_v22 = vpop.xlane.xlu1 %462  ;;  %v756_v12 = vsub.f32 %v2002_v18, %v2314_v45  ;;  %v757_v24 = vsub.f32 %v1982_v4, %v2316_v58  ;;  %v733_v4 = vsub.f32 %v2020_v30, %v2320_v10 }
 0x11f   : > { %v684_v21 = vsub.f32 %v636_v19, %v660_v53  ;;  %1518 = vrsqrt.f32 %v791_v20  ;;  %v720_v23 = vmax.f32 %v696_v44, 0.0  ;;  %v2326_v25 = vmul.f32 0.00390625, %v463_v22 }
 0x120   : > { %v427_v26 = vpop.xlane.xlu0 %426 }
 0x121   : > { %v708_v41 = vmax.f32 %v684_v21, 0.0  ;;  %v2328_v27 = vmul.f32 0.00390625, %v427_v26  ;;  %v792_v28 = vadd.f32 1e-12, %v720_v23  ;;  %v673_v63 = vmul.f32 %v2326_v25, %v2326_v25 }
 0x122   : > { %v583_v0 = vpop.xlane.xlu1 %582 }
 0x123   : > { %v780_v57 = vadd.f32 1e-12, %v708_v41  ;;  %1520 = vrsqrt.f32 %v792_v28  ;;  %v649_v6 = vmul.f32 0.00390625, %v583_v0  ;;  %v661_v14 = vmul.f32 %v2328_v27, %v2328_v27 }
 0x124   : > { %v547_v13 = vpop.xlane.xlu0 %546  ;;  %v755_v41 = vsub.f32 %v2000_v17, %v2314_v45  ;;  %v758_v17 = vsub.f32 %v1986_v7, %v2316_v58 }
 0x125   : > { %1522 = vrsqrt.f32 %v780_v57  ;;  %v637_v16 = vmul.f32 0.00390625, %v547_v13  ;;  %v1517_v56 = vpop.eup %1516  ;;  %v697_v46 = vsub.f32 %v649_v6, %v673_v63 }
 0x126   : > { %v466_v53 = vpop.xlane.xlu1 %465  ;;  %v828_v19 = vmul.f32 %v1517_v56, %v732_v40  ;;  %v827_v20 = vmul.f32 %v1517_v56, %v731_v1  ;;  %v734_v40 = vsub.f32 %v2022_v31, %v2320_v10 }
 0x127   : > { %v685_v39 = vsub.f32 %v637_v16, %v661_v14  ;;  %v721_v11 = vmax.f32 %v697_v46, 0.0  ;;  %v2336_v44 = vmul.f32 0.00390625, %v466_v53 }
 0x128   : > { %v430_v21 = vpop.xlane.xlu0 %429  ;;  %1015 = vmatprep.mubr.f32.mxu0 %v828_v19 }
 0x129   : > { %v709_v22 = vmax.f32 %v685_v39, 0.0  ;;  %v2338_v23 = vmul.f32 0.00390625, %v430_v21  ;;  %v1519_v26 = vpop.eup %1518  ;;  %v793_v28 = vadd.f32 1e-12, %v721_v11  ;;  %1016 = vmatmul.mubr.f32.vlgmr.msra.gmra.mrb[0].mxu0 %v827_v20  ;;  %v674_v0 = vmul.f32 %v2336_v44, %v2336_v44 }
 0x12a   : > { %v586_v1 = vpop.xlane.xlu1 %585  ;;  %v852_v13 = vmul.f32 %v1519_v26, %v756_v12  ;;  %v851_v14 = vmul.f32 %v1519_v26, %v755_v41 }
 0x12b   : > { %v781_v57 = vadd.f32 1e-12, %v709_v22  ;;  %1524 = vrsqrt.f32 %v793_v28  ;;  %v650_v63 = vmul.f32 0.00390625, %v586_v1  ;;  %v662_v18 = vmul.f32 %v2338_v23, %v2338_v23 }
 0x12c   : > { %v550_v6 = vpop.xlane.xlu0 %549  ;;  %1087 = vmatprep.mubr.f32.mxu1 %v852_v13  ;;  %v759_v28 = vsub.f32 %v2042_v47, %v2326_v25  ;;  %v735_v13 = vsub.f32 %v2046_v50, %v2328_v27  ;;  %v736_v47 = vsub.f32 %v2048_v51, %v2328_v27 }
 0x12d   : > { %1526 = vrsqrt.f32 %v781_v57  ;;  %v638_v45 = vmul.f32 0.00390625, %v550_v6  ;;  %v1521_v16 = vpop.eup %1520  ;;  %v698_v56 = vsub.f32 %v650_v63, %v674_v0  ;;  %1088 = vmatmul.mubr.f32.vlgmr.msra.gmra.mrb[0].mxu1 %v851_v14  ;;  %v760_v0 = vsub.f32 %v2044_v48, %v2326_v25 }
 0x12e   : > { %v469_v53 = vpop.xlane.xlu1 %468  ;;  %v854_v19 = vmul.f32 %v1521_v16, %v758_v17  ;;  %v853_v7 = vmul.f32 %v1521_v16, %v757_v24 }
 0x12f   : > { %v1523_v46 = vpop.eup %1522  ;;  %v686_v39 = vsub.f32 %v638_v45, %v662_v18  ;;  %v722_v58 = vmax.f32 %v698_v56, 0.0  ;;  %v2356_v20 = vmul.f32 0.00390625, %v469_v53 }
 0x130   : > { %v433_v11 = vpop.xlane.xlu0 %432  ;;  %v830_v21 = vmul.f32 %v1523_v46, %v734_v40  ;;  %v829_v22 = vmul.f32 %v1523_v46, %v733_v4  ;;  %1093 = vmatprep.mubr.f32.mxu1 %v854_v19  ;;  %v761_v19 = vsub.f32 %v2070_v3, %v2336_v44  ;;  %v738_v3 = vsub.f32 %v2076_v9, %v2338_v23 }
 0x131   : > { %v710_v26 = vmax.f32 %v686_v39, 0.0  ;;  %v2358_v41 = vmul.f32 0.00390625, %v433_v11  ;;  %v794_v30 = vadd.f32 1e-12, %v722_v58  ;;  %1094 = vmatmul.mubr.f32.gmra.mrb[2].mxu1 %v853_v7  ;;  %v675_v12 = vmul.f32 %v2356_v20, %v2356_v20 }
 0x132   : > { %1021 = vmatprep.mubr.f32.mxu0 %v830_v21  ;;  %v589_v10 = vpop.xlane.xlu1 %588  ;;  %v762_v21 = vsub.f32 %v2072_v5, %v2336_v44 }
 0x133   : > { %v782_v31 = vadd.f32 1e-12, %v710_v26  ;;  %1022 = vmatmul.mubr.f32.gmra.mrb[2].mxu0 %v829_v22  ;;  %1528 = vrsqrt.f32 %v794_v30  ;;  %v651_v24 = vmul.f32 0.00390625, %v589_v10  ;;  %v663_v1 = vmul.f32 %v2358_v41, %v2358_v41 }
 0x134   : > { %v553_v57 = vpop.xlane.xlu0 %552 }
 0x135   : > { %1530 = vrsqrt.f32 %v782_v31  ;;  %v639_v63 = vmul.f32 0.00390625, %v553_v57  ;;  %v1525_v6 = vpop.eup %1524  ;;  %v699_v14 = vsub.f32 %v651_v24, %v675_v12  ;;  %v737_v31 = vsub.f32 %v2074_v8, %v2338_v23 }
 0x136   : > { %v472_v45 = vpop.xlane.xlu1 %471  ;;  %v856_v16 = vmul.f32 %v1525_v6, %v760_v0  ;;  %v855_v4 = vmul.f32 %v1525_v6, %v759_v28 }
 0x137   : > { %v1527_v17 = vpop.eup %1526  ;;  %v687_v18 = vsub.f32 %v639_v63, %v663_v1  ;;  %v723_v40 = vmax.f32 %v699_v14, 0.0  ;;  %v2372_v48 = vmul.f32 0.00390625, %v472_v45  ;;  %v763_v14 = vsub.f32 %v2098_v29, %v2356_v20 }
 0x138   : > { %v436_v25 = vpop.xlane.xlu0 %435  ;;  %v832_v56 = vmul.f32 %v1527_v17, %v736_v47  ;;  %v831_v46 = vmul.f32 %v1527_v17, %v735_v13  ;;  %1099 = vmatprep.mubr.f32.mxu1 %v856_v16  ;;  %v764_v16 = vsub.f32 %v2100_v32, %v2356_v20  ;;  %v740_v29 = vsub.f32 %v2104_v35, %v2358_v41 }
 0x139   : > { %v711_v39 = vmax.f32 %v687_v18, 0.0  ;;  %v2374_v53 = vmul.f32 0.00390625, %v436_v25  ;;  %v795_v50 = vadd.f32 1e-12, %v723_v40  ;;  %1100 = vmatmul.mubr.f32.gmra.mrb[4].mxu1 %v855_v4  ;;  %v676_v7 = vmul.f32 %v2372_v48, %v2372_v48 }
 0x13a   : > { %1027 = vmatprep.mubr.f32.mxu0 %v832_v56  ;;  %v592_v27 = vpop.xlane.xlu1 %591  ;;  %v739_v56 = vsub.f32 %v2102_v34, %v2358_v41 }
 0x13b   : > { %v783_v51 = vadd.f32 1e-12, %v711_v39  ;;  %1028 = vmatmul.mubr.f32.gmra.mrb[4].mxu0 %v831_v46  ;;  %1532 = vrsqrt.f32 %v795_v50  ;;  %v652_v58 = vmul.f32 0.00390625, %v592_v27  ;;  %v664_v22 = vmul.f32 %v2374_v53, %v2374_v53 }
 0x13c   : > { %v556_v11 = vpop.xlane.xlu0 %555 }
 0x13d   : > { %1534 = vrsqrt.f32 %v783_v51  ;;  %v640_v26 = vmul.f32 0.00390625, %v556_v11  ;;  %v1529_v30 = vpop.eup %1528  ;;  %v700_v10 = vsub.f32 %v652_v58, %v676_v7 }
 0x13e   : > { %v475_v24 = vpop.xlane.xlu1 %474  ;;  %v858_v57 = vmul.f32 %v1529_v30, %v762_v21  ;;  %v857_v0 = vmul.f32 %v1529_v30, %v761_v19 }
 0x13f   : > { %v1531_v28 = vpop.eup %1530  ;;  %v688_v12 = vsub.f32 %v640_v26, %v664_v22  ;;  %v724_v1 = vmax.f32 %v700_v10, 0.0  ;;  %v2388_v5 = vmul.f32 0.00390625, %v475_v24  ;;  %v765_v26 = vsub.f32 %v2126_v61, %v2372_v48 }
 0x140   : > { %v439_v44 = vpop.xlane.xlu0 %438  ;;  %v834_v63 = vmul.f32 %v1531_v28, %v738_v3  ;;  %v833_v6 = vmul.f32 %v1531_v28, %v737_v31  ;;  %1105 = vmatprep.mubr.f32.mxu1 %v858_v57  ;;  %v766_v10 = vsub.f32 %v2128_v62, %v2372_v48  ;;  %v741_v57 = vsub.f32 %v2130_v2, %v2374_v53 }
 0x141   : > { %v712_v13 = vmax.f32 %v688_v12, 0.0  ;;  %v2390_v47 = vmul.f32 0.00390625, %v439_v44  ;;  %v796_v8 = vadd.f32 1e-12, %v724_v1  ;;  %1106 = vmatmul.mubr.f32.gmra.mrb[6].mxu1 %v857_v0  ;;  %v677_v17 = vmul.f32 %v2388_v5, %v2388_v5 }
 0x142   : > { %1033 = vmatprep.mubr.f32.mxu0 %v834_v63  ;;  %v595_v23 = vpop.xlane.xlu1 %594  ;;  %v742_v61 = vsub.f32 %v2132_v15, %v2374_v53 }
 0x143   : > { %v784_v9 = vadd.f32 1e-12, %v712_v13  ;;  %1034 = vmatmul.mubr.f32.gmra.mrb[6].mxu0 %v833_v6  ;;  %1536 = vrsqrt.f32 %v796_v8  ;;  %v653_v18 = vmul.f32 0.00390625, %v595_v23  ;;  %v665_v4 = vmul.f32 %v2390_v47, %v2390_v47 }
 0x144   : > { %v559_v45 = vpop.xlane.xlu0 %558 }
 0x145   : > { %1538 = vrsqrt.f32 %v784_v9  ;;  %v641_v40 = vmul.f32 0.00390625, %v559_v45  ;;  %v1533_v25 = vpop.eup %1532  ;;  %v701_v46 = vsub.f32 %v653_v18, %v677_v17  ;;  %v767_v18 = vsub.f32 %v2154_v54, %v2388_v5 }
 0x146   : > { %v478_v51 = vpop.xlane.xlu1 %477  ;;  %v860_v27 = vmul.f32 %v1533_v25, %v764_v16  ;;  %v859_v19 = vmul.f32 %v1533_v25, %v763_v14  ;;  %v744_v54 = vsub.f32 %v2160_v60, %v2390_v47 }
 0x147   : > { %v1535_v39 = vpop.eup %1534  ;;  %v689_v50 = vsub.f32 %v641_v40, %v665_v4  ;;  %v725_v7 = vmax.f32 %v701_v46, 0.0  ;;  %v2404_v32 = vmul.f32 0.00390625, %v478_v51  ;;  %v768_v40 = vsub.f32 %v2156_v55, %v2388_v5 }
 0x148   : > { %v442_v20 = vpop.xlane.xlu0 %441  ;;  %v836_v58 = vmul.f32 %v1535_v39, %v740_v29  ;;  %v835_v11 = vmul.f32 %v1535_v39, %v739_v56  ;;  %1111 = vmatprep.mubr.f32.mxu1 %v860_v27  ;;  %v743_v46 = vsub.f32 %v2158_v59, %v2390_v47 }
 0x149   : > { %v713_v21 = vmax.f32 %v689_v50, 0.0  ;;  %v2406_v22 = vmul.f32 0.00390625, %v442_v20  ;;  %v797_v34 = vadd.f32 1e-12, %v725_v7  ;;  %1112 = vmatmul.mubr.f32.gmra.mrb[8].mxu1 %v859_v19  ;;  %v678_v30 = vmul.f32 %v2404_v32, %v2404_v32 }
 0x14a   : > { %1039 = vmatprep.mubr.f32.mxu0 %v836_v58  ;;  %v598_v41 = vpop.xlane.xlu1 %597 }
 0x14b   : > { %v785_v35 = vadd.f32 1e-12, %v713_v21  ;;  %1040 = vmatmul.mubr.f32.gmra.mrb[8].mxu0 %v835_v11  ;;  %1540 = vrsqrt.f32 %v797_v34  ;;  %v654_v31 = vmul.f32 0.00390625, %v598_v41  ;;  %v666_v28 = vmul.f32 %v2406_v22, %v2406_v22 }
 0x14c   : > { %v562_v3 = vpop.xlane.xlu0 %561 }
 0x14d   : > { %1542 = vrsqrt.f32 %v785_v35  ;;  %v642_v12 = vmul.f32 0.00390625, %v562_v3  ;;  %v1537_v24 = vpop.eup %1536  ;;  %v702_v0 = vsub.f32 %v654_v31, %v678_v30  ;;  %v769_v35 = vsub.f32 %v2182_v42, %v2404_v32 }
 0x14e   : > { %v481_v63 = vpop.xlane.xlu1 %480  ;;  %v862_v6 = vmul.f32 %v1537_v24, %v766_v10  ;;  %v861_v13 = vmul.f32 %v1537_v24, %v765_v26  ;;  %v770_v31 = vsub.f32 %v2184_v43, %v2404_v32  ;;  %v746_v42 = vsub.f32 %v2188_v52, %v2406_v22 }
 0x14f   : > { %v1539_v1 = vpop.eup %1538  ;;  %v690_v44 = vsub.f32 %v642_v12, %v666_v28  ;;  %v726_v8 = vmax.f32 %v702_v0, 0.0  ;;  %v2420_v62 = vmul.f32 0.00390625, %v481_v63  ;;  %v745_v12 = vsub.f32 %v2186_v49, %v2406_v22 }
 0x150   : > { %v445_v48 = vpop.xlane.xlu0 %444  ;;  %v838_v9 = vmul.f32 %v1539_v1, %v742_v61  ;;  %v837_v23 = vmul.f32 %v1539_v1, %v741_v57  ;;  %1117 = vmatprep.mubr.f32.mxu1 %v862_v6 }
 0x151   : > { %v714_v14 = vmax.f32 %v690_v44, 0.0  ;;  %v2422_v17 = vmul.f32 0.00390625, %v445_v48  ;;  %v798_v2 = vadd.f32 1e-12, %v726_v8  ;;  %1118 = vmatmul.mubr.f32.gmra.mrb[10].mxu1 %v861_v13  ;;  %v679_v45 = vmul.f32 %v2420_v62, %v2420_v62 }
 0x152   : > { %1045 = vmatprep.mubr.f32.mxu0 %v838_v9  ;;  %v601_v53 = vpop.xlane.xlu1 %600  ;;  %v2699_v9 = vld [vmem:[#allocation13_spill] sm:$0xff] }
 0x153   : > { %v786_v15 = vadd.f32 1e-12, %v714_v14  ;;  %1046 = vmatmul.mubr.f32.gmra.mrb[10].mxu0 %v837_v23  ;;  %1544 = vrsqrt.f32 %v798_v2  ;;  %v655_v16 = vmul.f32 0.00390625, %v601_v53  ;;  %v667_v25 = vmul.f32 %v2422_v17, %v2422_v17  ;;  %v2700_v53 = vld [vmem:[#allocation14_spill] sm:$0xff] }
 0x154   : > { %v565_v4 = vpop.xlane.xlu0 %564  ;;  %v771_v23 = vsub.f32 %v2699_v9, %v2420_v62 }
 0x155   : > { %1546 = vrsqrt.f32 %v786_v15  ;;  %v643_v56 = vmul.f32 0.00390625, %v565_v4  ;;  %v1541_v29 = vpop.eup %1540  ;;  %v703_v39 = vsub.f32 %v655_v16, %v679_v45 }
 0x156   : > { %v484_v27 = vpop.xlane.xlu1 %483  ;;  %v864_v19 = vmul.f32 %v1541_v29, %v768_v40  ;;  %v863_v7 = vmul.f32 %v1541_v29, %v767_v18  ;;  %v772_v18 = vsub.f32 %v2700_v53, %v2420_v62  ;;  %v2701_v40 = vld [vmem:[#allocation15_spill] sm:$0xff] }
 0x157   : > { %v1543_v50 = vpop.eup %1542  ;;  %v691_v51 = vsub.f32 %v643_v56, %v667_v25  ;;  %v727_v20 = vmax.f32 %v703_v39, 0.0  ;;  %v2436_v55 = vmul.f32 0.00390625, %v484_v27  ;;  %v747_v25 = vsub.f32 %v2701_v40, %v2422_v17  ;;  %v2702_v56 = vld [vmem:[#allocation16_spill] sm:$0xff] }
 0x158   : > { %v448_v5 = vpop.xlane.xlu0 %447  ;;  %v840_v58 = vmul.f32 %v1543_v50, %v744_v54  ;;  %v839_v11 = vmul.f32 %v1543_v50, %v743_v46  ;;  %1123 = vmatprep.mubr.f32.mxu1 %v864_v19  ;;  %v748_v29 = vsub.f32 %v2702_v56, %v2422_v17 }
 0x159   : > { %v715_v21 = vmax.f32 %v691_v51, 0.0  ;;  %v2438_v34 = vmul.f32 0.00390625, %v448_v5  ;;  %v799_v59 = vadd.f32 1e-12, %v727_v20  ;;  %1124 = vmatmul.mubr.f32.gmra.mrb[12].mxu1 %v863_v7  ;;  %v680_v41 = vmul.f32 %v2436_v55, %v2436_v55 }
 0x15a   : > { %1051 = vmatprep.mubr.f32.mxu0 %v840_v58  ;;  %v604_v47 = vpop.xlane.xlu1 %603 }
 0x15b   : > { %v787_v60 = vadd.f32 1e-12, %v715_v21  ;;  %1052 = vmatmul.mubr.f32.gmra.mrb[12].mxu0 %v839_v11  ;;  %1548 = vrsqrt.f32 %v799_v59  ;;  %v656_v26 = vmul.f32 0.00390625, %v604_v47  ;;  %v668_v3 = vmul.f32 %v2438_v34, %v2438_v34 }
 0x15c   : > { %v568_v30 = vpop.xlane.xlu0 %567 }
 0x15d   : > { %1550 = vrsqrt.f32 %v787_v60  ;;  %v644_v10 = vmul.f32 0.00390625, %v568_v30  ;;  %v1545_v28 = vpop.eup %1544  ;;  %v704_v24 = vsub.f32 %v656_v26, %v680_v41  ;;  %v2703_v60 = vld [vmem:[#allocation17_spill] sm:$0xff]  ;;  %v2704_v30 = vld [vmem:[#allocation18_spill] sm:$0xff] }
 0x15e   : > { %v487_v0 = vpop.xlane.xlu1 %486  ;;  %v866_v1 = vmul.f32 %v1545_v28, %v770_v31  ;;  %v865_v44 = vmul.f32 %v1545_v28, %v769_v35  ;;  %v773_v47 = vsub.f32 %v2703_v60, %v2436_v55  ;;  %v774_v31 = vsub.f32 %v2704_v30, %v2436_v55 }
 0x15f   : > { %v1547_v57 = vpop.eup %1546  ;;  %v692_v61 = vsub.f32 %v644_v10, %v668_v3  ;;  %v728_v63 = vmax.f32 %v704_v24, 0.0  ;;  %v2452_v43 = vmul.f32 0.00390625, %v487_v0  ;;  %v2706_v24 = vld [vmem:[#allocation20_spill] sm:$0xff] }
 0x160   : > { %v451_v32 = vpop.xlane.xlu0 %450  ;;  %v842_v6 = vmul.f32 %v1547_v57, %v746_v42  ;;  %v841_v13 = vmul.f32 %v1547_v57, %v745_v12  ;;  %1129 = vmatprep.mubr.f32.mxu1 %v866_v1  ;;  %v2705_v12 = vld [vmem:[#allocation19_spill] sm:$0xff]  ;;  %v750_v57 = vsub.f32 %v2706_v24, %v2438_v34 }
 0x161   : > { %v716_v8 = vmax.f32 %v692_v61, 0.0  ;;  %v2454_v48 = vmul.f32 0.00390625, %v451_v32  ;;  %v800_v49 = vadd.f32 1e-12, %v728_v63  ;;  %1130 = vmatmul.mubr.f32.gmra.mrb[14].mxu1 %v865_v44  ;;  %v681_v14 = vmul.f32 %v2452_v43, %v2452_v43 }
 0x162   : > { %1057 = vmatprep.mubr.f32.mxu0 %v842_v6  ;;  %v607_v22 = vpop.xlane.xlu1 %606  ;;  %v749_v42 = vsub.f32 %v2705_v12, %v2438_v34  ;;  %v2708_v34 = vld [vmem:[#allocation22_spill] sm:$0xff] }
 0x163   : > { %v788_v52 = vadd.f32 1e-12, %v716_v8  ;;  %1058 = vmatmul.mubr.f32.gmra.mrb[14].mxu0 %v841_v13  ;;  %1552 = vrsqrt.f32 %v800_v49  ;;  %v657_v2 = vmul.f32 0.00390625, %v607_v22  ;;  %v669_v45 = vmul.f32 %v2454_v48, %v2454_v48 }
 0x164   : > { %v571_v15 = vpop.xlane.xlu0 %570  ;;  %v776_v9 = vsub.f32 %v2708_v34, %v2452_v43 }
 0x165   : > { %1554 = vrsqrt.f32 %v788_v52  ;;  %v645_v16 = vmul.f32 0.00390625, %v571_v15  ;;  %v1549_v4 = vpop.eup %1548  ;;  %v705_v46 = vsub.f32 %v657_v2, %v681_v14  ;;  %v2707_v52 = vld [vmem:[#allocation21_spill] sm:$0xff]  ;;  %v2709_v14 = vld [vmem:[#allocation23_spill] sm:$0xff]  ;;  %v2710_v15 = vld [vmem:[#allocation24_spill] sm:$0xff] }
 0x166   : > { %v490_v50 = vpop.xlane.xlu1 %489  ;;  %v868_v51 = vmul.f32 %v1549_v4, %v772_v18  ;;  %v867_v27 = vmul.f32 %v1549_v4, %v771_v23  ;;  %v775_v22 = vsub.f32 %v2707_v52, %v2452_v43  ;;  %v751_v2 = vsub.f32 %v2709_v14, %v2454_v48 }
 0x167   : > { %v1551_v54 = vpop.eup %1550  ;;  %v693_v39 = vsub.f32 %v645_v16, %v669_v45  ;;  %v729_v19 = vmax.f32 %v705_v46, 0.0  ;;  %v2468_v62 = vmul.f32 0.00390625, %v490_v50  ;;  %v752_v53 = vsub.f32 %v2710_v15, %v2454_v48 }
 0x168   : > { %v454_v7 = vpop.xlane.xlu0 %453  ;;  %v844_v20 = vmul.f32 %v1551_v54, %v748_v29  ;;  %v843_v5 = vmul.f32 %v1551_v54, %v747_v25  ;;  %1135 = vmatprep.mubr.f32.mxu1 %v868_v51 }
 0x169   : > { %v717_v58 = vmax.f32 %v693_v39, 0.0  ;;  %v622_v11 = vmul.f32 0.00390625, %v454_v7  ;;  %v801_v21 = vadd.f32 1e-12, %v729_v19  ;;  %1136 = vmatmul.mubr.f32.gmra.mrb[16].mxu1 %v867_v27  ;;  %v682_v35 = vmul.f32 %v2468_v62, %v2468_v62 }
 0x16a   : > { %1063 = vmatprep.mubr.f32.mxu0 %v844_v20  ;;  %v610_v17 = vpop.xlane.xlu1 %609  ;;  %v777_v43 = vsub.f32 %v2294_v33, %v2468_v62  ;;  %v778_v25 = vsub.f32 %v2296_v36, %v2468_v62  ;;  %v941_v27 = vlaneseq  ;;  %v939_v36 = vld [vmem:[%s2654_s3] sm:$0x3] }
 0x16b   : > { %v789_v59 = vadd.f32 1e-12, %v717_v58  ;;  %1064 = vmatmul.mubr.f32.gmra.mrb[16].mxu0 %v843_v5  ;;  %1556 = vrsqrt.f32 %v801_v21  ;;  %v658_v41 = vmul.f32 0.00390625, %v610_v17  ;;  %v670_v3 = vmul.f32 %v622_v11, %v622_v11 }
 0x16c   : > { %v574_v26 = vpop.xlane.xlu0 %573  ;;  %v753_v29 = vsub.f32 %v2298_v37, %v622_v11  ;;  %v754_v48 = vsub.f32 %v2300_v38, %v622_v11  ;;  %v942_v33 = vshrl.u32 %v941_v27, 7 }
 0x16d   : > { %1558 = vrsqrt.f32 %v789_v59  ;;  %v646_v10 = vmul.f32 0.00390625, %v574_v26  ;;  %v1553_v28 = vpop.eup %1552  ;;  %v706_v61 = vsub.f32 %v658_v41, %v682_v35 }
 0x16e   : > { %v870_v44 = vmul.f32 %v1553_v28, %v774_v31  ;;  %v869_v63 = vmul.f32 %v1553_v28, %v773_v47  ;;  %v943_v19 = vsub.s32 0, %v942_v33  ;;  %v947_v37 = vsub.s32 1, %v942_v33 }
 0x16f   : > { %v1555_v0 = vpop.eup %1554  ;;  %v694_v1 = vsub.f32 %v646_v10, %v670_v3  ;;  %v730_v32 = vmax.f32 %v706_v61, 0.0 }
 0x170   : > { %v846_v6 = vmul.f32 %v1555_v0, %v750_v57  ;;  %v845_v13 = vmul.f32 %v1555_v0, %v749_v42  ;;  %1141 = vmatprep.mubr.f32.mxu1 %v870_v44  ;;  %v2497_v62 = vrot.slane %v939_v36, %v943_v19  ;;  %v2499_v38 = vrot.slane %v939_v36, %v947_v37 }
 0x171   : > { %v718_v8 = vmax.f32 %v694_v1, 0.0  ;;  %v802_v55 = vadd.f32 1e-12, %v730_v32  ;;  %1142 = vmatmul.mubr.f32.gmra.mrb[18].mxu1 %v869_v63 }
 0x172   : > { %1069 = vmatprep.mubr.f32.mxu0 %v846_v6 }
 0x173   : > { %v790_v49 = vadd.f32 1e-12, %v718_v8  ;;  %1070 = vmatmul.mubr.f32.gmra.mrb[18].mxu0 %v845_v13  ;;  %1560 = vrsqrt.f32 %v802_v55 }
 0x175   : > { %1562 = vrsqrt.f32 %v790_v49  ;;  %v1557_v23 = vpop.eup %1556 }
 0x176   : > { %v872_v45 = vmul.f32 %v1557_v23, %v776_v9  ;;  %v871_v16 = vmul.f32 %v1557_v23, %v775_v22 }
 0x177   : > { %v1559_v18 = vpop.eup %1558 }
 0x178   : > { %v848_v4 = vmul.f32 %v1559_v18, %v752_v53  ;;  %v847_v40 = vmul.f32 %v1559_v18, %v751_v2  ;;  %1147 = vmatprep.mubr.f32.mxu1 %v872_v45 }
 0x179   : > { %1148 = vmatmul.mubr.f32.gmra.mrb[20].mxu1 %v871_v16 }
 0x17a   : > { %1075 = vmatprep.mubr.f32.mxu0 %v848_v4 }
 0x17b   : > { %1076 = vmatmul.mubr.f32.gmra.mrb[20].mxu0 %v847_v40 }
 0x17d   : > { %v1561_v56 = vpop.eup %1560 }
 0x17e   : > { %v874_v54 = vmul.f32 %v1561_v56, %v778_v25  ;;  %v873_v39 = vmul.f32 %v1561_v56, %v777_v43 }
 0x17f   : > { %v1563_v46 = vpop.eup %1562 }
 0x180   : > { %v850_v50 = vmul.f32 %v1563_v46, %v754_v48  ;;  %v849_v51 = vmul.f32 %v1563_v46, %v753_v29  ;;  %1153 = vmatprep.mubr.f32.mxu1 %v874_v54 }
 0x181   : > { %1154 = vmatmul.mubr.f32.gmra.mrb[22].mxu1 %v873_v39 }
 0x182   : > { %1081 = vmatprep.mubr.f32.mxu0 %v850_v50 }
 0x183   : > { %1082 = vmatmul.mubr.f32.gmra.mrb[22].mxu0 %v849_v51 }
 0x1fc   : > { %v1017_v7 = vpop.f32.mrb[0].mxu0 }
 0x1fd   : > { %v1018_v20 = vadd.f32 %v1017_v7, %v2497_v62  ;;  %v1019_v5 = vpop.f32.mrb[1].mxu0 }
 0x1fe   : > { %v1020_v58 = vadd.f32 %v1019_v5, %v2499_v38 }
 0x1ff   : > { %1160 = vst [vmem:[%s2504_s9] sm:$0xff] %v1018_v20 }
 0x200   : > { %1161 = vst [vmem:[%s2504_s9 + $0x8] sm:$0xff] %v1020_v58  ;;  %v1089_v11 = vpop.f32.mrb[0].mxu1 }
 0x201   : > { %v1090_v21 = vadd.f32 %v1089_v11, %v2497_v62  ;;  %v1091_v59 = vpop.f32.mrb[1].mxu1 }
 0x202   : > { %v1092_v17 = vadd.f32 %v1091_v59, %v2499_v38 }
 0x203   : > { %1184 = vst [vmem:[%s2504_s9 + $0xc0] sm:$0xff] %v1090_v21 }
 0x204   : > { %1185 = vst [vmem:[%s2504_s9 + $0xc8] sm:$0xff] %v1092_v17  ;;  %v1095_v47 = vpop.f32.mrb[2].mxu1 }
 0x205   : > { %v1096_v41 = vadd.f32 %v1095_v47, %v2497_v62  ;;  %v1097_v30 = vpop.f32.mrb[3].mxu1 }
 0x206   : > { %v1023_v60 = vpop.f32.mrb[2].mxu0  ;;  %v1098_v3 = vadd.f32 %v1097_v30, %v2499_v38 }
 0x207   : > { %v1024_v35 = vadd.f32 %v1023_v60, %v2497_v62  ;;  %v1025_v26 = vpop.f32.mrb[3].mxu0  ;;  %1186 = vst [vmem:[%s2504_s9 + $0xd0] sm:$0xff] %v1096_v41 }
 0x208   : > { %v1026_v31 = vadd.f32 %v1025_v26, %v2499_v38  ;;  %1187 = vst [vmem:[%s2504_s9 + $0xd8] sm:$0xff] %v1098_v3 }
 0x209   : > { %1162 = vst [vmem:[%s2504_s9 + $0x10] sm:$0xff] %v1024_v35 }
 0x20a   : > { %1163 = vst [vmem:[%s2504_s9 + $0x18] sm:$0xff] %v1026_v31 }
 0x20c   : > { %v1101_v10 = vpop.f32.mrb[4].mxu1 }
 0x20d   : > { %v1102_v12 = vadd.f32 %v1101_v10, %v2497_v62  ;;  %v1103_v42 = vpop.f32.mrb[5].mxu1 }
 0x20e   : > { %v1029_v28 = vpop.f32.mrb[4].mxu0  ;;  %v1104_v61 = vadd.f32 %v1103_v42, %v2499_v38 }
 0x20f   : > { %v1030_v24 = vadd.f32 %v1029_v28, %v2497_v62  ;;  %v1031_v57 = vpop.f32.mrb[5].mxu0  ;;  %1188 = vst [vmem:[%s2504_s9 + $0xe0] sm:$0xff] %v1102_v12 }
 0x210   : > { %v1032_v0 = vadd.f32 %v1031_v57, %v2499_v38  ;;  %1189 = vst [vmem:[%s2504_s9 + $0xe8] sm:$0xff] %v1104_v61 }
 0x211   : > { %1164 = vst [vmem:[%s2504_s9 + $0x20] sm:$0xff] %v1030_v24 }
 0x212   : > { %1165 = vst [vmem:[%s2504_s9 + $0x28] sm:$0xff] %v1032_v0 }
 0x214   : > { %v1107_v1 = vpop.f32.mrb[6].mxu1 }
 0x215   : > { %v1108_v63 = vadd.f32 %v1107_v1, %v2497_v62  ;;  %v1109_v32 = vpop.f32.mrb[7].mxu1 }
 0x216   : > { %v1035_v44 = vpop.f32.mrb[6].mxu0  ;;  %v1110_v8 = vadd.f32 %v1109_v32, %v2499_v38 }
 0x217   : > { %v1036_v6 = vadd.f32 %v1035_v44, %v2497_v62  ;;  %v1037_v13 = vpop.f32.mrb[7].mxu0  ;;  %1190 = vst [vmem:[%s2504_s9 + $0xf0] sm:$0xff] %v1108_v63 }
 0x218   : > { %v1038_v55 = vadd.f32 %v1037_v13, %v2499_v38  ;;  %1191 = vst [vmem:[%s2504_s9 + $0xf8] sm:$0xff] %v1110_v8 }
 0x219   : > { %1166 = vst [vmem:[%s2504_s9 + $0x30] sm:$0xff] %v1036_v6 }
 0x21a   : > { %1167 = vst [vmem:[%s2504_s9 + $0x38] sm:$0xff] %v1038_v55 }
 0x21c   : > { %v1113_v49 = vpop.f32.mrb[8].mxu1 }
 0x21d   : > { %v1114_v22 = vadd.f32 %v1113_v49, %v2497_v62  ;;  %v1115_v34 = vpop.f32.mrb[9].mxu1 }
 0x21e   : > { %v1041_v52 = vpop.f32.mrb[8].mxu0  ;;  %v1116_v14 = vadd.f32 %v1115_v34, %v2499_v38 }
 0x21f   : > { %v1042_v9 = vadd.f32 %v1041_v52, %v2497_v62  ;;  %v1043_v23 = vpop.f32.mrb[9].mxu0  ;;  %1192 = vst [vmem:[%s2504_s9 + $0x100] sm:$0xff] %v1114_v22 }
 0x220   : > { %v1044_v2 = vadd.f32 %v1043_v23, %v2499_v38  ;;  %1193 = vst [vmem:[%s2504_s9 + $0x108] sm:$0xff] %v1116_v14 }
 0x221   : > { %1168 = vst [vmem:[%s2504_s9 + $0x40] sm:$0xff] %v1042_v9 }
 0x222   : > { %1169 = vst [vmem:[%s2504_s9 + $0x48] sm:$0xff] %v1044_v2 }
 0x224   : > { %v1119_v15 = vpop.f32.mrb[10].mxu1 }
 0x225   : > { %v1120_v18 = vadd.f32 %v1119_v15, %v2497_v62  ;;  %v1121_v45 = vpop.f32.mrb[11].mxu1 }
 0x226   : > { %v1047_v53 = vpop.f32.mrb[10].mxu0  ;;  %v1122_v40 = vadd.f32 %v1121_v45, %v2499_v38 }
 0x227   : > { %v1048_v16 = vadd.f32 %v1047_v53, %v2497_v62  ;;  %v1049_v4 = vpop.f32.mrb[11].mxu0  ;;  %1194 = vst [vmem:[%s2504_s9 + $0x110] sm:$0xff] %v1120_v18 }
 0x228   : > { %v1050_v43 = vadd.f32 %v1049_v4, %v2499_v38  ;;  %1195 = vst [vmem:[%s2504_s9 + $0x118] sm:$0xff] %v1122_v40 }
 0x229   : > { %1170 = vst [vmem:[%s2504_s9 + $0x50] sm:$0xff] %v1048_v16 }
 0x22a   : > { %1171 = vst [vmem:[%s2504_s9 + $0x58] sm:$0xff] %v1050_v43 }
 0x22c   : > { %v1125_v25 = vpop.f32.mrb[12].mxu1 }
 0x22d   : > { %v1126_v29 = vadd.f32 %v1125_v25, %v2497_v62  ;;  %v1127_v48 = vpop.f32.mrb[13].mxu1 }
 0x22e   : > { %v1053_v56 = vpop.f32.mrb[12].mxu0  ;;  %v1128_v39 = vadd.f32 %v1127_v48, %v2499_v38 }
 0x22f   : > { %v1054_v46 = vadd.f32 %v1053_v56, %v2497_v62  ;;  %v1055_v54 = vpop.f32.mrb[13].mxu0  ;;  %1196 = vst [vmem:[%s2504_s9 + $0x120] sm:$0xff] %v1126_v29 }
 0x230   : > { %v1056_v50 = vadd.f32 %v1055_v54, %v2499_v38  ;;  %1197 = vst [vmem:[%s2504_s9 + $0x128] sm:$0xff] %v1128_v39 }
 0x231   : > { %1172 = vst [vmem:[%s2504_s9 + $0x60] sm:$0xff] %v1054_v46 }
 0x232   : > { %1173 = vst [vmem:[%s2504_s9 + $0x68] sm:$0xff] %v1056_v50 }
 0x234   : > { %v1131_v51 = vpop.f32.mrb[14].mxu1 }
 0x235   : > { %v1132_v33 = vadd.f32 %v1131_v51, %v2497_v62  ;;  %v1133_v19 = vpop.f32.mrb[15].mxu1 }
 0x236   : > { %v1059_v27 = vpop.f32.mrb[14].mxu0  ;;  %v1134_v7 = vadd.f32 %v1133_v19, %v2499_v38 }
 0x237   : > { %v1060_v36 = vadd.f32 %v1059_v27, %v2497_v62  ;;  %v1061_v37 = vpop.f32.mrb[15].mxu0  ;;  %1198 = vst [vmem:[%s2504_s9 + $0x130] sm:$0xff] %v1132_v33 }
 0x238   : > { %v1062_v20 = vadd.f32 %v1061_v37, %v2499_v38  ;;  %1199 = vst [vmem:[%s2504_s9 + $0x138] sm:$0xff] %v1134_v7 }
 0x239   : > { %1174 = vst [vmem:[%s2504_s9 + $0x70] sm:$0xff] %v1060_v36 }
 0x23a   : > { %1175 = vst [vmem:[%s2504_s9 + $0x78] sm:$0xff] %v1062_v20 }
 0x23c   : > { %v1137_v5 = vpop.f32.mrb[16].mxu1 }
 0x23d   : > { %v1138_v11 = vadd.f32 %v1137_v5, %v2497_v62  ;;  %v1139_v21 = vpop.f32.mrb[17].mxu1 }
 0x23e   : > { %v1065_v58 = vpop.f32.mrb[16].mxu0  ;;  %v1140_v60 = vadd.f32 %v1139_v21, %v2499_v38 }
 0x23f   : > { %v1066_v59 = vadd.f32 %v1065_v58, %v2497_v62  ;;  %v1067_v17 = vpop.f32.mrb[17].mxu0  ;;  %1200 = vst [vmem:[%s2504_s9 + $0x140] sm:$0xff] %v1138_v11 }
 0x240   : > { %v1068_v47 = vadd.f32 %v1067_v17, %v2499_v38  ;;  %1201 = vst [vmem:[%s2504_s9 + $0x148] sm:$0xff] %v1140_v60 }
 0x241   : > { %1176 = vst [vmem:[%s2504_s9 + $0x80] sm:$0xff] %v1066_v59 }
 0x242   : > { %1177 = vst [vmem:[%s2504_s9 + $0x88] sm:$0xff] %v1068_v47 }
 0x244   : > { %v1143_v35 = vpop.f32.mrb[18].mxu1 }
 0x245   : > { %v1144_v26 = vadd.f32 %v1143_v35, %v2497_v62  ;;  %v1145_v30 = vpop.f32.mrb[19].mxu1 }
 0x246   : > { %v1071_v41 = vpop.f32.mrb[18].mxu0  ;;  %v1146_v10 = vadd.f32 %v1145_v30, %v2499_v38 }
 0x247   : > { %v1072_v31 = vadd.f32 %v1071_v41, %v2497_v62  ;;  %v1073_v3 = vpop.f32.mrb[19].mxu0  ;;  %1202 = vst [vmem:[%s2504_s9 + $0x150] sm:$0xff] %v1144_v26 }
 0x248   : > { %v1074_v28 = vadd.f32 %v1073_v3, %v2499_v38  ;;  %1203 = vst [vmem:[%s2504_s9 + $0x158] sm:$0xff] %v1146_v10 }
 0x249   : > { %1178 = vst [vmem:[%s2504_s9 + $0x90] sm:$0xff] %v1072_v31 }
 0x24a   : > { %1179 = vst [vmem:[%s2504_s9 + $0x98] sm:$0xff] %v1074_v28 }
 0x24c   : > { %v1149_v12 = vpop.f32.mrb[20].mxu1 }
 0x24d   : > { %v1150_v24 = vadd.f32 %v1149_v12, %v2497_v62  ;;  %v1151_v57 = vpop.f32.mrb[21].mxu1 }
 0x24e   : > { %v1077_v42 = vpop.f32.mrb[20].mxu0  ;;  %v1152_v1 = vadd.f32 %v1151_v57, %v2499_v38 }
 0x24f   : > { %v1078_v61 = vadd.f32 %v1077_v42, %v2497_v62  ;;  %v1079_v0 = vpop.f32.mrb[21].mxu0  ;;  %1204 = vst [vmem:[%s2504_s9 + $0x160] sm:$0xff] %v1150_v24 }
 0x250   : > { %v1080_v44 = vadd.f32 %v1079_v0, %v2499_v38  ;;  %1205 = vst [vmem:[%s2504_s9 + $0x168] sm:$0xff] %v1152_v1 }
 0x251   : > { %1180 = vst [vmem:[%s2504_s9 + $0xa0] sm:$0xff] %v1078_v61 }
 0x252   : > { %1181 = vst [vmem:[%s2504_s9 + $0xa8] sm:$0xff] %v1080_v44 }
 0x254   : > { %v1155_v63 = vpop.f32.mrb[22].mxu1 }
 0x255   : > { %v1156_v6 = vadd.f32 %v1155_v63, %v2497_v62  ;;  %v1157_v13 = vpop.f32.mrb[23].mxu1 }
 0x256   : > { %v1083_v32 = vpop.f32.mrb[22].mxu0  ;;  %v1158_v49 = vadd.f32 %v1157_v13, %v2499_v38 }
 0x257   : > { %v1084_v8 = vadd.f32 %v1083_v32, %v2497_v62  ;;  %v1085_v55 = vpop.f32.mrb[23].mxu0  ;;  %1206 = vst [vmem:[%s2504_s9 + $0x170] sm:$0xff] %v1156_v6 }
 0x258   : > { %v1086_v52 = vadd.f32 %v1085_v55, %v2499_v38  ;;  %1207 = vst [vmem:[%s2504_s9 + $0x178] sm:$0xff] %v1158_v49 }
 0x259   : > { %1182 = vst [vmem:[%s2504_s9 + $0xb0] sm:$0xff] %v1084_v8 }
 0x25a   : > { %1183 = vst [vmem:[%s2504_s9 + $0xb8] sm:$0xff] %v1086_v52 }
 0x25b   : > { %1665 = shalt.err (!%p1662_p6)
}
 0x25c   : > { %s1666_s28 = scalar_lea.hbm %s2600_s6, 6144  ;;  %s1670_s12 = scalar_lea.hbm %s2655_s4, 12288 }
 0x25d   : > { %p1667_p8 = scmp.ne.s32.totalorder %s2600_s6, %s1666_s28  ;;  %p1671_p4 = scmp.lt.u32.totalorder %s2600_s6, %s2655_s4 }
 0x25e   : > { %p1672_p11 = scmp.lt.u32.totalorder %s1670_s12, %s1666_s28  ;;  %p1674_p3 = scmp.lt.u32.totalorder %s1666_s28, %s2600_s6 }
 0x25f   : > { %p1668_p10 = pnand %p1667_p8, %p1855_p12 }
 0x260   : > { %p1673_p13 = por %p1672_p11, %p1671_p4 }
 0x261   : > { %p1669_p0 = pneg %p1668_p10 }
 0x262   : > { %p1675_p7 = por %p1674_p3, %p1673_p13 }
 0x264   : > { %p1676_p9 = pnand %p1675_p7, %p1669_p0 }
 0x266   : > { %1679 = shalt.err (!%p1676_p9)
}
 0x267   : > { %s1734_s8 = smov 256   ;;  %s1735_s9 = smov 16  }
 0x268   : > { %1458 = dma.vmem_to_hbm [thread:$0]  (%p1855_p12), %s2602_s11, 6144, %s2600_s6, %s1209_s19, %s1734_s8, %s1734_s8, %s1735_s9  }
 0x269 PF: > { %s1238_s5 = sand.u32 1, %s1714_s15   ;;  %p2711_p1 = scmp.ne.s32.totalorder %s2674_s22, 0 }
 0x26a   : > { %p2712_p5 = scmp.ge.s32.totalorder %s1726_s18, 2  ;;  %s1239_s29 = scalar_lea.sflag [#allocation4], %s1238_s5 }
 0x26c   : > { %p1472_p2 = pnand %p2712_p5, %p2711_p1 }
 0x26e   : > { %1709 = dma.done.wait (!%p1472_p2), %s1239_s29, 6144  }
 0x26f   : > { %1711 = vsyncadd (!%p1472_p2), %s1239_s29, 4294961152  ;;  %p20_p6 = scmp.ge.s32.totalorder %s1817_s27, 4   ;;  %s2713_s15 = smov %s1718_s16 }
 0x270   : > { %s2714_s16 = smov %s1722_s17  ;;  %s2715_s17 = smov %s1851_s24 }
 0x271   : > { %s2716_s18 = smov %s1817_s27  ;;  %22 = sbr.rel (!%p20_p6) target bundleno = 9 (0x9), region = 98 }
 0x278   :  { %1244 = vsyncpa [#allocation3], 1 }
 0x279   :  { %1246 = vsyncpa [#allocation3 + $0x1], 1 }
 0x27a   :  { %1247 = vsyncpa [#allocation6], 1 }
 0x27b   :  { %1249 = vsyncpa [#allocation6 + $0x1], 1 }
 0x27c   :  { %1250 = vsyncpa [#allocation4], 1 }
 0x27d   :  { %1252 = vsyncpa [#allocation4 + $0x1], 1 }

// kernel: tpu_custom_call.1
= control target key start
LH: loop header
LB: loop body
LE: loop exit
PB: predicated region body
PF: predicated region fallthrough
CT: control target
= control target key end

     0   :  { %s2651_s0 = inlined_call_operand.hbm [shape: f32[384,256], index: 0, kind: input, shape index: {}]   ;;  %s2652_s1 = inlined_call_operand.hbm [shape: f32[384,256], index: 1, kind: input, shape index: {}]   ;;  %s2653_s2 = inlined_call_operand.hbm [shape: f32[256,256], index: 2, kind: input, shape index: {}]   ;;  %s2654_s3 = inlined_call_operand.vmem [shape: f32[1,256], index: 3, kind: input, shape index: {}]   ;;  %s2655_s4 = inlined_call_operand.hbm [shape: f32[384,256], index: 4, kind: output, shape index: {}]  }
   0x1   :  { %2672 = sst [smem:[#allocation25_spill]] %s2651_s0 }
   0x2   :  { %9 = vsyncpa [#allocation3], 0 }
   0x3   :  { %11 = vsyncpa [#allocation3 + $0x1], 0 }
   0x4   :  { %12 = vsyncpa [#allocation6], 0 }
   0x5   :  { %14 = vsyncpa [#allocation6 + $0x1], 0 }
   0x6   :  { %15 = vsyncpa [#allocation4], 0 }
   0x7   :  { %17 = vsyncpa [#allocation4 + $0x1], 0  ;;  %s1761_s15 = smov 0   ;;  %s1763_s16 = smov 0  }
   0x8   :  { %s1765_s17 = smov 0   ;;  %s1767_s18 = smov 0  }
   0x9 LB: > { %s1782_s19 = sadd.s32 4294967295, %s1726_s18   ;;  %s1328_s20 = sadd.s32 4294967294, %s1726_s18   ;;  %s1726_s18 = sphi %s1767_s18, %s2716_s18   ;;  %s1722_s17 = sphi %s1765_s17, %s2715_s17   ;;  %s1718_s16 = sphi %s1763_s16, %s2714_s16   ;;  %s1714_s15 = sphi %s1761_s15, %s2713_s15  }
   0xa   : > { %p43_p0 = scmp.ne.s32.totalorder %s1718_s16, %s1714_s15  ;;  %p2656_p1 = scmp.eq.s32.totalorder %s1782_s19, 0 }
   0xb   : > { %p141_p3 = scmp.eq.s32.totalorder %s1328_s20, 1  ;;  %p1329_p5 = scmp.ge.s32.totalorder %s1726_s18, 1 }
   0xc   : > { %p1791_p4 = por %p2656_p1, %p43_p0  ;;  %p148_p7 = scmp.lt.s32.totalorder %s1726_s18, 3 }
   0xd   : > { %p1796_p6 = por %p141_p3, %p43_p0  ;;  %s1728_s24 = smov [#allocation7]  }
   0xe   : > { %s2673_s21 = scalar_select %p1791_p4, 1, 0 }
   0xf   : > { %s2674_s22 = scalar_select %p1796_p6, 1, 0 }
  0x10   : > { %p1801_p8 = pnand %p1329_p5, %p148_p7  ;;  %s160_s25 = sshll.u32 %s1728_s24, 4  ;;  %s1805_s25 = int_to_ptr.vmem [resolvable:$true] %s160_s25 }
  0x11   : > { %s1817_s27 = sadd.s32 1, %s1726_s18   ;;  %s30_s28 = sadd.s32 1, %s1722_s17 }
  0x12   : > { %s2675_s23 = scalar_select %p1801_p8, 1, 0 }
  0x13   : > { %p1460_p9 = pneg %p1801_p8  ;;  %s27_s29 = ssub.s32 %s1726_s18, %s1817_s27 }
  0x14   : > { %s1564_s6 = scalar_lea.hbm %s2653_s2, 8192 }
  0x15   : > { %p1812_p11 = pnand %p1460_p9, %p2656_p1  ;;  %p1565_p12 = scmp.ne.s32.totalorder %s2653_s2, %s1564_s6 }
  0x16   : > { %p1571_p5 = scmp.lt.u32.totalorder %s1564_s6, %s2653_s2 }
  0x17   : > { %p1566_p13 = pneg %p1812_p11 }
  0x19   : > { %p1567_p0 = pnand %p1566_p13, %p1565_p12 }
  0x1b   : > { %p1568_p3 = pneg %p1567_p0 }
  0x1d   : > { %p1573_p7 = pnand %p1571_p5, %p1568_p3 }
  0x1f   : > { %1576 = shalt.err (!%p1573_p7)
}
  0x20   : > { %s1577_s11 = scalar_lea.vmem %s1805_s25, 8192  ;;  %p1585_p2 = scmp.lt.s32.totalorder %s1805_s25, %s1805_s25 }
  0x21   : > { %p1578_p9 = scmp.ne.s32.totalorder %s1805_s25, %s1577_s11  ;;  %p1586_p6 = scmp.lt.s32.totalorder %s1577_s11, %s1577_s11 }
  0x23   : > { %p1580_p10 = pnand %p1578_p9, %p1566_p13  ;;  %p1587_p4 = por %p1586_p6, %p1585_p2 }
  0x25   : > { %p1581_p1 = pneg %p1580_p10 }
  0x27   : > { %p1588_p8 = pnand %p1587_p4, %p1581_p1 }
  0x29   : > { %1591 = shalt.err (!%p1588_p8)
}
  0x2a   : > { %s1729_s12 = smov 256   ;;  %s1730_s13 = smov 16  }
  0x2b   : > { %1463 = dma.hbm_to_vmem [thread:$0]  (!%p1812_p11), %s2653_s2, 8192, %s1805_s25, [#allocation6], %s1729_s12, %s1729_s12, %s1730_s13  }
  0x2c   : > { %p28_p1 = scmp.eq.s32.totalorder %s27_s29, 0  ;;  %p37_p2 = scmp.ne.s32.totalorder %s1722_s17, %s1718_s16 }
  0x2d   : > { %p38_p4 = scmp.eq.s32.totalorder %s1726_s18, 0  ;;  %p1476_p6 = scmp.lt.s32.totalorder %s1726_s18, 2 }
  0x2e   : > { %s1851_s24 = scalar_select %p28_p1, %s1722_s17, %s30_s28  }
  0x2f   : > { %p39_p8 = por %p38_p4, %p37_p2  ;;  %p2677_p10 = scmp.eq.s32.totalorder %s1782_s19, 1 }
  0x30   : > { %s177_s26 = sand.u32 1, %s1722_s17   ;;  %s2659_s5 = smul.u32 6144, %s1726_s18 }
  0x31   : > { %p1855_p12 = por %p2677_p10, %p37_p2  ;;  %s1861_s6 = smul.u32 384, %s177_s26 }
  0x32   : > { %s2679_s0 = sld [smem:[#allocation25_spill]]  ;;  %p1870_p11 = pnand %p1476_p6, %p39_p8 }
  0x33   : > { %s181_s9 = scalar_lea.vmem [#allocation2], %s1861_s6  ;;  %s1878_s11 = scalar_lea.sflag [#allocation3], %s177_s26 }
  0x34   : > { %s189_s10 = sshll.u32 %s181_s9, 4  ;;  %p1594_p0 = pneg %p1870_p11  ;;  %s1876_s10 = int_to_ptr.vmem [resolvable:$true] %s189_s10 }
  0x38   : > { %s1868_s25 = scalar_lea.hbm %s2679_s0, %s2659_s5  ;;  %s1597_s8 = scalar_lea.hbm %s2679_s0, 12288 }
  0x39   : > { %s1592_s14 = scalar_lea.hbm %s1868_s25, 6144  ;;  %p1598_p7 = scmp.lt.u32.totalorder %s1868_s25, %s2679_s0 }
  0x3a   : > { %p1593_p13 = scmp.ne.s32.totalorder %s1868_s25, %s1592_s14  ;;  %p1599_p9 = scmp.lt.u32.totalorder %s1597_s8, %s1592_s14 }
  0x3b   : > { %p1601_p2 = scmp.lt.u32.totalorder %s1592_s14, %s1868_s25 }
  0x3c   : > { %p1595_p3 = pnand %p1594_p0, %p1593_p13  ;;  %p1600_p1 = por %p1599_p9, %p1598_p7 }
  0x3e   : > { %p1596_p5 = pneg %p1595_p3  ;;  %p1602_p4 = por %p1601_p2, %p1600_p1 }
  0x40   : > { %p1603_p6 = pnand %p1602_p4, %p1596_p5 }
  0x42   : > { %1606 = shalt.err (!%p1603_p6)
}
  0x43   : > { %s1607_s26 = scalar_lea.vmem %s1876_s10, 6144  ;;  %s1731_s9 = smov [#allocation2]  }
  0x44   : > { %p1608_p8 = scmp.ne.s32.totalorder %s1876_s10, %s1607_s26  ;;  %s1612_s20 = sshll.u32 %s1731_s9, 4  ;;  %s1613_s20 = int_to_ptr.vmem [resolvable:$false] %s1612_s20 }
  0x45   : > { %s1614_s5 = scalar_lea.vmem %s1613_s20, 12288  ;;  %p1615_p3 = scmp.lt.s32.totalorder %s1876_s10, %s1613_s20 }
  0x46   : > { %p1610_p10 = pnand %p1608_p8, %p1594_p0  ;;  %p1616_p7 = scmp.lt.s32.totalorder %s1614_s5, %s1607_s26 }
  0x48   : > { %p1611_p13 = pneg %p1610_p10  ;;  %p1617_p9 = por %p1616_p7, %p1615_p3 }
  0x4a   : > { %p1618_p1 = pnand %p1617_p9, %p1611_p13 }
  0x4c   : > { %1621 = shalt.err (!%p1618_p1)
}
  0x4d   : > { %1467 = dma.hbm_to_vmem [thread:$0]  (!%p1870_p11), %s1868_s25, 6144, %s1876_s10, %s1878_s11, %s1729_s12, %s1729_s12, %s1730_s13  }
  0x4e   : > { %s2681_s29 = smul.u32 6144, %s1726_s18  ;;  %s203_s26 = scalar_lea.vmem [#allocation5], %s1861_s6 }
  0x4f   : > { %s211_s9 = sshll.u32 %s203_s26, 4  ;;  %s2682_s20 = sand.u32 1, %s1726_s18   ;;  %s1917_s9 = int_to_ptr.vmem [resolvable:$true] %s211_s9 }
  0x50   : > { %s1914_s8 = scalar_lea.hbm %s2652_s1, %s2681_s29  ;;  %s1921_s5 = scalar_lea.sflag [#allocation6], %s2682_s20 }
  0x51   : > { %s1622_s0 = scalar_lea.hbm %s1914_s8, 6144  ;;  %s1627_s11 = scalar_lea.hbm %s2652_s1, 12288 }
  0x52   : > { %p1623_p5 = scmp.ne.s32.totalorder %s1914_s8, %s1622_s0  ;;  %p1628_p6 = scmp.lt.u32.totalorder %s1914_s8, %s2652_s1 }
  0x53   : > { %p1629_p8 = scmp.lt.u32.totalorder %s1627_s11, %s1622_s0  ;;  %p1631_p13 = scmp.lt.u32.totalorder %s1622_s0, %s1914_s8 }
  0x54   : > { %p1625_p2 = pnand %p1623_p5, %p1594_p0 }
  0x55   : > { %p1630_p10 = por %p1629_p8, %p1628_p6 }
  0x56   : > { %p1626_p4 = pneg %p1625_p2 }
  0x57   : > { %p1632_p3 = por %p1631_p13, %p1630_p10 }
  0x59   : > { %p1633_p7 = pnand %p1632_p3, %p1626_p4 }
  0x5b   : > { %1636 = shalt.err (!%p1633_p7)
}
  0x5c   : > { %s1637_s6 = scalar_lea.vmem %s1917_s9, 6144  ;;  %s1732_s7 = smov [#allocation5]  }
  0x5d   : > { %p1638_p9 = scmp.ne.s32.totalorder %s1917_s9, %s1637_s6  ;;  %s1642_s26 = sshll.u32 %s1732_s7, 4  ;;  %s1643_s26 = int_to_ptr.vmem [resolvable:$false] %s1642_s26 }
  0x5e   : > { %s1644_s20 = scalar_lea.vmem %s1643_s26, 12288  ;;  %p1645_p2 = scmp.lt.s32.totalorder %s1917_s9, %s1643_s26 }
  0x5f   : > { %p1640_p1 = pnand %p1638_p9, %p1594_p0  ;;  %p1646_p6 = scmp.lt.s32.totalorder %s1644_s20, %s1637_s6 }
  0x61   : > { %p1641_p5 = pneg %p1640_p1  ;;  %p1647_p8 = por %p1646_p6, %p1645_p2 }
  0x63   : > { %p1648_p10 = pnand %p1647_p8, %p1641_p5 }
  0x65   : > { %1651 = shalt.err (!%p1648_p10)
}
  0x66   : > { %1470 = dma.hbm_to_vmem [thread:$0]  (!%p1870_p11), %s1914_s8, 6144, %s1917_s9, %s1921_s5, %s1729_s12, %s1729_s12, %s1730_s13  }
  0x67   : > { %p2683_p0 = scmp.ne.s32.totalorder %s2675_s23, 0 }
  0x69   : > { %223 = sbr.rel (%p2683_p0) target bundleno = 617 (0x269), region = 36 }
  0x70   : > { %s1953_s0 = sand.u32 1, %s1718_s16   ;;  %p2684_p4 = scmp.ne.s32.totalorder %s2673_s21, 0 }
  0x71   : > { %s1956_s25 = smul.u32 384, %s1953_s0  ;;  %s226_s28 = scalar_lea.sflag [#allocation3], %s1953_s0 }
  0x73   : > { %s1960_s10 = scalar_lea.vmem [#allocation2], %s1956_s25 }
  0x74   : > { %1697 = dma.done.wait (%p2684_p4), %s226_s28, 6144  }
  0x75   : > { %1699 = vsyncadd (%p2684_p4), %s226_s28, 4294961152  ;;  %s234_s23 = sand.u32 1, %s1782_s19   ;;  %s1968_s13 = scalar_lea.vmem [#allocation5], %s1956_s25 }
  0x76   : > { %s235_s12 = scalar_lea.sflag [#allocation6], %s234_s23 }
  0x77   : > { %1701 = dma.done.wait (%p2684_p4), %s235_s12, 6144  }
  0x78   : > { %1703 = vsyncadd (%p2684_p4), %s235_s12, 4294961152  ;;  %p2685_p11 = scmp.eq.s32.totalorder %s1782_s19, 0 }
  0x7a   : > { %1705 = dma.done.wait (%p2685_p11), [#allocation6], 8192   ;;  %p2686_p13 = pmov %p2685_p11 }
  0x7b   : > { %v301_v0 = vld [vmem:[%s1960_s10 + $0xd0] sm:$0xff]  ;;  %v302_v1 = vld [vmem:[%s1960_s10 + $0xd8] sm:$0xff]  ;;  %v275_v5 = vld [vmem:[%s1960_s10] sm:$0xff]  ;;  %s2504_s9 = scalar_lea.vmem [#allocation8], %s1956_s25  ;;  %s1350_s5 = smul.u32 6144, %s1782_s19 }
  0x7c   : > { %1707 = vsyncadd (%p2686_p13), [#allocation6], 4294959104  ;;  %v349_v2 = vld [vmem:[%s1968_s13 + $0xd0] sm:$0xff]  ;;  %v350_v3 = vld [vmem:[%s1968_s13 + $0xd8] sm:$0xff]  ;;  %s1223_s11 = sshll.u32 %s2504_s9, 4  ;;  %s1209_s19 = scalar_lea.sflag [#allocation4], %s1953_s0  ;;  %s2602_s11 = int_to_ptr.vmem [resolvable:$true] %s1223_s11 }
  0x7d   : > { %v1982_v4 = vadd.f32 %v349_v2, %v301_v0  ;;  %v276_v6 = vld [vmem:[%s1960_s10 + $0x8] sm:$0xff]  ;;  %v1986_v7 = vadd.f32 %v350_v3, %v302_v1  ;;  %v323_v8 = vld [vmem:[%s1968_s13] sm:$0xff]  ;;  %v277_v19 = vld [vmem:[%s1960_s10 + $0x10] sm:$0xff]  ;;  %s2600_s6 = scalar_lea.hbm %s2655_s4, %s1350_s5  ;;  %s1652_s7 = scalar_lea.vmem %s2602_s11, 6144 }
  0x7e   : > { %v324_v9 = vld [vmem:[%s1968_s13 + $0x8] sm:$0xff]  ;;  %v299_v10 = vld [vmem:[%s1960_s10 + $0xc0] sm:$0xff]  ;;  %v1991_v11 = vadd.f32 %v323_v8, %v275_v5  ;;  %v278_v20 = vld [vmem:[%s1960_s10 + $0x18] sm:$0xff]  ;;  %p1653_p3 = scmp.ne.s32.totalorder %s2602_s11, %s1652_s7  ;;  %s1733_s26 = smov [#allocation8]  }
  0x7f   : > { %v1993_v12 = vadd.f32 %v324_v9, %v276_v6  ;;  %v300_v13 = vld [vmem:[%s1960_s10 + $0xc8] sm:$0xff]  ;;  %v347_v14 = vld [vmem:[%s1968_s13 + $0xc0] sm:$0xff]  ;;  %v458_v16 = vadd.f32 %v1986_v7, %v1982_v4  ;;  %v325_v21 = vld [vmem:[%s1968_s13 + $0x10] sm:$0xff]  ;;  %v517_v33 = vmul.f32 %v1982_v4, %v1982_v4  ;;  %v518_v34 = vmul.f32 %v1986_v7, %v1986_v7  ;;  %s1656_s20 = sshll.u32 %s1733_s26, 4  ;;  %s1657_s20 = int_to_ptr.vmem [resolvable:$false] %s1656_s20 }
  0x80   : > { %v348_v15 = vld [vmem:[%s1968_s13 + $0xc8] sm:$0xff]  ;;  %v2000_v17 = vadd.f32 %v347_v14, %v299_v10  ;;  %v491_v23 = vmul.f32 %v1991_v11, %v1991_v11  ;;  %v326_v25 = vld [vmem:[%s1968_s13 + $0x18] sm:$0xff]  ;;  %v2020_v30 = vadd.f32 %v325_v21, %v277_v19  ;;  %v303_v35 = vld [vmem:[%s1960_s10 + $0xe0] sm:$0xff]  ;;  %p1654_p7 = pnand %p1653_p3, %p1855_p12  ;;  %s1658_s25 = scalar_lea.vmem %s1657_s20, 12288 }
  0x81   : > { %v2002_v18 = vadd.f32 %v348_v15, %v300_v13  ;;  %v419_v22 = vadd.f32 %v1993_v12, %v1991_v11  ;;  %v492_v24 = vmul.f32 %v1993_v12, %v1993_v12  ;;  %459 = vadd.xlane.f32.xlu1 %v458_v16  ;;  %v2022_v31 = vadd.f32 %v326_v25, %v278_v20  ;;  %v304_v36 = vld [vmem:[%s1960_s10 + $0xe8] sm:$0xff]  ;;  %v351_v40 = vld [vmem:[%s1968_s13 + $0xe0] sm:$0xff]  ;;  %v305_v55 = vld [vmem:[%s1960_s10 + $0xf0] sm:$0xff]  ;;  %p1659_p1 = scmp.lt.s32.totalorder %s2602_s11, %s1657_s20  ;;  %p1660_p5 = scmp.lt.s32.totalorder %s1658_s25, %s1652_s7 }
  0x82   : > { %v515_v26 = vmul.f32 %v2000_v17, %v2000_v17  ;;  %v493_v38 = vmul.f32 %v2020_v30, %v2020_v30  ;;  %v352_v41 = vld [vmem:[%s1968_s13 + $0xe8] sm:$0xff]  ;;  %v279_v42 = vld [vmem:[%s1960_s10 + $0x20] sm:$0xff]  ;;  %v578_v46 = vadd.f32 %v518_v34, %v517_v33  ;;  %v2042_v47 = vadd.f32 %v351_v40, %v303_v35  ;;  %v306_v56 = vld [vmem:[%s1960_s10 + $0xf8] sm:$0xff]  ;;  %p1655_p9 = pneg %p1654_p7 }
  0x83   : > { %v516_v27 = vmul.f32 %v2002_v18, %v2002_v18  ;;  %420 = vadd.xlane.f32.xlu0 %v419_v22  ;;  %v539_v28 = vadd.f32 %v492_v24, %v491_v23  ;;  %v455_v29 = vadd.f32 %v2002_v18, %v2000_v17  ;;  %v422_v37 = vadd.f32 %v2022_v31, %v2020_v30  ;;  %v280_v43 = vld [vmem:[%s1960_s10 + $0x28] sm:$0xff]  ;;  %v327_v44 = vld [vmem:[%s1968_s13 + $0x20] sm:$0xff]  ;;  %v353_v60 = vld [vmem:[%s1968_s13 + $0xf0] sm:$0xff]  ;;  %p1661_p2 = por %p1660_p5, %p1659_p1 }
  0x84   : > { %v494_v39 = vmul.f32 %v2022_v31, %v2022_v31  ;;  %v328_v45 = vld [vmem:[%s1968_s13 + $0x28] sm:$0xff]  ;;  %v2044_v48 = vadd.f32 %v352_v41, %v304_v36  ;;  %v2046_v50 = vadd.f32 %v327_v44, %v279_v42  ;;  %v519_v53 = vmul.f32 %v2042_v47, %v2042_v47  ;;  %v354_v61 = vld [vmem:[%s1968_s13 + $0xf8] sm:$0xff]  ;;  %v281_v62 = vld [vmem:[%s1960_s10 + $0x30] sm:$0xff] }
  0x85   : > { %540 = vadd.xlane.f32.xlu1 %v539_v28  ;;  %v575_v32 = vadd.f32 %v516_v27, %v515_v26  ;;  %v2048_v51 = vadd.f32 %v328_v45, %v280_v43  ;;  %v282_v63 = vld [vmem:[%s1960_s10 + $0x38] sm:$0xff]  ;;  %v329_v0 = vld [vmem:[%s1968_s13 + $0x30] sm:$0xff]  ;;  %v2070_v3 = vadd.f32 %v353_v60, %v305_v55  ;;  %v2072_v5 = vadd.f32 %v354_v61, %v306_v56  ;;  %v307_v15 = vld [vmem:[%s1960_s10 + $0x100] sm:$0xff]  ;;  %p1662_p6 = pnand %p1661_p2, %p1655_p9 }
  0x86   : > { %v542_v49 = vadd.f32 %v494_v39, %v493_v38  ;;  %v461_v52 = vadd.f32 %v2044_v48, %v2042_v47  ;;  %v520_v54 = vmul.f32 %v2044_v48, %v2044_v48  ;;  %v495_v58 = vmul.f32 %v2046_v50, %v2046_v50  ;;  %v330_v1 = vld [vmem:[%s1968_s13 + $0x38] sm:$0xff]  ;;  %v308_v16 = vld [vmem:[%s1960_s10 + $0x108] sm:$0xff]  ;;  %v355_v22 = vld [vmem:[%s1968_s13 + $0x100] sm:$0xff] }
  0x87   : > { %456 = vadd.xlane.f32.xlu0 %v455_v29  ;;  %v425_v57 = vadd.f32 %v2048_v51, %v2046_v50  ;;  %v496_v59 = vmul.f32 %v2048_v51, %v2048_v51  ;;  %v2074_v8 = vadd.f32 %v329_v0, %v281_v62  ;;  %v2076_v9 = vadd.f32 %v330_v1, %v282_v63  ;;  %v356_v23 = vld [vmem:[%s1968_s13 + $0x108] sm:$0xff]  ;;  %v283_v24 = vld [vmem:[%s1960_s10 + $0x40] sm:$0xff]  ;;  %v309_v36 = vld [vmem:[%s1960_s10 + $0x110] sm:$0xff] }
  0x88   : > { %v581_v2 = vadd.f32 %v520_v54, %v519_v53  ;;  %v464_v10 = vadd.f32 %v2072_v5, %v2070_v3  ;;  %v521_v13 = vmul.f32 %v2070_v3, %v2070_v3  ;;  %v522_v14 = vmul.f32 %v2072_v5, %v2072_v5  ;;  %v284_v25 = vld [vmem:[%s1960_s10 + $0x48] sm:$0xff]  ;;  %v331_v26 = vld [vmem:[%s1968_s13 + $0x40] sm:$0xff]  ;;  %v357_v38 = vld [vmem:[%s1968_s13 + $0x110] sm:$0xff] }
  0x89   : > { %576 = vadd.xlane.f32.xlu1 %v575_v32  ;;  %v545_v6 = vadd.f32 %v496_v59, %v495_v58  ;;  %v428_v19 = vadd.f32 %v2076_v9, %v2074_v8  ;;  %v497_v20 = vmul.f32 %v2074_v8, %v2074_v8  ;;  %v498_v21 = vmul.f32 %v2076_v9, %v2076_v9  ;;  %v332_v27 = vld [vmem:[%s1968_s13 + $0x48] sm:$0xff]  ;;  %v878_v40 = vld [vmem:[#allocation7 + $0x18] sm:$0xff]  ;;  %v285_v45 = vld [vmem:[%s1960_s10 + $0x50] sm:$0xff] }
  0x8a   : > { %v584_v28 = vadd.f32 %v522_v14, %v521_v13  ;;  %v2098_v29 = vadd.f32 %v355_v22, %v307_v15  ;;  %v2100_v32 = vadd.f32 %v356_v23, %v308_v16  ;;  %v2102_v34 = vadd.f32 %v331_v26, %v283_v24  ;;  %v876_v39 = vld [vmem:[#allocation7 + $0x8] sm:$0xff]  ;;  %v358_v44 = vld [vmem:[%s1968_s13 + $0x118] sm:$0xff]  ;;  %v333_v54 = vld [vmem:[%s1968_s13 + $0x50] sm:$0xff] }
  0x8b   : > { %423 = vadd.xlane.f32.xlu0 %v422_v37  ;;  %v548_v33 = vadd.f32 %v498_v21, %v497_v20  ;;  %v2104_v35 = vadd.f32 %v332_v27, %v284_v25  ;;  %v310_v37 = vld [vmem:[%s1960_s10 + $0x118] sm:$0xff]  ;;  %v875_v55 = vld [vmem:[#allocation7] sm:$0xff]  ;;  %v877_v56 = vld [vmem:[#allocation7 + $0x10] sm:$0xff]  ;;  %v1351_v58 = vpack.c.bf16 %v878_v40, %v876_v39  ;;  %v2126_v61 = vadd.f32 %v357_v38, %v309_v36 }
  0x8c   : > { %v467_v41 = vadd.f32 %v2100_v32, %v2098_v29  ;;  %v523_v42 = vmul.f32 %v2098_v29, %v2098_v29  ;;  %v524_v43 = vmul.f32 %v2100_v32, %v2100_v32  ;;  %v880_v59 = vld [vmem:[#allocation7 + $0x28] sm:$0xff]  ;;  %v882_v60 = vld [vmem:[#allocation7 + $0x38] sm:$0xff]  ;;  %v2128_v62 = vadd.f32 %v358_v44, %v310_v37  ;;  %v879_v63 = vld [vmem:[#allocation7 + $0x20] sm:$0xff] }
  0x8d   : > { %579 = vadd.xlane.f32.xlu1 %v578_v46  ;;  %v286_v46 = vld [vmem:[%s1960_s10 + $0x58] sm:$0xff]  ;;  %v500_v53 = vmul.f32 %v2104_v35, %v2104_v35  ;;  %v881_v0 = vld [vmem:[#allocation7 + $0x30] sm:$0xff]  ;;  %1352 = vmatprep.subr.bf16.mxu0 %v1351_v58  ;;  %v1355_v16 = vpack.c.bf16 %v882_v60, %v880_v59  ;;  %v311_v20 = vld [vmem:[%s1960_s10 + $0x120] sm:$0xff]  ;;  %v525_v25 = vmul.f32 %v2126_v61, %v2126_v61 }
  0x8e   : > { %v587_v1 = vadd.f32 %v524_v43, %v523_v42  ;;  %v886_v13 = vld [vmem:[#allocation7 + $0x58] sm:$0xff]  ;;  %1415 = vmatprep.subr.bf16.mxu1 %v1351_v58  ;;  %v883_v22 = vld [vmem:[#allocation7 + $0x40] sm:$0xff]  ;;  %v885_v23 = vld [vmem:[#allocation7 + $0x50] sm:$0xff]  ;;  %v470_v24 = vadd.f32 %v2128_v62, %v2126_v61  ;;  %v526_v26 = vmul.f32 %v2128_v62, %v2128_v62 }
  0x8f   : > { %543 = vadd.xlane.f32.xlu0 %v542_v49  ;;  %v431_v49 = vadd.f32 %v2104_v35, %v2102_v34  ;;  %v312_v27 = vld [vmem:[%s1960_s10 + $0x128] sm:$0xff]  ;;  %v359_v39 = vld [vmem:[%s1968_s13 + $0x120] sm:$0xff] }
  0x90   : > { %v360_v40 = vld [vmem:[%s1968_s13 + $0x128] sm:$0xff]  ;;  %v335_v43 = vld [vmem:[%s1968_s13 + $0x60] sm:$0xff] }
  0x91   : > { %462 = vadd.xlane.f32.xlu1 %v461_v52  ;;  %v499_v52 = vmul.f32 %v2102_v34, %v2102_v34  ;;  %v288_v42 = vld [vmem:[%s1960_s10 + $0x68] sm:$0xff] }
  0x92   : > { %v336_v44 = vld [vmem:[%s1968_s13 + $0x68] sm:$0xff] }
  0x93   : > { %426 = vadd.xlane.f32.xlu0 %v425_v57  ;;  %v334_v57 = vld [vmem:[%s1968_s13 + $0x58] sm:$0xff]  ;;  %v551_v14 = vadd.f32 %v500_v53, %v499_v52  ;;  %v889_v52 = vld [vmem:[#allocation7 + $0x70] sm:$0xff]  ;;  %v590_v53 = vadd.f32 %v526_v26, %v525_v25  ;;  %v2160_v60 = vadd.f32 %v336_v44, %v288_v42  ;;  %v900_v44 = vld [vmem:[#allocation7 + $0xc8] sm:$0xff] }
  0x94   : > { %v2132_v15 = vadd.f32 %v334_v57, %v286_v46  ;;  %v894_v57 = vld [vmem:[#allocation7 + $0x98] sm:$0xff]  ;;  %v361_v25 = vld [vmem:[%s1968_s13 + $0x130] sm:$0xff] }
  0x95   : > { %582 = vadd.xlane.f32.xlu1 %v581_v2  ;;  %v2130_v2 = vadd.f32 %v333_v54, %v285_v45  ;;  %v1361_v45 = vpack.c.bf16 %v885_v23, %v883_v22  ;;  %v2154_v54 = vadd.f32 %v359_v39, %v311_v20  ;;  %v896_v20 = vld [vmem:[#allocation7 + $0xa8] sm:$0xff]  ;;  %v362_v26 = vld [vmem:[%s1968_s13 + $0x138] sm:$0xff]  ;;  %v895_v39 = vld [vmem:[#allocation7 + $0xa0] sm:$0xff] }
  0x96   : > { %v502_v38 = vmul.f32 %v2132_v15, %v2132_v15 }
  0x97   : > { %546 = vadd.xlane.f32.xlu0 %v545_v6  ;;  %v1353_v6 = vpack.c.bf16 %v877_v56, %v875_v55  ;;  %v434_v36 = vadd.f32 %v2132_v15, %v2130_v2  ;;  %v501_v37 = vmul.f32 %v2130_v2, %v2130_v2  ;;  %v2156_v55 = vadd.f32 %v360_v40, %v312_v27  ;;  %v892_v56 = vld [vmem:[#allocation7 + $0x88] sm:$0xff]  ;;  %v289_v27 = vld [vmem:[%s1960_s10 + $0x70] sm:$0xff] }
  0x98   : > { %v897_v40 = vld [vmem:[#allocation7 + $0xb0] sm:$0xff] }
  0x99   : > { %465 = vadd.xlane.f32.xlu1 %v464_v10  ;;  %v884_v10 = vld [vmem:[#allocation7 + $0x48] sm:$0xff]  ;;  %1354 = vmatpush1.bf16.msra.mxu0 %v1353_v6  ;;  %v554_v58 = vadd.f32 %v502_v38, %v501_v37 }
  0x9a   : > { %1431 = vmatpush1.bf16.msra.mxu1 %v1353_v6  ;;  %1356 = vmatprep.subr.bf16.mxu0 %v1355_v16  ;;  %v1359_v21 = vpack.c.bf16 %v886_v13, %v884_v10  ;;  %v891_v6 = vld [vmem:[#allocation7 + $0x80] sm:$0xff]  ;;  %v893_v10 = vld [vmem:[#allocation7 + $0x90] sm:$0xff]  ;;  %v473_v13 = vadd.f32 %v2156_v55, %v2154_v54 }
  0x9b   : > { %429 = vadd.xlane.f32.xlu0 %v428_v19  ;;  %v1357_v19 = vpack.c.bf16 %v881_v0, %v879_v63  ;;  %1416 = vmatprep.subr.bf16.mxu1 %v1355_v16  ;;  %v313_v0 = vld [vmem:[%s1960_s10 + $0x130] sm:$0xff]  ;;  %v528_v16 = vmul.f32 %v2156_v55, %v2156_v55  ;;  %v1369_v37 = vpack.c.bf16 %v893_v10, %v891_v6  ;;  %v316_v10 = vld [vmem:[%s1960_s10 + $0x148] sm:$0xff] }
  0x9c   : > { %v2182_v42 = vadd.f32 %v361_v25, %v313_v0  ;;  %v339_v25 = vld [vmem:[%s1968_s13 + $0x80] sm:$0xff] }
  0x9d   : > { %585 = vadd.xlane.f32.xlu1 %v584_v28  ;;  %v888_v28 = vld [vmem:[#allocation7 + $0x68] sm:$0xff]  ;;  %1358 = vmatpush1.bf16.msra.mxu0 %v1357_v19 }
  0x9e   : > { %1432 = vmatpush1.bf16.msra.mxu1 %v1357_v19  ;;  %1360 = vmatprep.subr.bf16.mxu0 %v1359_v21  ;;  %v314_v19 = vld [vmem:[%s1960_s10 + $0x138] sm:$0xff] }
  0x9f   : > { %549 = vadd.xlane.f32.xlu0 %v548_v33  ;;  %v890_v33 = vld [vmem:[#allocation7 + $0x78] sm:$0xff]  ;;  %1417 = vmatprep.subr.bf16.mxu1 %v1359_v21 }
  0xa0   : > { %v1363_v46 = vpack.c.bf16 %v890_v33, %v888_v28  ;;  %v898_v21 = vld [vmem:[#allocation7 + $0xb8] sm:$0xff]  ;;  %v337_v33 = vld [vmem:[%s1968_s13 + $0x70] sm:$0xff] }
  0xa1   : > { %468 = vadd.xlane.f32.xlu1 %v467_v41  ;;  %v287_v41 = vld [vmem:[%s1960_s10 + $0x60] sm:$0xff]  ;;  %1362 = vmatpush1.bf16.msra.mxu0 %v1361_v45  ;;  %v290_v28 = vld [vmem:[%s1960_s10 + $0x78] sm:$0xff]  ;;  %v1371_v38 = vpack.c.bf16 %v898_v21, %v896_v20 }
  0xa2   : > { %v2158_v59 = vadd.f32 %v335_v43, %v287_v41  ;;  %1433 = vmatpush1.bf16.msra.mxu1 %v1361_v45  ;;  %1364 = vmatprep.subr.bf16.mxu0 %v1363_v46  ;;  %v2184_v43 = vadd.f32 %v362_v26, %v314_v19  ;;  %v902_v45 = vld [vmem:[#allocation7 + $0xd8] sm:$0xff]  ;;  %v363_v21 = vld [vmem:[%s1968_s13 + $0x140] sm:$0xff]  ;;  %v340_v26 = vld [vmem:[%s1968_s13 + $0x88] sm:$0xff] }
  0xa3   : > { %432 = vadd.xlane.f32.xlu0 %v431_v49  ;;  %v887_v49 = vld [vmem:[#allocation7 + $0x60] sm:$0xff]  ;;  %1418 = vmatprep.subr.bf16.mxu1 %v1363_v46 }
  0xa4   : > { %v1365_v63 = vpack.c.bf16 %v889_v52, %v887_v49  ;;  %v437_v22 = vadd.f32 %v2160_v60, %v2158_v59  ;;  %v503_v23 = vmul.f32 %v2158_v59, %v2158_v59  ;;  %v2186_v49 = vadd.f32 %v337_v33, %v289_v27  ;;  %v903_v33 = vld [vmem:[#allocation7 + $0xe0] sm:$0xff] }
  0xa5   : > { %588 = vadd.xlane.f32.xlu1 %v587_v1  ;;  %v1367_v1 = vpack.c.bf16 %v894_v57, %v892_v56  ;;  %v315_v56 = vld [vmem:[%s1960_s10 + $0x140] sm:$0xff]  ;;  %v1375_v57 = vpack.c.bf16 %v902_v45, %v900_v44  ;;  %v476_v0 = vadd.f32 %v2184_v43, %v2182_v42  ;;  %v530_v6 = vmul.f32 %v2184_v43, %v2184_v43 }
  0xa6   : > { %1366 = vmatpush1.bf16.msra.mxu0 %v1365_v63  ;;  %1434 = vmatpush1.bf16.msra.mxu1 %v1365_v63  ;;  %v901_v63 = vld [vmem:[#allocation7 + $0xd0] sm:$0xff]  ;;  %v505_v19 = vmul.f32 %v2186_v49, %v2186_v49 }
  0xa7   : > { %552 = vadd.xlane.f32.xlu0 %v551_v14  ;;  %v527_v14 = vmul.f32 %v2154_v54, %v2154_v54  ;;  %1368 = vmatprep.subr.bf16.mxu0 %v1367_v1 }
  0xa8   : > { %1419 = vmatprep.subr.bf16.mxu1 %v1367_v1  ;;  %v529_v1 = vmul.f32 %v2182_v42, %v2182_v42 }
  0xa9   : > { %471 = vadd.xlane.f32.xlu1 %v470_v24  ;;  %v504_v24 = vmul.f32 %v2160_v60, %v2160_v60  ;;  %v593_v41 = vadd.f32 %v528_v16, %v527_v14  ;;  %v906_v14 = vld [vmem:[#allocation7 + $0xf8] sm:$0xff] }
  0xaa   : > { %1370 = vmatpush1.bf16.msra.mxu0 %v1369_v37  ;;  %1435 = vmatpush1.bf16.msra.mxu1 %v1369_v37  ;;  %v596_v37 = vadd.f32 %v530_v6, %v529_v1 }
  0xab   : > { %435 = vadd.xlane.f32.xlu0 %v434_v36  ;;  %v338_v36 = vld [vmem:[%s1968_s13 + $0x78] sm:$0xff]  ;;  %v557_v46 = vadd.f32 %v504_v24, %v503_v23  ;;  %1372 = vmatprep.subr.bf16.mxu0 %v1371_v38  ;;  %v291_v23 = vld [vmem:[%s1960_s10 + $0x80] sm:$0xff]  ;;  %v292_v24 = vld [vmem:[%s1960_s10 + $0x88] sm:$0xff] }
  0xac   : > { %v2188_v52 = vadd.f32 %v338_v36, %v290_v28  ;;  %1420 = vmatprep.subr.bf16.mxu1 %v1371_v38  ;;  %v905_v36 = vld [vmem:[#allocation7 + $0xf0] sm:$0xff]  ;;  %v2210_v38 = vadd.f32 %v363_v21, %v315_v56  ;;  %v2214_v45 = vadd.f32 %v339_v25, %v291_v23 }
  0xad   : > { %591 = vadd.xlane.f32.xlu1 %v590_v53  ;;  %v1373_v53 = vpack.c.bf16 %v897_v40, %v895_v39  ;;  %v908_v40 = vld [vmem:[#allocation7 + $0x108] sm:$0xff]  ;;  %v365_v21 = vld [vmem:[%s1968_s13 + $0x150] sm:$0xff] }
  0xae   : > { %v440_v16 = vadd.f32 %v2188_v52, %v2186_v49  ;;  %v506_v20 = vmul.f32 %v2188_v52, %v2188_v52  ;;  %2687 = vst [vmem:[#allocation13_spill] sm:$0xff] %v2210_v38  ;;  %2689 = vst [vmem:[#allocation15_spill] sm:$0xff] %v2214_v45  ;;  %v531_v1 = vmul.f32 %v2210_v38, %v2210_v38  ;;  %v293_v23 = vld [vmem:[%s1960_s10 + $0x90] sm:$0xff] }
  0xaf   : > { %555 = vadd.xlane.f32.xlu0 %v554_v58  ;;  %v899_v58 = vld [vmem:[#allocation7 + $0xc0] sm:$0xff]  ;;  %1374 = vmatpush1.bf16.msra.mxu0 %v1373_v53  ;;  %v341_v25 = vld [vmem:[%s1968_s13 + $0x90] sm:$0xff] }
  0xb0   : > { %1436 = vmatpush1.bf16.msra.mxu1 %v1373_v53  ;;  %v1377_v27 = vpack.c.bf16 %v901_v63, %v899_v58  ;;  %1376 = vmatprep.subr.bf16.mxu0 %v1375_v57  ;;  %v560_v44 = vadd.f32 %v506_v20, %v505_v19  ;;  %v1381_v53 = vpack.c.bf16 %v905_v36, %v903_v33  ;;  %v907_v58 = vld [vmem:[#allocation7 + $0x100] sm:$0xff]  ;;  %v909_v63 = vld [vmem:[#allocation7 + $0x110] sm:$0xff] }
  0xb1   : > { %474 = vadd.xlane.f32.xlu1 %v473_v13  ;;  %v904_v13 = vld [vmem:[#allocation7 + $0xe8] sm:$0xff]  ;;  %1421 = vmatprep.subr.bf16.mxu1 %v1375_v57  ;;  %v317_v57 = vld [vmem:[%s1960_s10 + $0x150] sm:$0xff]  ;;  %v507_v19 = vmul.f32 %v2214_v45, %v2214_v45  ;;  %v911_v33 = vld [vmem:[#allocation7 + $0x120] sm:$0xff] }
  0xb2   : > { %v1379_v28 = vpack.c.bf16 %v906_v14, %v904_v13  ;;  %v912_v13 = vld [vmem:[#allocation7 + $0x128] sm:$0xff]  ;;  %v914_v14 = vld [vmem:[#allocation7 + $0x138] sm:$0xff]  ;;  %v913_v36 = vld [vmem:[#allocation7 + $0x130] sm:$0xff] }
  0xb3   : > { %438 = vadd.xlane.f32.xlu0 %v437_v22  ;;  %v364_v22 = vld [vmem:[%s1968_s13 + $0x148] sm:$0xff]  ;;  %1378 = vmatpush1.bf16.msra.mxu0 %v1377_v27 }
  0xb4   : > { %v2212_v39 = vadd.f32 %v364_v22, %v316_v10  ;;  %1437 = vmatpush1.bf16.msra.mxu1 %v1377_v27  ;;  %1380 = vmatprep.subr.bf16.mxu0 %v1379_v28  ;;  %v318_v10 = vld [vmem:[%s1960_s10 + $0x158] sm:$0xff]  ;;  %v1385_v27 = vpack.c.bf16 %v909_v63, %v907_v58  ;;  %v319_v58 = vld [vmem:[%s1960_s10 + $0x160] sm:$0xff] }
  0xb5   : > { %594 = vadd.xlane.f32.xlu1 %v593_v41  ;;  %v910_v41 = vld [vmem:[#allocation7 + $0x118] sm:$0xff]  ;;  %1422 = vmatprep.subr.bf16.mxu1 %v1379_v28  ;;  %v1387_v28 = vpack.c.bf16 %v914_v14, %v912_v13  ;;  %v915_v63 = vld [vmem:[#allocation7 + $0x140] sm:$0xff]  ;;  %v320_v13 = vld [vmem:[%s1960_s10 + $0x168] sm:$0xff] }
  0xb6   : > { %2688 = vst [vmem:[#allocation14_spill] sm:$0xff] %v2212_v39  ;;  %v1383_v56 = vpack.c.bf16 %v910_v41, %v908_v40  ;;  %v532_v6 = vmul.f32 %v2212_v39, %v2212_v39  ;;  %v366_v22 = vld [vmem:[%s1968_s13 + $0x158] sm:$0xff]  ;;  %v2238_v40 = vadd.f32 %v365_v21, %v317_v57  ;;  %v920_v14 = vld [vmem:[#allocation7 + $0x168] sm:$0xff]  ;;  %v367_v21 = vld [vmem:[%s1968_s13 + $0x160] sm:$0xff] }
  0xb7   : > { %558 = vadd.xlane.f32.xlu0 %v557_v46  ;;  %v2216_v46 = vadd.f32 %v340_v26, %v292_v24  ;;  %v294_v24 = vld [vmem:[%s1960_s10 + $0x98] sm:$0xff]  ;;  %1382 = vmatpush1.bf16.msra.mxu0 %v1381_v53  ;;  %v2240_v41 = vadd.f32 %v366_v22, %v318_v10  ;;  %v368_v22 = vld [vmem:[%s1968_s13 + $0x168] sm:$0xff] }
  0xb8   : > { %v342_v26 = vld [vmem:[%s1968_s13 + $0x98] sm:$0xff]  ;;  %1438 = vmatpush1.bf16.msra.mxu1 %v1381_v53  ;;  %1384 = vmatprep.subr.bf16.mxu0 %v1383_v56  ;;  %2691 = vst [vmem:[#allocation17_spill] sm:$0xff] %v2238_v40 }
  0xb9   : > { %477 = vadd.xlane.f32.xlu1 %v476_v0  ;;  %2690 = vst [vmem:[#allocation16_spill] sm:$0xff] %v2216_v46  ;;  %v479_v0 = vadd.f32 %v2212_v39, %v2210_v38  ;;  %v508_v20 = vmul.f32 %v2216_v46, %v2216_v46  ;;  %1423 = vmatprep.subr.bf16.mxu1 %v1383_v56  ;;  %2692 = vst [vmem:[#allocation18_spill] sm:$0xff] %v2240_v41 }
  0xba   : > { %v2242_v39 = vadd.f32 %v341_v25, %v293_v23  ;;  %v2244_v53 = vadd.f32 %v342_v26, %v294_v24  ;;  %v1389_v56 = vpack.c.bf16 %v913_v36, %v911_v33  ;;  %v534_v10 = vmul.f32 %v2240_v41, %v2240_v41  ;;  %v295_v23 = vld [vmem:[%s1960_s10 + $0xa0] sm:$0xff]  ;;  %v296_v24 = vld [vmem:[%s1960_s10 + $0xa8] sm:$0xff]  ;;  %v921_v33 = vld [vmem:[#allocation7 + $0x170] sm:$0xff] }
  0xbb   : > { %441 = vadd.xlane.f32.xlu0 %v440_v16  ;;  %v443_v16 = vadd.f32 %v2216_v46, %v2214_v45  ;;  %v918_v46 = vld [vmem:[#allocation7 + $0x158] sm:$0xff]  ;;  %v563_v45 = vadd.f32 %v508_v20, %v507_v19  ;;  %1386 = vmatpush1.bf16.msra.mxu0 %v1385_v27  ;;  %v343_v25 = vld [vmem:[%s1968_s13 + $0xa0] sm:$0xff]  ;;  %v344_v26 = vld [vmem:[%s1968_s13 + $0xa8] sm:$0xff] }
  0xbc   : > { %2693 = vst [vmem:[#allocation19_spill] sm:$0xff] %v2242_v39  ;;  %2694 = vst [vmem:[#allocation20_spill] sm:$0xff] %v2244_v53  ;;  %1439 = vmatpush1.bf16.msra.mxu1 %v1385_v27  ;;  %1388 = vmatprep.subr.bf16.mxu0 %v1387_v28  ;;  %v509_v19 = vmul.f32 %v2242_v39, %v2242_v39  ;;  %v510_v20 = vmul.f32 %v2244_v53, %v2244_v53 }
  0xbd   : > { %597 = vadd.xlane.f32.xlu1 %v596_v37  ;;  %v599_v37 = vadd.f32 %v532_v6, %v531_v1  ;;  %1424 = vmatprep.subr.bf16.mxu1 %v1387_v28  ;;  %v482_v1 = vadd.f32 %v2240_v41, %v2238_v40  ;;  %v533_v6 = vmul.f32 %v2238_v40, %v2238_v40  ;;  %v919_v28 = vld [vmem:[#allocation7 + $0x160] sm:$0xff] }
  0xbe   : > { %v566_v41 = vadd.f32 %v510_v20, %v509_v19  ;;  %v2270_v40 = vadd.f32 %v343_v25, %v295_v23  ;;  %v369_v20 = vld [vmem:[%s1968_s13 + $0x170] sm:$0xff]  ;;  %v298_v23 = vld [vmem:[%s1960_s10 + $0xb8] sm:$0xff] }
  0xbf   : > { %561 = vadd.xlane.f32.xlu0 %v560_v44  ;;  %v916_v44 = vld [vmem:[#allocation7 + $0x148] sm:$0xff]  ;;  %1390 = vmatpush1.bf16.msra.mxu0 %v1389_v56  ;;  %v602_v36 = vadd.f32 %v534_v10, %v533_v6  ;;  %v346_v25 = vld [vmem:[%s1968_s13 + $0xb8] sm:$0xff] }
  0xc0   : > { %v1391_v57 = vpack.c.bf16 %v918_v46, %v916_v44  ;;  %v446_v46 = vadd.f32 %v2244_v53, %v2242_v39  ;;  %1440 = vmatpush1.bf16.msra.mxu1 %v1389_v56  ;;  %v2268_v44 = vadd.f32 %v368_v22, %v320_v13  ;;  %v924_v53 = vld [vmem:[#allocation7 + $0x188] sm:$0xff]  ;;  %v926_v39 = vld [vmem:[#allocation7 + $0x198] sm:$0xff]  ;;  %2697 = vst [vmem:[#allocation23_spill] sm:$0xff] %v2270_v40  ;;  %v297_v22 = vld [vmem:[%s1960_s10 + $0xb0] sm:$0xff] }
  0xc1   : > { %480 = vadd.xlane.f32.xlu1 %v479_v0  ;;  %v917_v0 = vld [vmem:[#allocation7 + $0x150] sm:$0xff]  ;;  %v2272_v56 = vadd.f32 %v344_v26, %v296_v24  ;;  %v2300_v38 = vadd.f32 %v346_v25, %v298_v23 }
  0xc2   : > { %v1393_v27 = vpack.c.bf16 %v917_v0, %v915_v63  ;;  %1392 = vmatprep.subr.bf16.mxu0 %v1391_v57  ;;  %1425 = vmatprep.subr.bf16.mxu1 %v1391_v57  ;;  %2696 = vst [vmem:[#allocation22_spill] sm:$0xff] %v2268_v44  ;;  %v1397_v57 = vpack.c.bf16 %v921_v33, %v919_v28  ;;  %v321_v63 = vld [vmem:[%s1960_s10 + $0x170] sm:$0xff]  ;;  %v923_v0 = vld [vmem:[#allocation7 + $0x180] sm:$0xff] }
  0xc3   : > { %444 = vadd.xlane.f32.xlu0 %v443_v16  ;;  %v922_v16 = vld [vmem:[#allocation7 + $0x178] sm:$0xff]  ;;  %2698 = vst [vmem:[#allocation24_spill] sm:$0xff] %v2272_v56  ;;  %v536_v13 = vmul.f32 %v2268_v44, %v2268_v44  ;;  %v512_v19 = vmul.f32 %v2272_v56, %v2272_v56  ;;  %v345_v24 = vld [vmem:[%s1968_s13 + $0xb0] sm:$0xff]  ;;  %v2294_v33 = vadd.f32 %v369_v20, %v321_v63 }
  0xc4   : > { %1394 = vmatpush1.bf16.msra.mxu0 %v1393_v27  ;;  %1441 = vmatpush1.bf16.msra.mxu1 %v1393_v27  ;;  %v927_v27 = vld [vmem:[#allocation7 + $0x1a0] sm:$0xff] }
  0xc5   : > { %600 = vadd.xlane.f32.xlu1 %v599_v37  ;;  %v2266_v37 = vadd.f32 %v367_v21, %v319_v58  ;;  %v1399_v58 = vpack.c.bf16 %v926_v39, %v924_v53  ;;  %v449_v39 = vadd.f32 %v2272_v56, %v2270_v40  ;;  %v511_v53 = vmul.f32 %v2270_v40, %v2270_v40  ;;  %v370_v21 = vld [vmem:[%s1968_s13 + $0x178] sm:$0xff]  ;;  %v932_v56 = vld [vmem:[#allocation7 + $0x1c8] sm:$0xff] }
  0xc6   : > { %v934_v40 = vld [vmem:[#allocation7 + $0x1d8] sm:$0xff] }
  0xc7   : > { %564 = vadd.xlane.f32.xlu0 %v563_v45  ;;  %v1395_v45 = vpack.c.bf16 %v922_v16, %v920_v14  ;;  %2695 = vst [vmem:[#allocation21_spill] sm:$0xff] %v2266_v37  ;;  %v485_v6 = vadd.f32 %v2268_v44, %v2266_v37  ;;  %v535_v10 = vmul.f32 %v2266_v37, %v2266_v37  ;;  %v322_v14 = vld [vmem:[%s1960_s10 + $0x178] sm:$0xff]  ;;  %v928_v16 = vld [vmem:[#allocation7 + $0x1a8] sm:$0xff] }
  0xc8   : > { %v569_v44 = vadd.f32 %v512_v19, %v511_v53  ;;  %v2298_v37 = vadd.f32 %v345_v24, %v297_v22  ;;  %v935_v53 = vld [vmem:[#allocation7 + $0x1e0] sm:$0xff]  ;;  %v937_v19 = vld [vmem:[#allocation7 + $0x1f0] sm:$0xff] }
  0xc9   : > { %483 = vadd.xlane.f32.xlu1 %v482_v1  ;;  %1396 = vmatprep.subr.bf16.mxu0 %v1395_v45  ;;  %v925_v1 = vld [vmem:[#allocation7 + $0x190] sm:$0xff]  ;;  %v605_v28 = vadd.f32 %v536_v13, %v535_v10  ;;  %v936_v13 = vld [vmem:[#allocation7 + $0x1e8] sm:$0xff] }
  0xca   : > { %1426 = vmatprep.subr.bf16.mxu1 %v1395_v45  ;;  %1398 = vmatpush1.bf16.msra.mxu0 %v1397_v57  ;;  %v1401_v26 = vpack.c.bf16 %v925_v1, %v923_v0  ;;  %v929_v45 = vld [vmem:[#allocation7 + $0x1b0] sm:$0xff]  ;;  %v931_v0 = vld [vmem:[#allocation7 + $0x1c0] sm:$0xff] }
  0xcb   : > { %447 = vadd.xlane.f32.xlu0 %v446_v46  ;;  %v930_v46 = vld [vmem:[#allocation7 + $0x1b8] sm:$0xff]  ;;  %1442 = vmatpush1.bf16.msra.mxu1 %v1397_v57  ;;  %v1405_v57 = vpack.c.bf16 %v929_v45, %v927_v27  ;;  %v933_v1 = vld [vmem:[#allocation7 + $0x1d0] sm:$0xff] }
  0xcc   : > { %1400 = vmatprep.subr.bf16.mxu0 %v1399_v58  ;;  %1427 = vmatprep.subr.bf16.mxu1 %v1399_v58  ;;  %v1407_v58 = vpack.c.bf16 %v934_v40, %v932_v56  ;;  %v513_v40 = vmul.f32 %v2298_v37, %v2298_v37  ;;  %v514_v56 = vmul.f32 %v2300_v38, %v2300_v38 }
  0xcd   : > { %603 = vadd.xlane.f32.xlu1 %v602_v36  ;;  %v2296_v36 = vadd.f32 %v370_v21, %v322_v14  ;;  %v938_v14 = vld [vmem:[#allocation7 + $0x1f8] sm:$0xff]  ;;  %v1413_v21 = vpack.c.bf16 %v937_v19, %v935_v53 }
  0xce   : > { %1402 = vmatpush1.bf16.msra.mxu0 %v1401_v26 }
  0xcf   : > { %567 = vadd.xlane.f32.xlu0 %v566_v41  ;;  %v1403_v41 = vpack.c.bf16 %v930_v46, %v928_v16  ;;  %1443 = vmatpush1.bf16.msra.mxu1 %v1401_v26  ;;  %v488_v63 = vadd.f32 %v2296_v36, %v2294_v33  ;;  %v538_v10 = vmul.f32 %v2296_v36, %v2296_v36 }
  0xd0   : > { %v452_v16 = vadd.f32 %v2300_v38, %v2298_v37  ;;  %v1409_v46 = vpack.c.bf16 %v933_v1, %v931_v0 }
  0xd1   : > { %486 = vadd.xlane.f32.xlu1 %v485_v6  ;;  %1404 = vmatprep.subr.bf16.mxu0 %v1403_v41  ;;  %v537_v6 = vmul.f32 %v2294_v33, %v2294_v33 }
  0xd2   : > { %1428 = vmatprep.subr.bf16.mxu1 %v1403_v41  ;;  %1406 = vmatpush1.bf16.msra.mxu0 %v1405_v57 }
  0xd3   : > { %450 = vadd.xlane.f32.xlu0 %v449_v39  ;;  %1444 = vmatpush1.bf16.msra.mxu1 %v1405_v57  ;;  %v1411_v39 = vpack.c.bf16 %v938_v14, %v936_v13  ;;  %v608_v20 = vadd.f32 %v538_v10, %v537_v6 }
  0xd4   : > { %1408 = vmatprep.subr.bf16.mxu0 %v1407_v58  ;;  %1429 = vmatprep.subr.bf16.mxu1 %v1407_v58 }
  0xd5   : > { %606 = vadd.xlane.f32.xlu1 %v605_v28 }
  0xd6   : > { %1410 = vmatpush1.bf16.msra.mxu0 %v1409_v46 }
  0xd7   : > { %570 = vadd.xlane.f32.xlu0 %v569_v44  ;;  %v572_v44 = vadd.f32 %v514_v56, %v513_v40  ;;  %1445 = vmatpush1.bf16.msra.mxu1 %v1409_v46 }
  0xd8   : > { %1412 = vmatprep.subr.bf16.mxu0 %v1411_v39  ;;  %1430 = vmatprep.subr.bf16.mxu1 %v1411_v39 }
  0xd9   : > { %489 = vadd.xlane.f32.xlu1 %v488_v63 }
  0xda   : > { %1414 = vmatpush1.bf16.msra.mxu0 %v1413_v21 }
  0xdb   : > { %453 = vadd.xlane.f32.xlu0 %v452_v16  ;;  %1446 = vmatpush1.bf16.msra.mxu1 %v1413_v21 }
  0xdd   : > { %609 = vadd.xlane.f32.xlu1 %v608_v20 }
  0xdf   : > { %573 = vadd.xlane.f32.xlu0 %v572_v44 }
 0x10e   : > { %v460_v22 = vpop.xlane.xlu1 %459 }
 0x10f   : > { %v2316_v58 = vmul.f32 0.00390625, %v460_v22 }
 0x110   : > { %v421_v23 = vpop.xlane.xlu0 %420 }
 0x111   : > { %v611_v24 = vmul.f32 0.00390625, %v421_v23  ;;  %v672_v56 = vmul.f32 %v2316_v58, %v2316_v58 }
 0x112   : > { %v541_v25 = vpop.xlane.xlu1 %540 }
 0x113   : > { %v635_v26 = vmul.f32 0.00390625, %v541_v25  ;;  %v659_v41 = vmul.f32 %v611_v24, %v611_v24 }
 0x114   : > { %v457_v27 = vpop.xlane.xlu0 %456 }
 0x115   : > { %v2314_v45 = vmul.f32 0.00390625, %v457_v27  ;;  %v683_v28 = vsub.f32 %v635_v26, %v659_v41 }
 0x116   : > { %v577_v57 = vpop.xlane.xlu1 %576 }
 0x117   : > { %v707_v0 = vmax.f32 %v683_v28, 0.0  ;;  %v647_v1 = vmul.f32 0.00390625, %v577_v57  ;;  %v671_v63 = vmul.f32 %v2314_v45, %v2314_v45 }
 0x118   : > { %v424_v6 = vpop.xlane.xlu0 %423 }
 0x119   : > { %v2320_v10 = vmul.f32 0.00390625, %v424_v6  ;;  %v779_v13 = vadd.f32 1e-12, %v707_v0  ;;  %v695_v14 = vsub.f32 %v647_v1, %v671_v63  ;;  %v731_v1 = vsub.f32 %v1991_v11, %v611_v24 }
 0x11a   : > { %v580_v16 = vpop.xlane.xlu1 %579 }
 0x11b   : > { %1516 = vrsqrt.f32 %v779_v13  ;;  %v719_v40 = vmax.f32 %v695_v14, 0.0  ;;  %v648_v46 = vmul.f32 0.00390625, %v580_v16  ;;  %v660_v53 = vmul.f32 %v2320_v10, %v2320_v10 }
 0x11c   : > { %v544_v39 = vpop.xlane.xlu0 %543 }
 0x11d   : > { %v636_v19 = vmul.f32 0.00390625, %v544_v39  ;;  %v791_v20 = vadd.f32 1e-12, %v719_v40  ;;  %v696_v44 = vsub.f32 %v648_v46, %v672_v56  ;;  %v732_v40 = vsub.f32 %v1993_v12, %v611_v24 }
 0x11e   : > { %v463_v22 = vpop.xlane.xlu1 %462  ;;  %v756_v12 = vsub.f32 %v2002_v18, %v2314_v45  ;;  %v757_v24 = vsub.f32 %v1982_v4, %v2316_v58  ;;  %v733_v4 = vsub.f32 %v2020_v30, %v2320_v10 }
 0x11f   : > { %v684_v21 = vsub.f32 %v636_v19, %v660_v53  ;;  %1518 = vrsqrt.f32 %v791_v20  ;;  %v720_v23 = vmax.f32 %v696_v44, 0.0  ;;  %v2326_v25 = vmul.f32 0.00390625, %v463_v22 }
 0x120   : > { %v427_v26 = vpop.xlane.xlu0 %426 }
 0x121   : > { %v708_v41 = vmax.f32 %v684_v21, 0.0  ;;  %v2328_v27 = vmul.f32 0.00390625, %v427_v26  ;;  %v792_v28 = vadd.f32 1e-12, %v720_v23  ;;  %v673_v63 = vmul.f32 %v2326_v25, %v2326_v25 }
 0x122   : > { %v583_v0 = vpop.xlane.xlu1 %582 }
 0x123   : > { %v780_v57 = vadd.f32 1e-12, %v708_v41  ;;  %1520 = vrsqrt.f32 %v792_v28  ;;  %v649_v6 = vmul.f32 0.00390625, %v583_v0  ;;  %v661_v14 = vmul.f32 %v2328_v27, %v2328_v27 }
 0x124   : > { %v547_v13 = vpop.xlane.xlu0 %546  ;;  %v755_v41 = vsub.f32 %v2000_v17, %v2314_v45  ;;  %v758_v17 = vsub.f32 %v1986_v7, %v2316_v58 }
 0x125   : > { %1522 = vrsqrt.f32 %v780_v57  ;;  %v637_v16 = vmul.f32 0.00390625, %v547_v13  ;;  %v1517_v56 = vpop.eup %1516  ;;  %v697_v46 = vsub.f32 %v649_v6, %v673_v63 }
 0x126   : > { %v466_v53 = vpop.xlane.xlu1 %465  ;;  %v828_v19 = vmul.f32 %v1517_v56, %v732_v40  ;;  %v827_v20 = vmul.f32 %v1517_v56, %v731_v1  ;;  %v734_v40 = vsub.f32 %v2022_v31, %v2320_v10 }
 0x127   : > { %v685_v39 = vsub.f32 %v637_v16, %v661_v14  ;;  %v721_v11 = vmax.f32 %v697_v46, 0.0  ;;  %v2336_v44 = vmul.f32 0.00390625, %v466_v53 }
 0x128   : > { %v430_v21 = vpop.xlane.xlu0 %429  ;;  %1015 = vmatprep.mubr.f32.mxu0 %v828_v19 }
 0x129   : > { %v709_v22 = vmax.f32 %v685_v39, 0.0  ;;  %v2338_v23 = vmul.f32 0.00390625, %v430_v21  ;;  %v1519_v26 = vpop.eup %1518  ;;  %v793_v28 = vadd.f32 1e-12, %v721_v11  ;;  %1016 = vmatmul.mubr.f32.vlgmr.msra.gmra.mrb[0].mxu0 %v827_v20  ;;  %v674_v0 = vmul.f32 %v2336_v44, %v2336_v44 }
 0x12a   : > { %v586_v1 = vpop.xlane.xlu1 %585  ;;  %v852_v13 = vmul.f32 %v1519_v26, %v756_v12  ;;  %v851_v14 = vmul.f32 %v1519_v26, %v755_v41 }
 0x12b   : > { %v781_v57 = vadd.f32 1e-12, %v709_v22  ;;  %1524 = vrsqrt.f32 %v793_v28  ;;  %v650_v63 = vmul.f32 0.00390625, %v586_v1  ;;  %v662_v18 = vmul.f32 %v2338_v23, %v2338_v23 }
 0x12c   : > { %v550_v6 = vpop.xlane.xlu0 %549  ;;  %1087 = vmatprep.mubr.f32.mxu1 %v852_v13  ;;  %v759_v28 = vsub.f32 %v2042_v47, %v2326_v25  ;;  %v735_v13 = vsub.f32 %v2046_v50, %v2328_v27  ;;  %v736_v47 = vsub.f32 %v2048_v51, %v2328_v27 }
 0x12d   : > { %1526 = vrsqrt.f32 %v781_v57  ;;  %v638_v45 = vmul.f32 0.00390625, %v550_v6  ;;  %v1521_v16 = vpop.eup %1520  ;;  %v698_v56 = vsub.f32 %v650_v63, %v674_v0  ;;  %1088 = vmatmul.mubr.f32.vlgmr.msra.gmra.mrb[0].mxu1 %v851_v14  ;;  %v760_v0 = vsub.f32 %v2044_v48, %v2326_v25 }
 0x12e   : > { %v469_v53 = vpop.xlane.xlu1 %468  ;;  %v854_v19 = vmul.f32 %v1521_v16, %v758_v17  ;;  %v853_v7 = vmul.f32 %v1521_v16, %v757_v24 }
 0x12f   : > { %v1523_v46 = vpop.eup %1522  ;;  %v686_v39 = vsub.f32 %v638_v45, %v662_v18  ;;  %v722_v58 = vmax.f32 %v698_v56, 0.0  ;;  %v2356_v20 = vmul.f32 0.00390625, %v469_v53 }
 0x130   : > { %v433_v11 = vpop.xlane.xlu0 %432  ;;  %v830_v21 = vmul.f32 %v1523_v46, %v734_v40  ;;  %v829_v22 = vmul.f32 %v1523_v46, %v733_v4  ;;  %1093 = vmatprep.mubr.f32.mxu1 %v854_v19  ;;  %v761_v19 = vsub.f32 %v2070_v3, %v2336_v44  ;;  %v738_v3 = vsub.f32 %v2076_v9, %v2338_v23 }
 0x131   : > { %v710_v26 = vmax.f32 %v686_v39, 0.0  ;;  %v2358_v41 = vmul.f32 0.00390625, %v433_v11  ;;  %v794_v30 = vadd.f32 1e-12, %v722_v58  ;;  %1094 = vmatmul.mubr.f32.gmra.mrb[2].mxu1 %v853_v7  ;;  %v675_v12 = vmul.f32 %v2356_v20, %v2356_v20 }
 0x132   : > { %1021 = vmatprep.mubr.f32.mxu0 %v830_v21  ;;  %v589_v10 = vpop.xlane.xlu1 %588  ;;  %v762_v21 = vsub.f32 %v2072_v5, %v2336_v44 }
 0x133   : > { %v782_v31 = vadd.f32 1e-12, %v710_v26  ;;  %1022 = vmatmul.mubr.f32.gmra.mrb[2].mxu0 %v829_v22  ;;  %1528 = vrsqrt.f32 %v794_v30  ;;  %v651_v24 = vmul.f32 0.00390625, %v589_v10  ;;  %v663_v1 = vmul.f32 %v2358_v41, %v2358_v41 }
 0x134   : > { %v553_v57 = vpop.xlane.xlu0 %552 }
 0x135   : > { %1530 = vrsqrt.f32 %v782_v31  ;;  %v639_v63 = vmul.f32 0.00390625, %v553_v57  ;;  %v1525_v6 = vpop.eup %1524  ;;  %v699_v14 = vsub.f32 %v651_v24, %v675_v12  ;;  %v737_v31 = vsub.f32 %v2074_v8, %v2338_v23 }
 0x136   : > { %v472_v45 = vpop.xlane.xlu1 %471  ;;  %v856_v16 = vmul.f32 %v1525_v6, %v760_v0  ;;  %v855_v4 = vmul.f32 %v1525_v6, %v759_v28 }
 0x137   : > { %v1527_v17 = vpop.eup %1526  ;;  %v687_v18 = vsub.f32 %v639_v63, %v663_v1  ;;  %v723_v40 = vmax.f32 %v699_v14, 0.0  ;;  %v2372_v48 = vmul.f32 0.00390625, %v472_v45  ;;  %v763_v14 = vsub.f32 %v2098_v29, %v2356_v20 }
 0x138   : > { %v436_v25 = vpop.xlane.xlu0 %435  ;;  %v832_v56 = vmul.f32 %v1527_v17, %v736_v47  ;;  %v831_v46 = vmul.f32 %v1527_v17, %v735_v13  ;;  %1099 = vmatprep.mubr.f32.mxu1 %v856_v16  ;;  %v764_v16 = vsub.f32 %v2100_v32, %v2356_v20  ;;  %v740_v29 = vsub.f32 %v2104_v35, %v2358_v41 }
 0x139   : > { %v711_v39 = vmax.f32 %v687_v18, 0.0  ;;  %v2374_v53 = vmul.f32 0.00390625, %v436_v25  ;;  %v795_v50 = vadd.f32 1e-12, %v723_v40  ;;  %1100 = vmatmul.mubr.f32.gmra.mrb[4].mxu1 %v855_v4  ;;  %v676_v7 = vmul.f32 %v2372_v48, %v2372_v48 }
 0x13a   : > { %1027 = vmatprep.mubr.f32.mxu0 %v832_v56  ;;  %v592_v27 = vpop.xlane.xlu1 %591  ;;  %v739_v56 = vsub.f32 %v2102_v34, %v2358_v41 }
 0x13b   : > { %v783_v51 = vadd.f32 1e-12, %v711_v39  ;;  %1028 = vmatmul.mubr.f32.gmra.mrb[4].mxu0 %v831_v46  ;;  %1532 = vrsqrt.f32 %v795_v50  ;;  %v652_v58 = vmul.f32 0.00390625, %v592_v27  ;;  %v664_v22 = vmul.f32 %v2374_v53, %v2374_v53 }
 0x13c   : > { %v556_v11 = vpop.xlane.xlu0 %555 }
 0x13d   : > { %1534 = vrsqrt.f32 %v783_v51  ;;  %v640_v26 = vmul.f32 0.00390625, %v556_v11  ;;  %v1529_v30 = vpop.eup %1528  ;;  %v700_v10 = vsub.f32 %v652_v58, %v676_v7 }
 0x13e   : > { %v475_v24 = vpop.xlane.xlu1 %474  ;;  %v858_v57 = vmul.f32 %v1529_v30, %v762_v21  ;;  %v857_v0 = vmul.f32 %v1529_v30, %v761_v19 }
 0x13f   : > { %v1531_v28 = vpop.eup %1530  ;;  %v688_v12 = vsub.f32 %v640_v26, %v664_v22  ;;  %v724_v1 = vmax.f32 %v700_v10, 0.0  ;;  %v2388_v5 = vmul.f32 0.00390625, %v475_v24  ;;  %v765_v26 = vsub.f32 %v2126_v61, %v2372_v48 }
 0x140   : > { %v439_v44 = vpop.xlane.xlu0 %438  ;;  %v834_v63 = vmul.f32 %v1531_v28, %v738_v3  ;;  %v833_v6 = vmul.f32 %v1531_v28, %v737_v31  ;;  %1105 = vmatprep.mubr.f32.mxu1 %v858_v57  ;;  %v766_v10 = vsub.f32 %v2128_v62, %v2372_v48  ;;  %v741_v57 = vsub.f32 %v2130_v2, %v2374_v53 }
 0x141   : > { %v712_v13 = vmax.f32 %v688_v12, 0.0  ;;  %v2390_v47 = vmul.f32 0.00390625, %v439_v44  ;;  %v796_v8 = vadd.f32 1e-12, %v724_v1  ;;  %1106 = vmatmul.mubr.f32.gmra.mrb[6].mxu1 %v857_v0  ;;  %v677_v17 = vmul.f32 %v2388_v5, %v2388_v5 }
 0x142   : > { %1033 = vmatprep.mubr.f32.mxu0 %v834_v63  ;;  %v595_v23 = vpop.xlane.xlu1 %594  ;;  %v742_v61 = vsub.f32 %v2132_v15, %v2374_v53 }
 0x143   : > { %v784_v9 = vadd.f32 1e-12, %v712_v13  ;;  %1034 = vmatmul.mubr.f32.gmra.mrb[6].mxu0 %v833_v6  ;;  %1536 = vrsqrt.f32 %v796_v8  ;;  %v653_v18 = vmul.f32 0.00390625, %v595_v23  ;;  %v665_v4 = vmul.f32 %v2390_v47, %v2390_v47 }
 0x144   : > { %v559_v45 = vpop.xlane.xlu0 %558 }
 0x145   : > { %1538 = vrsqrt.f32 %v784_v9  ;;  %v641_v40 = vmul.f32 0.00390625, %v559_v45  ;;  %v1533_v25 = vpop.eup %1532  ;;  %v701_v46 = vsub.f32 %v653_v18, %v677_v17  ;;  %v767_v18 = vsub.f32 %v2154_v54, %v2388_v5 }
 0x146   : > { %v478_v51 = vpop.xlane.xlu1 %477  ;;  %v860_v27 = vmul.f32 %v1533_v25, %v764_v16  ;;  %v859_v19 = vmul.f32 %v1533_v25, %v763_v14  ;;  %v744_v54 = vsub.f32 %v2160_v60, %v2390_v47 }
 0x147   : > { %v1535_v39 = vpop.eup %1534  ;;  %v689_v50 = vsub.f32 %v641_v40, %v665_v4  ;;  %v725_v7 = vmax.f32 %v701_v46, 0.0  ;;  %v2404_v32 = vmul.f32 0.00390625, %v478_v51  ;;  %v768_v40 = vsub.f32 %v2156_v55, %v2388_v5 }
 0x148   : > { %v442_v20 = vpop.xlane.xlu0 %441  ;;  %v836_v58 = vmul.f32 %v1535_v39, %v740_v29  ;;  %v835_v11 = vmul.f32 %v1535_v39, %v739_v56  ;;  %1111 = vmatprep.mubr.f32.mxu1 %v860_v27  ;;  %v743_v46 = vsub.f32 %v2158_v59, %v2390_v47 }
 0x149   : > { %v713_v21 = vmax.f32 %v689_v50, 0.0  ;;  %v2406_v22 = vmul.f32 0.00390625, %v442_v20  ;;  %v797_v34 = vadd.f32 1e-12, %v725_v7  ;;  %1112 = vmatmul.mubr.f32.gmra.mrb[8].mxu1 %v859_v19  ;;  %v678_v30 = vmul.f32 %v2404_v32, %v2404_v32 }
 0x14a   : > { %1039 = vmatprep.mubr.f32.mxu0 %v836_v58  ;;  %v598_v41 = vpop.xlane.xlu1 %597 }
 0x14b   : > { %v785_v35 = vadd.f32 1e-12, %v713_v21  ;;  %1040 = vmatmul.mubr.f32.gmra.mrb[8].mxu0 %v835_v11  ;;  %1540 = vrsqrt.f32 %v797_v34  ;;  %v654_v31 = vmul.f32 0.00390625, %v598_v41  ;;  %v666_v28 = vmul.f32 %v2406_v22, %v2406_v22 }
 0x14c   : > { %v562_v3 = vpop.xlane.xlu0 %561 }
 0x14d   : > { %1542 = vrsqrt.f32 %v785_v35  ;;  %v642_v12 = vmul.f32 0.00390625, %v562_v3  ;;  %v1537_v24 = vpop.eup %1536  ;;  %v702_v0 = vsub.f32 %v654_v31, %v678_v30  ;;  %v769_v35 = vsub.f32 %v2182_v42, %v2404_v32 }
 0x14e   : > { %v481_v63 = vpop.xlane.xlu1 %480  ;;  %v862_v6 = vmul.f32 %v1537_v24, %v766_v10  ;;  %v861_v13 = vmul.f32 %v1537_v24, %v765_v26  ;;  %v770_v31 = vsub.f32 %v2184_v43, %v2404_v32  ;;  %v746_v42 = vsub.f32 %v2188_v52, %v2406_v22 }
 0x14f   : > { %v1539_v1 = vpop.eup %1538  ;;  %v690_v44 = vsub.f32 %v642_v12, %v666_v28  ;;  %v726_v8 = vmax.f32 %v702_v0, 0.0  ;;  %v2420_v62 = vmul.f32 0.00390625, %v481_v63  ;;  %v745_v12 = vsub.f32 %v2186_v49, %v2406_v22 }
 0x150   : > { %v445_v48 = vpop.xlane.xlu0 %444  ;;  %v838_v9 = vmul.f32 %v1539_v1, %v742_v61  ;;  %v837_v23 = vmul.f32 %v1539_v1, %v741_v57  ;;  %1117 = vmatprep.mubr.f32.mxu1 %v862_v6 }
 0x151   : > { %v714_v14 = vmax.f32 %v690_v44, 0.0  ;;  %v2422_v17 = vmul.f32 0.00390625, %v445_v48  ;;  %v798_v2 = vadd.f32 1e-12, %v726_v8  ;;  %1118 = vmatmul.mubr.f32.gmra.mrb[10].mxu1 %v861_v13  ;;  %v679_v45 = vmul.f32 %v2420_v62, %v2420_v62 }
 0x152   : > { %1045 = vmatprep.mubr.f32.mxu0 %v838_v9  ;;  %v601_v53 = vpop.xlane.xlu1 %600  ;;  %v2699_v9 = vld [vmem:[#allocation13_spill] sm:$0xff] }
 0x153   : > { %v786_v15 = vadd.f32 1e-12, %v714_v14  ;;  %1046 = vmatmul.mubr.f32.gmra.mrb[10].mxu0 %v837_v23  ;;  %1544 = vrsqrt.f32 %v798_v2  ;;  %v655_v16 = vmul.f32 0.00390625, %v601_v53  ;;  %v667_v25 = vmul.f32 %v2422_v17, %v2422_v17  ;;  %v2700_v53 = vld [vmem:[#allocation14_spill] sm:$0xff] }
 0x154   : > { %v565_v4 = vpop.xlane.xlu0 %564  ;;  %v771_v23 = vsub.f32 %v2699_v9, %v2420_v62 }
 0x155   : > { %1546 = vrsqrt.f32 %v786_v15  ;;  %v643_v56 = vmul.f32 0.00390625, %v565_v4  ;;  %v1541_v29 = vpop.eup %1540  ;;  %v703_v39 = vsub.f32 %v655_v16, %v679_v45 }
 0x156   : > { %v484_v27 = vpop.xlane.xlu1 %483  ;;  %v864_v19 = vmul.f32 %v1541_v29, %v768_v40  ;;  %v863_v7 = vmul.f32 %v1541_v29, %v767_v18  ;;  %v772_v18 = vsub.f32 %v2700_v53, %v2420_v62  ;;  %v2701_v40 = vld [vmem:[#allocation15_spill] sm:$0xff] }
 0x157   : > { %v1543_v50 = vpop.eup %1542  ;;  %v691_v51 = vsub.f32 %v643_v56, %v667_v25  ;;  %v727_v20 = vmax.f32 %v703_v39, 0.0  ;;  %v2436_v55 = vmul.f32 0.00390625, %v484_v27  ;;  %v747_v25 = vsub.f32 %v2701_v40, %v2422_v17  ;;  %v2702_v56 = vld [vmem:[#allocation16_spill] sm:$0xff] }
 0x158   : > { %v448_v5 = vpop.xlane.xlu0 %447  ;;  %v840_v58 = vmul.f32 %v1543_v50, %v744_v54  ;;  %v839_v11 = vmul.f32 %v1543_v50, %v743_v46  ;;  %1123 = vmatprep.mubr.f32.mxu1 %v864_v19  ;;  %v748_v29 = vsub.f32 %v2702_v56, %v2422_v17 }
 0x159   : > { %v715_v21 = vmax.f32 %v691_v51, 0.0  ;;  %v2438_v34 = vmul.f32 0.00390625, %v448_v5  ;;  %v799_v59 = vadd.f32 1e-12, %v727_v20  ;;  %1124 = vmatmul.mubr.f32.gmra.mrb[12].mxu1 %v863_v7  ;;  %v680_v41 = vmul.f32 %v2436_v55, %v2436_v55 }
 0x15a   : > { %1051 = vmatprep.mubr.f32.mxu0 %v840_v58  ;;  %v604_v47 = vpop.xlane.xlu1 %603 }
 0x15b   : > { %v787_v60 = vadd.f32 1e-12, %v715_v21  ;;  %1052 = vmatmul.mubr.f32.gmra.mrb[12].mxu0 %v839_v11  ;;  %1548 = vrsqrt.f32 %v799_v59  ;;  %v656_v26 = vmul.f32 0.00390625, %v604_v47  ;;  %v668_v3 = vmul.f32 %v2438_v34, %v2438_v34 }
 0x15c   : > { %v568_v30 = vpop.xlane.xlu0 %567 }
 0x15d   : > { %1550 = vrsqrt.f32 %v787_v60  ;;  %v644_v10 = vmul.f32 0.00390625, %v568_v30  ;;  %v1545_v28 = vpop.eup %1544  ;;  %v704_v24 = vsub.f32 %v656_v26, %v680_v41  ;;  %v2703_v60 = vld [vmem:[#allocation17_spill] sm:$0xff]  ;;  %v2704_v30 = vld [vmem:[#allocation18_spill] sm:$0xff] }
 0x15e   : > { %v487_v0 = vpop.xlane.xlu1 %486  ;;  %v866_v1 = vmul.f32 %v1545_v28, %v770_v31  ;;  %v865_v44 = vmul.f32 %v1545_v28, %v769_v35  ;;  %v773_v47 = vsub.f32 %v2703_v60, %v2436_v55  ;;  %v774_v31 = vsub.f32 %v2704_v30, %v2436_v55 }
 0x15f   : > { %v1547_v57 = vpop.eup %1546  ;;  %v692_v61 = vsub.f32 %v644_v10, %v668_v3  ;;  %v728_v63 = vmax.f32 %v704_v24, 0.0  ;;  %v2452_v43 = vmul.f32 0.00390625, %v487_v0  ;;  %v2706_v24 = vld [vmem:[#allocation20_spill] sm:$0xff] }
 0x160   : > { %v451_v32 = vpop.xlane.xlu0 %450  ;;  %v842_v6 = vmul.f32 %v1547_v57, %v746_v42  ;;  %v841_v13 = vmul.f32 %v1547_v57, %v745_v12  ;;  %1129 = vmatprep.mubr.f32.mxu1 %v866_v1  ;;  %v2705_v12 = vld [vmem:[#allocation19_spill] sm:$0xff]  ;;  %v750_v57 = vsub.f32 %v2706_v24, %v2438_v34 }
 0x161   : > { %v716_v8 = vmax.f32 %v692_v61, 0.0  ;;  %v2454_v48 = vmul.f32 0.00390625, %v451_v32  ;;  %v800_v49 = vadd.f32 1e-12, %v728_v63  ;;  %1130 = vmatmul.mubr.f32.gmra.mrb[14].mxu1 %v865_v44  ;;  %v681_v14 = vmul.f32 %v2452_v43, %v2452_v43 }
 0x162   : > { %1057 = vmatprep.mubr.f32.mxu0 %v842_v6  ;;  %v607_v22 = vpop.xlane.xlu1 %606  ;;  %v749_v42 = vsub.f32 %v2705_v12, %v2438_v34  ;;  %v2708_v34 = vld [vmem:[#allocation22_spill] sm:$0xff] }
 0x163   : > { %v788_v52 = vadd.f32 1e-12, %v716_v8  ;;  %1058 = vmatmul.mubr.f32.gmra.mrb[14].mxu0 %v841_v13  ;;  %1552 = vrsqrt.f32 %v800_v49  ;;  %v657_v2 = vmul.f32 0.00390625, %v607_v22  ;;  %v669_v45 = vmul.f32 %v2454_v48, %v2454_v48 }
 0x164   : > { %v571_v15 = vpop.xlane.xlu0 %570  ;;  %v776_v9 = vsub.f32 %v2708_v34, %v2452_v43 }
 0x165   : > { %1554 = vrsqrt.f32 %v788_v52  ;;  %v645_v16 = vmul.f32 0.00390625, %v571_v15  ;;  %v1549_v4 = vpop.eup %1548  ;;  %v705_v46 = vsub.f32 %v657_v2, %v681_v14  ;;  %v2707_v52 = vld [vmem:[#allocation21_spill] sm:$0xff]  ;;  %v2709_v14 = vld [vmem:[#allocation23_spill] sm:$0xff]  ;;  %v2710_v15 = vld [vmem:[#allocation24_spill] sm:$0xff] }
 0x166   : > { %v490_v50 = vpop.xlane.xlu1 %489  ;;  %v868_v51 = vmul.f32 %v1549_v4, %v772_v18  ;;  %v867_v27 = vmul.f32 %v1549_v4, %v771_v23  ;;  %v775_v22 = vsub.f32 %v2707_v52, %v2452_v43  ;;  %v751_v2 = vsub.f32 %v2709_v14, %v2454_v48 }
 0x167   : > { %v1551_v54 = vpop.eup %1550  ;;  %v693_v39 = vsub.f32 %v645_v16, %v669_v45  ;;  %v729_v19 = vmax.f32 %v705_v46, 0.0  ;;  %v2468_v62 = vmul.f32 0.00390625, %v490_v50  ;;  %v752_v53 = vsub.f32 %v2710_v15, %v2454_v48 }
 0x168   : > { %v454_v7 = vpop.xlane.xlu0 %453  ;;  %v844_v20 = vmul.f32 %v1551_v54, %v748_v29  ;;  %v843_v5 = vmul.f32 %v1551_v54, %v747_v25  ;;  %1135 = vmatprep.mubr.f32.mxu1 %v868_v51 }
 0x169   : > { %v717_v58 = vmax.f32 %v693_v39, 0.0  ;;  %v622_v11 = vmul.f32 0.00390625, %v454_v7  ;;  %v801_v21 = vadd.f32 1e-12, %v729_v19  ;;  %1136 = vmatmul.mubr.f32.gmra.mrb[16].mxu1 %v867_v27  ;;  %v682_v35 = vmul.f32 %v2468_v62, %v2468_v62 }
 0x16a   : > { %1063 = vmatprep.mubr.f32.mxu0 %v844_v20  ;;  %v610_v17 = vpop.xlane.xlu1 %609  ;;  %v777_v43 = vsub.f32 %v2294_v33, %v2468_v62  ;;  %v778_v25 = vsub.f32 %v2296_v36, %v2468_v62  ;;  %v941_v27 = vlaneseq  ;;  %v939_v36 = vld [vmem:[%s2654_s3] sm:$0x3] }
 0x16b   : > { %v789_v59 = vadd.f32 1e-12, %v717_v58  ;;  %1064 = vmatmul.mubr.f32.gmra.mrb[16].mxu0 %v843_v5  ;;  %1556 = vrsqrt.f32 %v801_v21  ;;  %v658_v41 = vmul.f32 0.00390625, %v610_v17  ;;  %v670_v3 = vmul.f32 %v622_v11, %v622_v11 }
 0x16c   : > { %v574_v26 = vpop.xlane.xlu0 %573  ;;  %v753_v29 = vsub.f32 %v2298_v37, %v622_v11  ;;  %v754_v48 = vsub.f32 %v2300_v38, %v622_v11  ;;  %v942_v33 = vshrl.u32 %v941_v27, 7 }
 0x16d   : > { %1558 = vrsqrt.f32 %v789_v59  ;;  %v646_v10 = vmul.f32 0.00390625, %v574_v26  ;;  %v1553_v28 = vpop.eup %1552  ;;  %v706_v61 = vsub.f32 %v658_v41, %v682_v35 }
 0x16e   : > { %v870_v44 = vmul.f32 %v1553_v28, %v774_v31  ;;  %v869_v63 = vmul.f32 %v1553_v28, %v773_v47  ;;  %v943_v19 = vsub.s32 0, %v942_v33  ;;  %v947_v37 = vsub.s32 1, %v942_v33 }
 0x16f   : > { %v1555_v0 = vpop.eup %1554  ;;  %v694_v1 = vsub.f32 %v646_v10, %v670_v3  ;;  %v730_v32 = vmax.f32 %v706_v61, 0.0 }
 0x170   : > { %v846_v6 = vmul.f32 %v1555_v0, %v750_v57  ;;  %v845_v13 = vmul.f32 %v1555_v0, %v749_v42  ;;  %1141 = vmatprep.mubr.f32.mxu1 %v870_v44  ;;  %v2497_v62 = vrot.slane %v939_v36, %v943_v19  ;;  %v2499_v38 = vrot.slane %v939_v36, %v947_v37 }
 0x171   : > { %v718_v8 = vmax.f32 %v694_v1, 0.0  ;;  %v802_v55 = vadd.f32 1e-12, %v730_v32  ;;  %1142 = vmatmul.mubr.f32.gmra.mrb[18].mxu1 %v869_v63 }
 0x172   : > { %1069 = vmatprep.mubr.f32.mxu0 %v846_v6 }
 0x173   : > { %v790_v49 = vadd.f32 1e-12, %v718_v8  ;;  %1070 = vmatmul.mubr.f32.gmra.mrb[18].mxu0 %v845_v13  ;;  %1560 = vrsqrt.f32 %v802_v55 }
 0x175   : > { %1562 = vrsqrt.f32 %v790_v49  ;;  %v1557_v23 = vpop.eup %1556 }
 0x176   : > { %v872_v45 = vmul.f32 %v1557_v23, %v776_v9  ;;  %v871_v16 = vmul.f32 %v1557_v23, %v775_v22 }
 0x177   : > { %v1559_v18 = vpop.eup %1558 }
 0x178   : > { %v848_v4 = vmul.f32 %v1559_v18, %v752_v53  ;;  %v847_v40 = vmul.f32 %v1559_v18, %v751_v2  ;;  %1147 = vmatprep.mubr.f32.mxu1 %v872_v45 }
 0x179   : > { %1148 = vmatmul.mubr.f32.gmra.mrb[20].mxu1 %v871_v16 }
 0x17a   : > { %1075 = vmatprep.mubr.f32.mxu0 %v848_v4 }
 0x17b   : > { %1076 = vmatmul.mubr.f32.gmra.mrb[20].mxu0 %v847_v40 }
 0x17d   : > { %v1561_v56 = vpop.eup %1560 }
 0x17e   : > { %v874_v54 = vmul.f32 %v1561_v56, %v778_v25  ;;  %v873_v39 = vmul.f32 %v1561_v56, %v777_v43 }
 0x17f   : > { %v1563_v46 = vpop.eup %1562 }
 0x180   : > { %v850_v50 = vmul.f32 %v1563_v46, %v754_v48  ;;  %v849_v51 = vmul.f32 %v1563_v46, %v753_v29  ;;  %1153 = vmatprep.mubr.f32.mxu1 %v874_v54 }
 0x181   : > { %1154 = vmatmul.mubr.f32.gmra.mrb[22].mxu1 %v873_v39 }
 0x182   : > { %1081 = vmatprep.mubr.f32.mxu0 %v850_v50 }
 0x183   : > { %1082 = vmatmul.mubr.f32.gmra.mrb[22].mxu0 %v849_v51 }
 0x1fc   : > { %v1017_v7 = vpop.f32.mrb[0].mxu0 }
 0x1fd   : > { %v1018_v20 = vadd.f32 %v1017_v7, %v2497_v62  ;;  %v1019_v5 = vpop.f32.mrb[1].mxu0 }
 0x1fe   : > { %v1020_v58 = vadd.f32 %v1019_v5, %v2499_v38 }
 0x1ff   : > { %1160 = vst [vmem:[%s2504_s9] sm:$0xff] %v1018_v20 }
 0x200   : > { %1161 = vst [vmem:[%s2504_s9 + $0x8] sm:$0xff] %v1020_v58  ;;  %v1089_v11 = vpop.f32.mrb[0].mxu1 }
 0x201   : > { %v1090_v21 = vadd.f32 %v1089_v11, %v2497_v62  ;;  %v1091_v59 = vpop.f32.mrb[1].mxu1 }
 0x202   : > { %v1092_v17 = vadd.f32 %v1091_v59, %v2499_v38 }
 0x203   : > { %1184 = vst [vmem:[%s2504_s9 + $0xc0] sm:$0xff] %v1090_v21 }
 0x204   : > { %1185 = vst [vmem:[%s2504_s9 + $0xc8] sm:$0xff] %v1092_v17  ;;  %v1095_v47 = vpop.f32.mrb[2].mxu1 }
 0x205   : > { %v1096_v41 = vadd.f32 %v1095_v47, %v2497_v62  ;;  %v1097_v30 = vpop.f32.mrb[3].mxu1 }
 0x206   : > { %v1023_v60 = vpop.f32.mrb[2].mxu0  ;;  %v1098_v3 = vadd.f32 %v1097_v30, %v2499_v38 }
 0x207   : > { %v1024_v35 = vadd.f32 %v1023_v60, %v2497_v62  ;;  %v1025_v26 = vpop.f32.mrb[3].mxu0  ;;  %1186 = vst [vmem:[%s2504_s9 + $0xd0] sm:$0xff] %v1096_v41 }
 0x208   : > { %v1026_v31 = vadd.f32 %v1025_v26, %v2499_v38  ;;  %1187 = vst [vmem:[%s2504_s9 + $0xd8] sm:$0xff] %v1098_v3 }
 0x209   : > { %1162 = vst [vmem:[%s2504_s9 + $0x10] sm:$0xff] %v1024_v35 }
 0x20a   : > { %1163 = vst [vmem:[%s2504_s9 + $0x18] sm:$0xff] %v1026_v31 }
 0x20c   : > { %v1101_v10 = vpop.f32.mrb[4].mxu1 }
 0x20d   : > { %v1102_v12 = vadd.f32 %v1101_v10, %v2497_v62  ;;  %v1103_v42 = vpop.f32.mrb[5].mxu1 }
 0x20e   : > { %v1029_v28 = vpop.f32.mrb[4].mxu0  ;;  %v1104_v61 = vadd.f32 %v1103_v42, %v2499_v38 }
 0x20f   : > { %v1030_v24 = vadd.f32 %v1029_v28, %v2497_v62  ;;  %v1031_v57 = vpop.f32.mrb[5].mxu0  ;;  %1188 = vst [vmem:[%s2504_s9 + $0xe0] sm:$0xff] %v1102_v12 }
 0x210   : > { %v1032_v0 = vadd.f32 %v1031_v57, %v2499_v38  ;;  %1189 = vst [vmem:[%s2504_s9 + $0xe8] sm:$0xff] %v1104_v61 }
 0x211   : > { %1164 = vst [vmem:[%s2504_s9 + $0x20] sm:$0xff] %v1030_v24 }
 0x212   : > { %1165 = vst [vmem:[%s2504_s9 + $0x28] sm:$0xff] %v1032_v0 }
 0x214   : > { %v1107_v1 = vpop.f32.mrb[6].mxu1 }
 0x215   : > { %v1108_v63 = vadd.f32 %v1107_v1, %v2497_v62  ;;  %v1109_v32 = vpop.f32.mrb[7].mxu1 }
 0x216   : > { %v1035_v44 = vpop.f32.mrb[6].mxu0  ;;  %v1110_v8 = vadd.f32 %v1109_v32, %v2499_v38 }
 0x217   : > { %v1036_v6 = vadd.f32 %v1035_v44, %v2497_v62  ;;  %v1037_v13 = vpop.f32.mrb[7].mxu0  ;;  %1190 = vst [vmem:[%s2504_s9 + $0xf0] sm:$0xff] %v1108_v63 }
 0x218   : > { %v1038_v55 = vadd.f32 %v1037_v13, %v2499_v38  ;;  %1191 = vst [vmem:[%s2504_s9 + $0xf8] sm:$0xff] %v1110_v8 }
 0x219   : > { %1166 = vst [vmem:[%s2504_s9 + $0x30] sm:$0xff] %v1036_v6 }
 0x21a   : > { %1167 = vst [vmem:[%s2504_s9 + $0x38] sm:$0xff] %v1038_v55 }
 0x21c   : > { %v1113_v49 = vpop.f32.mrb[8].mxu1 }
 0x21d   : > { %v1114_v22 = vadd.f32 %v1113_v49, %v2497_v62  ;;  %v1115_v34 = vpop.f32.mrb[9].mxu1 }
 0x21e   : > { %v1041_v52 = vpop.f32.mrb[8].mxu0  ;;  %v1116_v14 = vadd.f32 %v1115_v34, %v2499_v38 }
 0x21f   : > { %v1042_v9 = vadd.f32 %v1041_v52, %v2497_v62  ;;  %v1043_v23 = vpop.f32.mrb[9].mxu0  ;;  %1192 = vst [vmem:[%s2504_s9 + $0x100] sm:$0xff] %v1114_v22 }
 0x220   : > { %v1044_v2 = vadd.f32 %v1043_v23, %v2499_v38  ;;  %1193 = vst [vmem:[%s2504_s9 + $0x108] sm:$0xff] %v1116_v14 }
 0x221   : > { %1168 = vst [vmem:[%s2504_s9 + $0x40] sm:$0xff] %v1042_v9 }
 0x222   : > { %1169 = vst [vmem:[%s2504_s9 + $0x48] sm:$0xff] %v1044_v2 }
 0x224   : > { %v1119_v15 = vpop.f32.mrb[10].mxu1 }
 0x225   : > { %v1120_v18 = vadd.f32 %v1119_v15, %v2497_v62  ;;  %v1121_v45 = vpop.f32.mrb[11].mxu1 }
 0x226   : > { %v1047_v53 = vpop.f32.mrb[10].mxu0  ;;  %v1122_v40 = vadd.f32 %v1121_v45, %v2499_v38 }
 0x227   : > { %v1048_v16 = vadd.f32 %v1047_v53, %v2497_v62  ;;  %v1049_v4 = vpop.f32.mrb[11].mxu0  ;;  %1194 = vst [vmem:[%s2504_s9 + $0x110] sm:$0xff] %v1120_v18 }
 0x228   : > { %v1050_v43 = vadd.f32 %v1049_v4, %v2499_v38  ;;  %1195 = vst [vmem:[%s2504_s9 + $0x118] sm:$0xff] %v1122_v40 }
 0x229   : > { %1170 = vst [vmem:[%s2504_s9 + $0x50] sm:$0xff] %v1048_v16 }
 0x22a   : > { %1171 = vst [vmem:[%s2504_s9 + $0x58] sm:$0xff] %v1050_v43 }
 0x22c   : > { %v1125_v25 = vpop.f32.mrb[12].mxu1 }
 0x22d   : > { %v1126_v29 = vadd.f32 %v1125_v25, %v2497_v62  ;;  %v1127_v48 = vpop.f32.mrb[13].mxu1 }
 0x22e   : > { %v1053_v56 = vpop.f32.mrb[12].mxu0  ;;  %v1128_v39 = vadd.f32 %v1127_v48, %v2499_v38 }
 0x22f   : > { %v1054_v46 = vadd.f32 %v1053_v56, %v2497_v62  ;;  %v1055_v54 = vpop.f32.mrb[13].mxu0  ;;  %1196 = vst [vmem:[%s2504_s9 + $0x120] sm:$0xff] %v1126_v29 }
 0x230   : > { %v1056_v50 = vadd.f32 %v1055_v54, %v2499_v38  ;;  %1197 = vst [vmem:[%s2504_s9 + $0x128] sm:$0xff] %v1128_v39 }
 0x231   : > { %1172 = vst [vmem:[%s2504_s9 + $0x60] sm:$0xff] %v1054_v46 }
 0x232   : > { %1173 = vst [vmem:[%s2504_s9 + $0x68] sm:$0xff] %v1056_v50 }
 0x234   : > { %v1131_v51 = vpop.f32.mrb[14].mxu1 }
 0x235   : > { %v1132_v33 = vadd.f32 %v1131_v51, %v2497_v62  ;;  %v1133_v19 = vpop.f32.mrb[15].mxu1 }
 0x236   : > { %v1059_v27 = vpop.f32.mrb[14].mxu0  ;;  %v1134_v7 = vadd.f32 %v1133_v19, %v2499_v38 }
 0x237   : > { %v1060_v36 = vadd.f32 %v1059_v27, %v2497_v62  ;;  %v1061_v37 = vpop.f32.mrb[15].mxu0  ;;  %1198 = vst [vmem:[%s2504_s9 + $0x130] sm:$0xff] %v1132_v33 }
 0x238   : > { %v1062_v20 = vadd.f32 %v1061_v37, %v2499_v38  ;;  %1199 = vst [vmem:[%s2504_s9 + $0x138] sm:$0xff] %v1134_v7 }
 0x239   : > { %1174 = vst [vmem:[%s2504_s9 + $0x70] sm:$0xff] %v1060_v36 }
 0x23a   : > { %1175 = vst [vmem:[%s2504_s9 + $0x78] sm:$0xff] %v1062_v20 }
 0x23c   : > { %v1137_v5 = vpop.f32.mrb[16].mxu1 }
 0x23d   : > { %v1138_v11 = vadd.f32 %v1137_v5, %v2497_v62  ;;  %v1139_v21 = vpop.f32.mrb[17].mxu1 }
 0x23e   : > { %v1065_v58 = vpop.f32.mrb[16].mxu0  ;;  %v1140_v60 = vadd.f32 %v1139_v21, %v2499_v38 }
 0x23f   : > { %v1066_v59 = vadd.f32 %v1065_v58, %v2497_v62  ;;  %v1067_v17 = vpop.f32.mrb[17].mxu0  ;;  %1200 = vst [vmem:[%s2504_s9 + $0x140] sm:$0xff] %v1138_v11 }
 0x240   : > { %v1068_v47 = vadd.f32 %v1067_v17, %v2499_v38  ;;  %1201 = vst [vmem:[%s2504_s9 + $0x148] sm:$0xff] %v1140_v60 }
 0x241   : > { %1176 = vst [vmem:[%s2504_s9 + $0x80] sm:$0xff] %v1066_v59 }
 0x242   : > { %1177 = vst [vmem:[%s2504_s9 + $0x88] sm:$0xff] %v1068_v47 }
 0x244   : > { %v1143_v35 = vpop.f32.mrb[18].mxu1 }
 0x245   : > { %v1144_v26 = vadd.f32 %v1143_v35, %v2497_v62  ;;  %v1145_v30 = vpop.f32.mrb[19].mxu1 }
 0x246   : > { %v1071_v41 = vpop.f32.mrb[18].mxu0  ;;  %v1146_v10 = vadd.f32 %v1145_v30, %v2499_v38 }
 0x247   : > { %v1072_v31 = vadd.f32 %v1071_v41, %v2497_v62  ;;  %v1073_v3 = vpop.f32.mrb[19].mxu0  ;;  %1202 = vst [vmem:[%s2504_s9 + $0x150] sm:$0xff] %v1144_v26 }
 0x248   : > { %v1074_v28 = vadd.f32 %v1073_v3, %v2499_v38  ;;  %1203 = vst [vmem:[%s2504_s9 + $0x158] sm:$0xff] %v1146_v10 }
 0x249   : > { %1178 = vst [vmem:[%s2504_s9 + $0x90] sm:$0xff] %v1072_v31 }
 0x24a   : > { %1179 = vst [vmem:[%s2504_s9 + $0x98] sm:$0xff] %v1074_v28 }
 0x24c   : > { %v1149_v12 = vpop.f32.mrb[20].mxu1 }
 0x24d   : > { %v1150_v24 = vadd.f32 %v1149_v12, %v2497_v62  ;;  %v1151_v57 = vpop.f32.mrb[21].mxu1 }
 0x24e   : > { %v1077_v42 = vpop.f32.mrb[20].mxu0  ;;  %v1152_v1 = vadd.f32 %v1151_v57, %v2499_v38 }
 0x24f   : > { %v1078_v61 = vadd.f32 %v1077_v42, %v2497_v62  ;;  %v1079_v0 = vpop.f32.mrb[21].mxu0  ;;  %1204 = vst [vmem:[%s2504_s9 + $0x160] sm:$0xff] %v1150_v24 }
 0x250   : > { %v1080_v44 = vadd.f32 %v1079_v0, %v2499_v38  ;;  %1205 = vst [vmem:[%s2504_s9 + $0x168] sm:$0xff] %v1152_v1 }
 0x251   : > { %1180 = vst [vmem:[%s2504_s9 + $0xa0] sm:$0xff] %v1078_v61 }
 0x252   : > { %1181 = vst [vmem:[%s2504_s9 + $0xa8] sm:$0xff] %v1080_v44 }
 0x254   : > { %v1155_v63 = vpop.f32.mrb[22].mxu1 }
 0x255   : > { %v1156_v6 = vadd.f32 %v1155_v63, %v2497_v62  ;;  %v1157_v13 = vpop.f32.mrb[23].mxu1 }
 0x256   : > { %v1083_v32 = vpop.f32.mrb[22].mxu0  ;;  %v1158_v49 = vadd.f32 %v1157_v13, %v2499_v38 }
 0x257   : > { %v1084_v8 = vadd.f32 %v1083_v32, %v2497_v62  ;;  %v1085_v55 = vpop.f32.mrb[23].mxu0  ;;  %1206 = vst [vmem:[%s2504_s9 + $0x170] sm:$0xff] %v1156_v6 }
 0x258   : > { %v1086_v52 = vadd.f32 %v1085_v55, %v2499_v38  ;;  %1207 = vst [vmem:[%s2504_s9 + $0x178] sm:$0xff] %v1158_v49 }
 0x259   : > { %1182 = vst [vmem:[%s2504_s9 + $0xb0] sm:$0xff] %v1084_v8 }
 0x25a   : > { %1183 = vst [vmem:[%s2504_s9 + $0xb8] sm:$0xff] %v1086_v52 }
 0x25b   : > { %1665 = shalt.err (!%p1662_p6)
}
 0x25c   : > { %s1666_s28 = scalar_lea.hbm %s2600_s6, 6144  ;;  %s1670_s12 = scalar_lea.hbm %s2655_s4, 12288 }
 0x25d   : > { %p1667_p8 = scmp.ne.s32.totalorder %s2600_s6, %s1666_s28  ;;  %p1671_p4 = scmp.lt.u32.totalorder %s2600_s6, %s2655_s4 }
 0x25e   : > { %p1672_p11 = scmp.lt.u32.totalorder %s1670_s12, %s1666_s28  ;;  %p1674_p3 = scmp.lt.u32.totalorder %s1666_s28, %s2600_s6 }
 0x25f   : > { %p1668_p10 = pnand %p1667_p8, %p1855_p12 }
 0x260   : > { %p1673_p13 = por %p1672_p11, %p1671_p4 }
 0x261   : > { %p1669_p0 = pneg %p1668_p10 }
 0x262   : > { %p1675_p7 = por %p1674_p3, %p1673_p13 }
 0x264   : > { %p1676_p9 = pnand %p1675_p7, %p1669_p0 }
 0x266   : > { %1679 = shalt.err (!%p1676_p9)
}
 0x267   : > { %s1734_s8 = smov 256   ;;  %s1735_s9 = smov 16  }
 0x268   : > { %1458 = dma.vmem_to_hbm [thread:$0]  (%p1855_p12), %s2602_s11, 6144, %s2600_s6, %s1209_s19, %s1734_s8, %s1734_s8, %s1735_s9  }
 0x269 PF: > { %s1238_s5 = sand.u32 1, %s1714_s15   ;;  %p2711_p1 = scmp.ne.s32.totalorder %s2674_s22, 0 }
 0x26a   : > { %p2712_p5 = scmp.ge.s32.totalorder %s1726_s18, 2  ;;  %s1239_s29 = scalar_lea.sflag [#allocation4], %s1238_s5 }
 0x26c   : > { %p1472_p2 = pnand %p2712_p5, %p2711_p1 }
 0x26e   : > { %1709 = dma.done.wait (!%p1472_p2), %s1239_s29, 6144  }
 0x26f   : > { %1711 = vsyncadd (!%p1472_p2), %s1239_s29, 4294961152  ;;  %p20_p6 = scmp.ge.s32.totalorder %s1817_s27, 4   ;;  %s2713_s15 = smov %s1718_s16 }
 0x270   : > { %s2714_s16 = smov %s1722_s17  ;;  %s2715_s17 = smov %s1851_s24 }
 0x271   : > { %s2716_s18 = smov %s1817_s27  ;;  %22 = sbr.rel (!%p20_p6) target bundleno = 9 (0x9), region = 98 }
 0x278   :  { %1244 = vsyncpa [#allocation3], 1 }
 0x279   :  { %1246 = vsyncpa [#allocation3 + $0x1], 1 }
 0x27a   :  { %1247 = vsyncpa [#allocation6], 1 }
 0x27b   :  { %1249 = vsyncpa [#allocation6 + $0x1], 1 }
 0x27c   :  { %1250 = vsyncpa [#allocation4], 1 }
 0x27d   :  { %1252 = vsyncpa [#allocation4 + $0x1], 1 }

</bundles_post_ra>
